<compile_context>
chip_gen: v5e
topology: v5e:2x2
jax: 0.10.0
libtpu: 0.0.40
codegen_flags: <defaults>
</compile_context>

<pallas_src>
import functools

import numpy as np

import jax
import jax.numpy as jnp
from jax.experimental import pallas as pl
from jax.experimental.pallas import tpu as pltpu


# ----------------------------------------------------------------------------
# Fused 'same'-conv kernel: row-banded (block-Toeplitz over width) matmuls,
# bias + ReLU fused into the store.  Whole (batch-tile) problem lives in VMEM.
# ----------------------------------------------------------------------------
def _conv_band_kernel(x_ref, w_ref, b_ref, o_ref, *, apply_relu):
    # x_ref: (TB, H + k - 1, Wp*Cin)   spatially padded rows, (w, c) merged lanes
    # w_ref: (k, Wp*Cin, W*Cout)       one banded 2-D weight per row tap dy
    # b_ref: (1, W*Cout)               bias tiled over w
    # o_ref: (TB, H, W*Cout)
    TB, H, WC = o_ref.shape
    k = w_ref.shape[0]
    bias = b_ref[...]
    for b in range(TB):                       # static unroll, TB <= 8
        acc = jnp.zeros((H, WC), jnp.float32)
        for dy in range(k):                   # static unroll over row taps
            acc = acc + jnp.dot(x_ref[b, dy:dy + H, :], w_ref[dy],
                                preferred_element_type=jnp.float32)
        out = acc + bias
        if apply_relu:
            out = jnp.maximum(out, 0.0)
        o_ref[b, :, :] = out.astype(o_ref.dtype)


def conv2d_same_nhwc(x_nhwc, w_band, b_band, *, ksize, apply_relu):
    """k x k 'same' conv (stride 1) + optional ReLU.  x: (B, H, W, C) NHWC."""
    B, H, W, C = x_nhwc.shape
    k = ksize
    p = (k - 1) // 2
    Hp, Wp = H + 2 * p, W + 2 * p
    WC_out = w_band.shape[2]
    Cout = WC_out // W

    xp = jnp.pad(x_nhwc, ((0, 0), (p, p), (p, p), (0, 0)))   # tiny zero pad
    xr = xp.reshape(B, Hp, Wp * C)                           # free: merge (w, c) lanes

    # >= 2 batch tiles so both v7x TensorCores get work; cap the in-kernel
    # unroll at 8 images per tile.
    nb = max(2 if B >= 2 else 1, pl.cdiv(B, 8))
    TB = pl.cdiv(B, nb)
    Bp = nb * TB
    if Bp != B:
        xr = jnp.pad(xr, ((0, Bp - B), (0, 0), (0, 0)))

    out = pl.pallas_call(
        functools.partial(_conv_band_kernel, apply_relu=apply_relu),
        out_shape=jax.ShapeDtypeStruct((Bp, H, WC_out), x_nhwc.dtype),
        grid_spec=pltpu.PrefetchScalarGridSpec(
            num_scalar_prefetch=0,
            grid=(nb,),
            in_specs=[
                pl.BlockSpec((TB, Hp, Wp * C), lambda i: (i, 0, 0)),
                pl.BlockSpec((k, Wp * C, WC_out), lambda i: (0, 0, 0)),
                pl.BlockSpec((1, WC_out), lambda i: (0, 0)),
            ],
            out_specs=pl.BlockSpec((TB, H, WC_out), lambda i: (i, 0, 0)),
        ),
        compiler_params=pltpu.CompilerParams(
            dimension_semantics=("parallel",)),
        cost_estimate=pl.CostEstimate(
            flops=2 * B * H * W * (k * k * C) * Cout,          # true conv flops
            bytes_accessed=4 * (B * Hp * Wp * C + int(w_band.size)
                                + int(b_band.size) + B * H * W * Cout),
            transcendentals=0),
    )(xr, w_band, b_band)

    if Bp != B:
        out = out[:B]
    return out.reshape(B, H, W, Cout)                          # free reshape


def max_pool2d_nhwc(x, m):
    """F.max_pool2d(x, m) (stride=m, no padding) on NHWC; tiny XLA reshape-max."""
    B, H, W, C = x.shape
    Hc, Wc = (H // m) * m, (W // m) * m
    x = x[:, :Hc, :Wc, :]
    return x.reshape(B, Hc // m, m, Wc // m, m, C).max(axis=(2, 4))


# ----------------------------------------------------------------------------
# Fused dense tail: dense1+ReLU -> dense2+ReLU -> generator in ONE kernel.
# ----------------------------------------------------------------------------
def _dense_tail_kernel(x_ref, w1_ref, b1_ref, w2_ref, b2_ref, w3_ref, b3_ref,
                       o_ref):
    h = jnp.dot(x_ref[...], w1_ref[...], preferred_element_type=jnp.float32)
    h = jnp.maximum(h + b1_ref[...], 0.0)
    h = jnp.dot(h, w2_ref[...], preferred_element_type=jnp.float32)
    h = jnp.maximum(h + b2_ref[...], 0.0)
    o = jnp.dot(h, w3_ref[...], preferred_element_type=jnp.float32) + b3_ref[...]
    o_ref[...] = o.astype(o_ref.dtype)


def dense_tail(x2d, params):
    M = x2d.shape[0]
    w1, b1 = params['dense1_w'], params['dense1_b']
    w2, b2 = params['dense2_w'], params['dense2_b']
    w3, b3 = params['gen_w'], params['gen_b']
    N = w3.shape[1]
    operands = (x2d, w1, b1, w2, b2, w3, b3)
    return pl.pallas_call(
        _dense_tail_kernel,
        out_shape=jax.ShapeDtypeStruct((M, N), x2d.dtype),
        grid_spec=pltpu.PrefetchScalarGridSpec(
            num_scalar_prefetch=0,
            grid=(1,),
            in_specs=[pl.BlockSpec(a.shape, lambda i: (0, 0)) for a in operands],
            out_specs=pl.BlockSpec((M, N), lambda i: (0, 0)),
        ),
        compiler_params=pltpu.CompilerParams(
            dimension_semantics=("arbitrary",)),
        cost_estimate=pl.CostEstimate(
            flops=2 * M * (int(w1.size) + int(w2.size) + int(w3.size)),
            bytes_accessed=4 * (sum(int(a.size) for a in operands) + M * N),
            transcendentals=0),
    )(*operands)


# ----------------------------------------------------------------------------
# Parameter init (torch nn.Linear / nn.Conv2d default U(-1/sqrt(fan_in), ...)).
# ----------------------------------------------------------------------------
def _linear_init(key, n_out, n_in, dtype=jnp.float32):
    kw, kb = jax.random.split(key)
    bound = 1.0 / (n_in ** 0.5)
    w = jax.random.uniform(kw, (n_out, n_in), dtype, -bound, bound)
    b = jax.random.uniform(kb, (n_out,), dtype, -bound, bound)
    return w, b


def _conv_init(key, c_out, c_in, k, dtype=jnp.float32):
    kw, kb = jax.random.split(key)
    fan_in = c_in * k * k
    bound = 1.0 / (fan_in ** 0.5)
    w = jax.random.uniform(kw, (c_out, c_in, k, k), dtype, -bound, bound)
    b = jax.random.uniform(kb, (c_out,), dtype, -bound, bound)
    return w, b


def _spatial_after(h, w, lp):
    # 'same' convs preserve H,W; each maxpool halves (matches the module's
    # conv_output_size / maxpool2d_output_size formulas for even spatial dims).
    for mp in (lp['maxpool_1'], lp['maxpool_2'], lp['maxpool_3']):
        if mp is not None:
            h, w = h // mp, w // mp
    return h, w


def init_raw_params(key, channel_input, h_in, w_in, output_size, lp):
    ks = jax.random.split(key, 9)
    raw = {}
    raw['cnn1_w1'], raw['cnn1_b1'] = _conv_init(ks[0], lp['cnn1'], channel_input, lp['kernel_1'])
    raw['cnn1_w2'], raw['cnn1_b2'] = _conv_init(ks[1], lp['cnn1'], lp['cnn1'], lp['kernel_1'])
    raw['cnn2_w1'], raw['cnn2_b1'] = _conv_init(ks[2], lp['cnn2'], lp['cnn1'], lp['kernel_2'])
    raw['cnn2_w2'], raw['cnn2_b2'] = _conv_init(ks[3], lp['cnn2'], lp['cnn2'], lp['kernel_2'])
    raw['cnn3_w1'], raw['cnn3_b1'] = _conv_init(ks[4], lp['cnn3'], lp['cnn2'], lp['kernel_3'])
    raw['cnn3_w2'], raw['cnn3_b2'] = _conv_init(ks[5], lp['cnn3'], lp['cnn3'], lp['kernel_3'])
    h3, w3 = _spatial_after(h_in, w_in, lp)
    flat = lp['cnn3'] * h3 * w3
    raw['dense1_w'], raw['dense1_b'] = _linear_init(ks[6], lp['dense1'], flat)
    raw['dense2_w'], raw['dense2_b'] = _linear_init(ks[7], lp['dense2'], lp['dense1'])
    raw['gen_w'], raw['gen_b'] = _linear_init(ks[8], output_size, lp['dense2'])
    return raw


def _conv_band_params(w_oihw, bias, w_spatial, k):
    """Build the row-banded weights once at init (host-side numpy).

    band[dy, (w+dx)*Cin + ci, w*Cout + co] = w[co, ci, dy, dx]
    so   out[b, h, w, co] = sum_dy  x_pad[b, h+dy, :] @ band[dy]  (per image).
    """
    w = np.asarray(jax.device_get(w_oihw), np.float32)
    Cout, Cin = w.shape[0], w.shape[1]
    Wp = w_spatial + (k - 1)
    band = np.zeros((k, Wp * Cin, w_spatial * Cout), np.float32)
    for dy in range(k):
        for dx in range(k):
            blk = w[:, :, dy, dx].T                       # (Cin, Cout)
            for wo in range(w_spatial):
                r0 = (wo + dx) * Cin
                c0 = wo * Cout
                band[dy, r0:r0 + Cin, c0:c0 + Cout] = blk
    b = np.asarray(jax.device_get(bias), np.float32)
    b_band = np.tile(b, w_spatial).reshape(1, w_spatial * Cout)
    return jnp.asarray(band), jnp.asarray(b_band)


def prepare_params(raw, lp, channel_input, h_in, w_in):
    """Pre-band conv weights / pre-transpose dense weights ONCE at init."""
    p = {}
    h, w = h_in, w_in
    for blk, kk, mp in (('cnn1', lp['kernel_1'], lp['maxpool_1']),
                        ('cnn2', lp['kernel_2'], lp['maxpool_2']),
                        ('cnn3', lp['kernel_3'], lp['maxpool_3'])):
        p[blk + '_w1'], p[blk + '_b1'] = _conv_band_params(
            raw[blk + '_w1'], raw[blk + '_b1'], w, kk)
        p[blk + '_w2'], p[blk + '_b2'] = _conv_band_params(
            raw[blk + '_w2'], raw[blk + '_b2'], w, kk)
        if mp is not None:
            h, w = h // mp, w // mp
    h3, w3 = h, w
    c3 = lp['cnn3']
    # dense1 expects torch's NCHW flatten (c, h, w); our activations flatten
    # as NHWC (h, w, c) -> permute the weight's input axis accordingly.
    d1w = raw['dense1_w']
    d1 = d1w.shape[0]
    d1w = d1w.reshape(d1, c3, h3, w3).transpose(0, 2, 3, 1).reshape(d1, h3 * w3 * c3)
    p['dense1_w'] = d1w.T
    p['dense1_b'] = raw['dense1_b'].reshape(1, -1)
    p['dense2_w'] = raw['dense2_w'].T
    p['dense2_b'] = raw['dense2_b'].reshape(1, -1)
    p['gen_w'] = raw['gen_w'].T
    p['gen_b'] = raw['gen_b'].reshape(1, -1)
    return p


# ----------------------------------------------------------------------------
# Full Conv2dIntoDense forward (NHWC end-to-end).
# ----------------------------------------------------------------------------
def make_forward(lp):
    k1, k2, k3 = lp['kernel_1'], lp['kernel_2'], lp['kernel_3']
    mp1, mp2, mp3 = lp['maxpool_1'], lp['maxpool_2'], lp['maxpool_3']

    def cnn_block(h, params, pre, ksize, mp):
        # conv -> relu -> conv -> relu -> maxpool   (CNN2DDoubleMaxpool)
        h = conv2d_same_nhwc(h, params[pre + '_w1'], params[pre + '_b1'],
                             ksize=ksize, apply_relu=True)
        h = conv2d_same_nhwc(h, params[pre + '_w2'], params[pre + '_b2'],
                             ksize=ksize, apply_relu=True)
        if mp is not None:
            h = max_pool2d_nhwc(h, mp)
        # TODO(synk): BatchNorm2d / training-mode Dropout2d not implemented (inference path).
        return h

    @jax.jit
    def forward(params, x):
        # x: (bs, seq, C, H, W)  -- TimeDistributed flattens time into batch.
        bs, seq = x.shape[0], x.shape[1]
        h = x.reshape(bs * seq, *x.shape[2:])
        h = jnp.transpose(h, (0, 2, 3, 1))       # single NCHW -> NHWC entry transpose
        h = cnn_block(h, params, 'cnn1', k1, mp1)
        h = cnn_block(h, params, 'cnn2', k2, mp2)
        h = cnn_block(h, params, 'cnn3', k3, mp3)
        h = h.reshape(bs * seq, -1)              # flatten=True, (h, w, c) order
        out = dense_tail(h, params)              # dense1+ReLU -> dense2+ReLU -> Generator (lin=True)
        return out.reshape(bs, seq, -1)

    return forward


# ----------------------------------------------------------------------------
# Pure-JAX reference (HIGHEST precision, NCHW) for correctness checking.
# ----------------------------------------------------------------------------
def _max_pool2d_nchw(x, m):
    B, C, H, W = x.shape
    Hc, Wc = (H // m) * m, (W // m) * m
    x = x[:, :, :Hc, :Wc]
    return x.reshape(B, C, Hc // m, m, Wc // m, m).max(axis=(3, 5))


def ref_forward(raw, x, lp):
    hp = jax.lax.Precision.HIGHEST

    def conv(h, w, b, ksize):
        p = (ksize - 1) // 2
        y = jax.lax.conv_general_dilated(
            h, w, window_strides=(1, 1), padding=((p, p), (p, p)),
            dimension_numbers=('NCHW', 'OIHW', 'NCHW'), precision=hp)
        return y + b[None, :, None, None]

    bs, seq = x.shape[0], x.shape[1]
    h = x.reshape(bs * seq, *x.shape[2:])
    for blk, ksize, mp in (('cnn1', lp['kernel_1'], lp['maxpool_1']),
                           ('cnn2', lp['kernel_2'], lp['maxpool_2']),
                           ('cnn3', lp['kernel_3'], lp['maxpool_3'])):
        h = jax.nn.relu(conv(h, raw[blk + '_w1'], raw[blk + '_b1'], ksize))
        h = jax.nn.relu(conv(h, raw[blk + '_w2'], raw[blk + '_b2'], ksize))
        if mp is not None:
            h = _max_pool2d_nchw(h, mp)
    h = h.reshape(bs * seq, -1)
    h = jax.nn.relu(jnp.dot(h, raw['dense1_w'].T, precision=hp) + raw['dense1_b'])
    h = jax.nn.relu(jnp.dot(h, raw['dense2_w'].T, precision=hp) + raw['dense2_b'])
    out = jnp.dot(h, raw['gen_w'].T, precision=hp) + raw['gen_b']
    return out.reshape(bs, seq, -1)


if __name__ == "__main__":
    layers_param = dict(cnn1=8, kernel_1=3, maxpool_1=2,
                        cnn2=8, kernel_2=3, maxpool_2=2,
                        cnn3=16, kernel_3=3, maxpool_3=2,
                        dense1=32, dense2=16,
                        dropout=None, batch_norm=False)
    output_size = 10
    batch, time_size, channels, h_in, w_in = 2, 3, 1, 16, 16

    key = jax.random.PRNGKey(0)
    k_x, k_p = jax.random.split(key)
    x = jax.random.normal(k_x, (batch, time_size, channels, h_in, w_in), jnp.float32)

    raw = init_raw_params(k_p, channels, h_in, w_in, output_size, layers_param)
    params = prepare_params(raw, layers_param, channels, h_in, w_in)
    forward = make_forward(layers_param)

    out = jax.block_until_ready(forward(params, x))
    assert out.shape == (batch, time_size, output_size), out.shape

    ref = jax.block_until_ready(ref_forward(raw, x, layers_param))
    max_err = float(jnp.max(jnp.abs(out - ref)))
    assert jnp.allclose(out, ref, atol=2e-3, rtol=2e-3), f"mismatch vs reference: {max_err}"

    print("KERNEL_OK")
</pallas_src>

<mosaic_0001>
module attributes {stable_mosaic.version = 11 : i64} {
  func.func @_conv_band_kernel(%arg0: i32, %arg1: memref<3x18x18xf32, #tpu.memory_space<vmem>>, %arg2: memref<3x18x128xf32, #tpu.memory_space<vmem>>, %arg3: memref<1x128xf32, #tpu.memory_space<vmem>>, %arg4: memref<3x16x128xf32, #tpu.memory_space<vmem>>) attributes {dimension_semantics = [#tpu.dimension_semantics<parallel>], iteration_bounds = array<i64: 2>, scalar_prefetch = 0 : i64, scratch_operands = 0 : i64, tpu.core_type = #tpu.core_type<tc>, window_params = [{transform_indices = @transform_0, window_bounds = array<i64: 3, 18, 18>}, {pipeline_mode = #tpu.pipeline_mode<synchronous>, transform_indices = @transform_1, window_bounds = array<i64: 3, 18, 128>}, {pipeline_mode = #tpu.pipeline_mode<synchronous>, transform_indices = @transform_2, window_bounds = array<i64: 1, 128>}, {transform_indices = @transform_3, window_bounds = array<i64: 3, 16, 128>}]} {
    %c0 = arith.constant 0 : index
    %c0_0 = arith.constant 0 : index
    %0 = vector.load %arg3[%c0, %c0_0] : memref<1x128xf32, #tpu.memory_space<vmem>>, vector<1x128xf32>
    %cst = arith.constant 0.000000e+00 : f32
    %1 = vector.broadcast %cst : f32 to vector<16x128xf32>
    %c0_1 = arith.constant 0 : index
    %c0_2 = arith.constant 0 : index
    %c0_3 = arith.constant 0 : index
    %2 = vector.load %arg1[%c0_1, %c0_2, %c0_3] : memref<3x18x18xf32, #tpu.memory_space<vmem>>, vector<1x16x18xf32>
    %3 = vector.shape_cast %2 : vector<1x16x18xf32> to vector<16x18xf32>
    %c0_4 = arith.constant 0 : index
    %c0_5 = arith.constant 0 : index
    %c0_6 = arith.constant 0 : index
    %4 = vector.load %arg2[%c0_4, %c0_5, %c0_6] : memref<3x18x128xf32, #tpu.memory_space<vmem>>, vector<1x18x128xf32>
    %5 = vector.shape_cast %4 : vector<1x18x128xf32> to vector<18x128xf32>
    %cst_7 = arith.constant dense<0.000000e+00> : vector<16x128xf32>
    %6 = tpu.matmul %3, %5, %cst_7 {dimension_numbers = #tpu.dot_dimension_numbers<[1], [0], [0], [1], [0, 0, 1, 1], [], []>} : vector<16x18xf32>, vector<18x128xf32>, vector<16x128xf32> -> vector<16x128xf32>
    %7 = arith.addf %1, %6 : vector<16x128xf32>
    %c0_8 = arith.constant 0 : index
    %c1 = arith.constant 1 : index
    %c0_9 = arith.constant 0 : index
    %8 = vector.load %arg1[%c0_8, %c1, %c0_9] : memref<3x18x18xf32, #tpu.memory_space<vmem>>, vector<1x16x18xf32>
    %9 = vector.shape_cast %8 : vector<1x16x18xf32> to vector<16x18xf32>
    %c1_10 = arith.constant 1 : index
    %c0_11 = arith.constant 0 : index
    %c0_12 = arith.constant 0 : index
    %10 = vector.load %arg2[%c1_10, %c0_11, %c0_12] : memref<3x18x128xf32, #tpu.memory_space<vmem>>, vector<1x18x128xf32>
    %11 = vector.shape_cast %10 : vector<1x18x128xf32> to vector<18x128xf32>
    %cst_13 = arith.constant dense<0.000000e+00> : vector<16x128xf32>
    %12 = tpu.matmul %9, %11, %cst_13 {dimension_numbers = #tpu.dot_dimension_numbers<[1], [0], [0], [1], [0, 0, 1, 1], [], []>} : vector<16x18xf32>, vector<18x128xf32>, vector<16x128xf32> -> vector<16x128xf32>
    %13 = arith.addf %7, %12 : vector<16x128xf32>
    %c0_14 = arith.constant 0 : index
    %c2 = arith.constant 2 : index
    %c0_15 = arith.constant 0 : index
    %14 = vector.load %arg1[%c0_14, %c2, %c0_15] : memref<3x18x18xf32, #tpu.memory_space<vmem>>, vector<1x16x18xf32>
    %15 = vector.shape_cast %14 : vector<1x16x18xf32> to vector<16x18xf32>
    %c2_16 = arith.constant 2 : index
    %c0_17 = arith.constant 0 : index
    %c0_18 = arith.constant 0 : index
    %16 = vector.load %arg2[%c2_16, %c0_17, %c0_18] : memref<3x18x128xf32, #tpu.memory_space<vmem>>, vector<1x18x128xf32>
    %17 = vector.shape_cast %16 : vector<1x18x128xf32> to vector<18x128xf32>
    %cst_19 = arith.constant dense<0.000000e+00> : vector<16x128xf32>
    %18 = tpu.matmul %15, %17, %cst_19 {dimension_numbers = #tpu.dot_dimension_numbers<[1], [0], [0], [1], [0, 0, 1, 1], [], []>} : vector<16x18xf32>, vector<18x128xf32>, vector<16x128xf32> -> vector<16x128xf32>
    %19 = arith.addf %13, %18 : vector<16x128xf32>
    %20 = vector.broadcast %0 : vector<1x128xf32> to vector<16x128xf32>
    %21 = arith.addf %19, %20 : vector<16x128xf32>
    %cst_20 = arith.constant 0.000000e+00 : f32
    %22 = vector.broadcast %cst_20 : f32 to vector<16x128xf32>
    %23 = arith.maximumf %21, %22 : vector<16x128xf32>
    %c0_21 = arith.constant 0 : index
    %c0_22 = arith.constant 0 : index
    %c0_23 = arith.constant 0 : index
    %24 = vector.load %arg4[%c0_21, %c0_22, %c0_23] : memref<3x16x128xf32, #tpu.memory_space<vmem>>, vector<1x16x128xf32>
    %25 = vector.shape_cast %24 : vector<1x16x128xf32> to vector<16x128xf32>
    %26 = vector.shape_cast %23 : vector<16x128xf32> to vector<1x16x128xf32>
    tpu.vector_store %arg4[%c0_21, %c0_22, %c0_23], %26 {strides = array<i32>} : memref<3x16x128xf32, #tpu.memory_space<vmem>>, vector<1x16x128xf32>,
    %cst_24 = arith.constant 0.000000e+00 : f32
    %27 = vector.broadcast %cst_24 : f32 to vector<16x128xf32>
    %c1_25 = arith.constant 1 : index
    %c0_26 = arith.constant 0 : index
    %c0_27 = arith.constant 0 : index
    %28 = vector.load %arg1[%c1_25, %c0_26, %c0_27] : memref<3x18x18xf32, #tpu.memory_space<vmem>>, vector<1x16x18xf32>
    %29 = vector.shape_cast %28 : vector<1x16x18xf32> to vector<16x18xf32>
    %c0_28 = arith.constant 0 : index
    %c0_29 = arith.constant 0 : index
    %c0_30 = arith.constant 0 : index
    %30 = vector.load %arg2[%c0_28, %c0_29, %c0_30] : memref<3x18x128xf32, #tpu.memory_space<vmem>>, vector<1x18x128xf32>
    %31 = vector.shape_cast %30 : vector<1x18x128xf32> to vector<18x128xf32>
    %cst_31 = arith.constant dense<0.000000e+00> : vector<16x128xf32>
    %32 = tpu.matmul %29, %31, %cst_31 {dimension_numbers = #tpu.dot_dimension_numbers<[1], [0], [0], [1], [0, 0, 1, 1], [], []>} : vector<16x18xf32>, vector<18x128xf32>, vector<16x128xf32> -> vector<16x128xf32>
    %33 = arith.addf %27, %32 : vector<16x128xf32>
    %c1_32 = arith.constant 1 : index
    %c1_33 = arith.constant 1 : index
    %c0_34 = arith.constant 0 : index
    %34 = vector.load %arg1[%c1_32, %c1_33, %c0_34] : memref<3x18x18xf32, #tpu.memory_space<vmem>>, vector<1x16x18xf32>
    %35 = vector.shape_cast %34 : vector<1x16x18xf32> to vector<16x18xf32>
    %c1_35 = arith.constant 1 : index
    %c0_36 = arith.constant 0 : index
    %c0_37 = arith.constant 0 : index
    %36 = vector.load %arg2[%c1_35, %c0_36, %c0_37] : memref<3x18x128xf32, #tpu.memory_space<vmem>>, vector<1x18x128xf32>
    %37 = vector.shape_cast %36 : vector<1x18x128xf32> to vector<18x128xf32>
    %cst_38 = arith.constant dense<0.000000e+00> : vector<16x128xf32>
    %38 = tpu.matmul %35, %37, %cst_38 {dimension_numbers = #tpu.dot_dimension_numbers<[1], [0], [0], [1], [0, 0, 1, 1], [], []>} : vector<16x18xf32>, vector<18x128xf32>, vector<16x128xf32> -> vector<16x128xf32>
    %39 = arith.addf %33, %38 : vector<16x128xf32>
    %c1_39 = arith.constant 1 : index
    %c2_40 = arith.constant 2 : index
    %c0_41 = arith.constant 0 : index
    %40 = vector.load %arg1[%c1_39, %c2_40, %c0_41] : memref<3x18x18xf32, #tpu.memory_space<vmem>>, vector<1x16x18xf32>
    %41 = vector.shape_cast %40 : vector<1x16x18xf32> to vector<16x18xf32>
    %c2_42 = arith.constant 2 : index
    %c0_43 = arith.constant 0 : index
    %c0_44 = arith.constant 0 : index
    %42 = vector.load %arg2[%c2_42, %c0_43, %c0_44] : memref<3x18x128xf32, #tpu.memory_space<vmem>>, vector<1x18x128xf32>
    %43 = vector.shape_cast %42 : vector<1x18x128xf32> to vector<18x128xf32>
    %cst_45 = arith.constant dense<0.000000e+00> : vector<16x128xf32>
    %44 = tpu.matmul %41, %43, %cst_45 {dimension_numbers = #tpu.dot_dimension_numbers<[1], [0], [0], [1], [0, 0, 1, 1], [], []>} : vector<16x18xf32>, vector<18x128xf32>, vector<16x128xf32> -> vector<16x128xf32>
    %45 = arith.addf %39, %44 : vector<16x128xf32>
    %46 = vector.broadcast %0 : vector<1x128xf32> to vector<16x128xf32>
    %47 = arith.addf %45, %46 : vector<16x128xf32>
    %cst_46 = arith.constant 0.000000e+00 : f32
    %48 = vector.broadcast %cst_46 : f32 to vector<16x128xf32>
    %49 = arith.maximumf %47, %48 : vector<16x128xf32>
    %c1_47 = arith.constant 1 : index
    %c0_48 = arith.constant 0 : index
    %c0_49 = arith.constant 0 : index
    %50 = vector.load %arg4[%c1_47, %c0_48, %c0_49] : memref<3x16x128xf32, #tpu.memory_space<vmem>>, vector<1x16x128xf32>
    %51 = vector.shape_cast %50 : vector<1x16x128xf32> to vector<16x128xf32>
    %52 = vector.shape_cast %49 : vector<16x128xf32> to vector<1x16x128xf32>
    tpu.vector_store %arg4[%c1_47, %c0_48, %c0_49], %52 {strides = array<i32>} : memref<3x16x128xf32, #tpu.memory_space<vmem>>, vector<1x16x128xf32>,
    %cst_50 = arith.constant 0.000000e+00 : f32
    %53 = vector.broadcast %cst_50 : f32 to vector<16x128xf32>
    %c2_51 = arith.constant 2 : index
    %c0_52 = arith.constant 0 : index
    %c0_53 = arith.constant 0 : index
    %54 = vector.load %arg1[%c2_51, %c0_52, %c0_53] : memref<3x18x18xf32, #tpu.memory_space<vmem>>, vector<1x16x18xf32>
    %55 = vector.shape_cast %54 : vector<1x16x18xf32> to vector<16x18xf32>
    %c0_54 = arith.constant 0 : index
    %c0_55 = arith.constant 0 : index
    %c0_56 = arith.constant 0 : index
    %56 = vector.load %arg2[%c0_54, %c0_55, %c0_56] : memref<3x18x128xf32, #tpu.memory_space<vmem>>, vector<1x18x128xf32>
    %57 = vector.shape_cast %56 : vector<1x18x128xf32> to vector<18x128xf32>
    %cst_57 = arith.constant dense<0.000000e+00> : vector<16x128xf32>
    %58 = tpu.matmul %55, %57, %cst_57 {dimension_numbers = #tpu.dot_dimension_numbers<[1], [0], [0], [1], [0, 0, 1, 1], [], []>} : vector<16x18xf32>, vector<18x128xf32>, vector<16x128xf32> -> vector<16x128xf32>
    %59 = arith.addf %53, %58 : vector<16x128xf32>
    %c2_58 = arith.constant 2 : index
    %c1_59 = arith.constant 1 : index
    %c0_60 = arith.constant 0 : index
    %60 = vector.load %arg1[%c2_58, %c1_59, %c0_60] : memref<3x18x18xf32, #tpu.memory_space<vmem>>, vector<1x16x18xf32>
    %61 = vector.shape_cast %60 : vector<1x16x18xf32> to vector<16x18xf32>
    %c1_61 = arith.constant 1 : index
    %c0_62 = arith.constant 0 : index
    %c0_63 = arith.constant 0 : index
    %62 = vector.load %arg2[%c1_61, %c0_62, %c0_63] : memref<3x18x128xf32, #tpu.memory_space<vmem>>, vector<1x18x128xf32>
    %63 = vector.shape_cast %62 : vector<1x18x128xf32> to vector<18x128xf32>
    %cst_64 = arith.constant dense<0.000000e+00> : vector<16x128xf32>
    %64 = tpu.matmul %61, %63, %cst_64 {dimension_numbers = #tpu.dot_dimension_numbers<[1], [0], [0], [1], [0, 0, 1, 1], [], []>} : vector<16x18xf32>, vector<18x128xf32>, vector<16x128xf32> -> vector<16x128xf32>
    %65 = arith.addf %59, %64 : vector<16x128xf32>
    %c2_65 = arith.constant 2 : index
    %c2_66 = arith.constant 2 : index
    %c0_67 = arith.constant 0 : index
    %66 = vector.load %arg1[%c2_65, %c2_66, %c0_67] : memref<3x18x18xf32, #tpu.memory_space<vmem>>, vector<1x16x18xf32>
    %67 = vector.shape_cast %66 : vector<1x16x18xf32> to vector<16x18xf32>
    %c2_68 = arith.constant 2 : index
    %c0_69 = arith.constant 0 : index
    %c0_70 = arith.constant 0 : index
    %68 = vector.load %arg2[%c2_68, %c0_69, %c0_70] : memref<3x18x128xf32, #tpu.memory_space<vmem>>, vector<1x18x128xf32>
    %69 = vector.shape_cast %68 : vector<1x18x128xf32> to vector<18x128xf32>
    %cst_71 = arith.constant dense<0.000000e+00> : vector<16x128xf32>
    %70 = tpu.matmul %67, %69, %cst_71 {dimension_numbers = #tpu.dot_dimension_numbers<[1], [0], [0], [1], [0, 0, 1, 1], [], []>} : vector<16x18xf32>, vector<18x128xf32>, vector<16x128xf32> -> vector<16x128xf32>
    %71 = arith.addf %65, %70 : vector<16x128xf32>
    %72 = vector.broadcast %0 : vector<1x128xf32> to vector<16x128xf32>
    %73 = arith.addf %71, %72 : vector<16x128xf32>
    %cst_72 = arith.constant 0.000000e+00 : f32
    %74 = vector.broadcast %cst_72 : f32 to vector<16x128xf32>
    %75 = arith.maximumf %73, %74 : vector<16x128xf32>
    %c2_73 = arith.constant 2 : index
    %c0_74 = arith.constant 0 : index
    %c0_75 = arith.constant 0 : index
    %76 = vector.load %arg4[%c2_73, %c0_74, %c0_75] : memref<3x16x128xf32, #tpu.memory_space<vmem>>, vector<1x16x128xf32>
    %77 = vector.shape_cast %76 : vector<1x16x128xf32> to vector<16x128xf32>
    %78 = vector.shape_cast %75 : vector<16x128xf32> to vector<1x16x128xf32>
    tpu.vector_store %arg4[%c2_73, %c0_74, %c0_75], %78 {strides = array<i32>} : memref<3x16x128xf32, #tpu.memory_space<vmem>>, vector<1x16x128xf32>,
    return
  }
  func.func @transform_0(%arg0: i32) -> (i32, i32, i32) {
    %c0_i32 = arith.constant 0 : i32
    %c0_i32_0 = arith.constant 0 : i32
    %c0_i32_1 = arith.constant 0 : i32
    return %arg0, %c0_i32, %c0_i32_0 : i32, i32, i32
  }
  func.func @transform_1(%arg0: i32) -> (i32, i32, i32) {
    %c0_i32 = arith.constant 0 : i32
    %c0_i32_0 = arith.constant 0 : i32
    %c0_i32_1 = arith.constant 0 : i32
    %c0_i32_2 = arith.constant 0 : i32
    return %c0_i32, %c0_i32_0, %c0_i32_1 : i32, i32, i32
  }
  func.func @transform_2(%arg0: i32) -> (i32, i32) {
    %c0_i32 = arith.constant 0 : i32
    %c0_i32_0 = arith.constant 0 : i32
    %c0_i32_1 = arith.constant 0 : i32
    return %c0_i32, %c0_i32_0 : i32, i32
  }
  func.func @transform_3(%arg0: i32) -> (i32, i32, i32) {
    %c0_i32 = arith.constant 0 : i32
    %c0_i32_0 = arith.constant 0 : i32
    %c0_i32_1 = arith.constant 0 : i32
    return %arg0, %c0_i32, %c0_i32_0 : i32, i32, i32
  }
}

module attributes {stable_mosaic.version = 11 : i64} {
  func.func @_conv_band_kernel(%arg0: i32, %arg1: memref<3x18x144xf32, #tpu.memory_space<vmem>>, %arg2: memref<3x144x128xf32, #tpu.memory_space<vmem>>, %arg3: memref<1x128xf32, #tpu.memory_space<vmem>>, %arg4: memref<3x16x128xf32, #tpu.memory_space<vmem>>) attributes {dimension_semantics = [#tpu.dimension_semantics<parallel>], iteration_bounds = array<i64: 2>, scalar_prefetch = 0 : i64, scratch_operands = 0 : i64, tpu.core_type = #tpu.core_type<tc>, window_params = [{transform_indices = @transform_0, window_bounds = array<i64: 3, 18, 144>}, {pipeline_mode = #tpu.pipeline_mode<synchronous>, transform_indices = @transform_1, window_bounds = array<i64: 3, 144, 128>}, {pipeline_mode = #tpu.pipeline_mode<synchronous>, transform_indices = @transform_2, window_bounds = array<i64: 1, 128>}, {transform_indices = @transform_3, window_bounds = array<i64: 3, 16, 128>}]} {
    %c0 = arith.constant 0 : index
    %c0_0 = arith.constant 0 : index
    %0 = vector.load %arg3[%c0, %c0_0] : memref<1x128xf32, #tpu.memory_space<vmem>>, vector<1x128xf32>
    %cst = arith.constant 0.000000e+00 : f32
    %1 = vector.broadcast %cst : f32 to vector<16x128xf32>
    %c0_1 = arith.constant 0 : index
    %c0_2 = arith.constant 0 : index
    %c0_3 = arith.constant 0 : index
    %2 = vector.load %arg1[%c0_1, %c0_2, %c0_3] : memref<3x18x144xf32, #tpu.memory_space<vmem>>, vector<1x16x144xf32>
    %3 = vector.shape_cast %2 : vector<1x16x144xf32> to vector<16x144xf32>
    %c0_4 = arith.constant 0 : index
    %c0_5 = arith.constant 0 : index
    %c0_6 = arith.constant 0 : index
    %4 = vector.load %arg2[%c0_4, %c0_5, %c0_6] : memref<3x144x128xf32, #tpu.memory_space<vmem>>, vector<1x144x128xf32>
    %5 = vector.shape_cast %4 : vector<1x144x128xf32> to vector<144x128xf32>
    %cst_7 = arith.constant dense<0.000000e+00> : vector<16x128xf32>
    %6 = tpu.matmul %3, %5, %cst_7 {dimension_numbers = #tpu.dot_dimension_numbers<[1], [0], [0], [1], [0, 0, 1, 1], [], []>} : vector<16x144xf32>, vector<144x128xf32>, vector<16x128xf32> -> vector<16x128xf32>
    %7 = arith.addf %1, %6 : vector<16x128xf32>
    %c0_8 = arith.constant 0 : index
    %c1 = arith.constant 1 : index
    %c0_9 = arith.constant 0 : index
    %8 = vector.load %arg1[%c0_8, %c1, %c0_9] : memref<3x18x144xf32, #tpu.memory_space<vmem>>, vector<1x16x144xf32>
    %9 = vector.shape_cast %8 : vector<1x16x144xf32> to vector<16x144xf32>
    %c1_10 = arith.constant 1 : index
    %c0_11 = arith.constant 0 : index
    %c0_12 = arith.constant 0 : index
    %10 = vector.load %arg2[%c1_10, %c0_11, %c0_12] : memref<3x144x128xf32, #tpu.memory_space<vmem>>, vector<1x144x128xf32>
    %11 = vector.shape_cast %10 : vector<1x144x128xf32> to vector<144x128xf32>
    %cst_13 = arith.constant dense<0.000000e+00> : vector<16x128xf32>
    %12 = tpu.matmul %9, %11, %cst_13 {dimension_numbers = #tpu.dot_dimension_numbers<[1], [0], [0], [1], [0, 0, 1, 1], [], []>} : vector<16x144xf32>, vector<144x128xf32>, vector<16x128xf32> -> vector<16x128xf32>
    %13 = arith.addf %7, %12 : vector<16x128xf32>
    %c0_14 = arith.constant 0 : index
    %c2 = arith.constant 2 : index
    %c0_15 = arith.constant 0 : index
    %14 = vector.load %arg1[%c0_14, %c2, %c0_15] : memref<3x18x144xf32, #tpu.memory_space<vmem>>, vector<1x16x144xf32>
    %15 = vector.shape_cast %14 : vector<1x16x144xf32> to vector<16x144xf32>
    %c2_16 = arith.constant 2 : index
    %c0_17 = arith.constant 0 : index
    %c0_18 = arith.constant 0 : index
    %16 = vector.load %arg2[%c2_16, %c0_17, %c0_18] : memref<3x144x128xf32, #tpu.memory_space<vmem>>, vector<1x144x128xf32>
    %17 = vector.shape_cast %16 : vector<1x144x128xf32> to vector<144x128xf32>
    %cst_19 = arith.constant dense<0.000000e+00> : vector<16x128xf32>
    %18 = tpu.matmul %15, %17, %cst_19 {dimension_numbers = #tpu.dot_dimension_numbers<[1], [0], [0], [1], [0, 0, 1, 1], [], []>} : vector<16x144xf32>, vector<144x128xf32>, vector<16x128xf32> -> vector<16x128xf32>
    %19 = arith.addf %13, %18 : vector<16x128xf32>
    %20 = vector.broadcast %0 : vector<1x128xf32> to vector<16x128xf32>
    %21 = arith.addf %19, %20 : vector<16x128xf32>
    %cst_20 = arith.constant 0.000000e+00 : f32
    %22 = vector.broadcast %cst_20 : f32 to vector<16x128xf32>
    %23 = arith.maximumf %21, %22 : vector<16x128xf32>
    %c0_21 = arith.constant 0 : index
    %c0_22 = arith.constant 0 : index
    %c0_23 = arith.constant 0 : index
    %24 = vector.load %arg4[%c0_21, %c0_22, %c0_23] : memref<3x16x128xf32, #tpu.memory_space<vmem>>, vector<1x16x128xf32>
    %25 = vector.shape_cast %24 : vector<1x16x128xf32> to vector<16x128xf32>
    %26 = vector.shape_cast %23 : vector<16x128xf32> to vector<1x16x128xf32>
    tpu.vector_store %arg4[%c0_21, %c0_22, %c0_23], %26 {strides = array<i32>} : memref<3x16x128xf32, #tpu.memory_space<vmem>>, vector<1x16x128xf32>,
    %cst_24 = arith.constant 0.000000e+00 : f32
    %27 = vector.broadcast %cst_24 : f32 to vector<16x128xf32>
    %c1_25 = arith.constant 1 : index
    %c0_26 = arith.constant 0 : index
    %c0_27 = arith.constant 0 : index
    %28 = vector.load %arg1[%c1_25, %c0_26, %c0_27] : memref<3x18x144xf32, #tpu.memory_space<vmem>>, vector<1x16x144xf32>
    %29 = vector.shape_cast %28 : vector<1x16x144xf32> to vector<16x144xf32>
    %c0_28 = arith.constant 0 : index
    %c0_29 = arith.constant 0 : index
    %c0_30 = arith.constant 0 : index
    %30 = vector.load %arg2[%c0_28, %c0_29, %c0_30] : memref<3x144x128xf32, #tpu.memory_space<vmem>>, vector<1x144x128xf32>
    %31 = vector.shape_cast %30 : vector<1x144x128xf32> to vector<144x128xf32>
    %cst_31 = arith.constant dense<0.000000e+00> : vector<16x128xf32>
    %32 = tpu.matmul %29, %31, %cst_31 {dimension_numbers = #tpu.dot_dimension_numbers<[1], [0], [0], [1], [0, 0, 1, 1], [], []>} : vector<16x144xf32>, vector<144x128xf32>, vector<16x128xf32> -> vector<16x128xf32>
    %33 = arith.addf %27, %32 : vector<16x128xf32>
    %c1_32 = arith.constant 1 : index
    %c1_33 = arith.constant 1 : index
    %c0_34 = arith.constant 0 : index
    %34 = vector.load %arg1[%c1_32, %c1_33, %c0_34] : memref<3x18x144xf32, #tpu.memory_space<vmem>>, vector<1x16x144xf32>
    %35 = vector.shape_cast %34 : vector<1x16x144xf32> to vector<16x144xf32>
    %c1_35 = arith.constant 1 : index
    %c0_36 = arith.constant 0 : index
    %c0_37 = arith.constant 0 : index
    %36 = vector.load %arg2[%c1_35, %c0_36, %c0_37] : memref<3x144x128xf32, #tpu.memory_space<vmem>>, vector<1x144x128xf32>
    %37 = vector.shape_cast %36 : vector<1x144x128xf32> to vector<144x128xf32>
    %cst_38 = arith.constant dense<0.000000e+00> : vector<16x128xf32>
    %38 = tpu.matmul %35, %37, %cst_38 {dimension_numbers = #tpu.dot_dimension_numbers<[1], [0], [0], [1], [0, 0, 1, 1], [], []>} : vector<16x144xf32>, vector<144x128xf32>, vector<16x128xf32> -> vector<16x128xf32>
    %39 = arith.addf %33, %38 : vector<16x128xf32>
    %c1_39 = arith.constant 1 : index
    %c2_40 = arith.constant 2 : index
    %c0_41 = arith.constant 0 : index
    %40 = vector.load %arg1[%c1_39, %c2_40, %c0_41] : memref<3x18x144xf32, #tpu.memory_space<vmem>>, vector<1x16x144xf32>
    %41 = vector.shape_cast %40 : vector<1x16x144xf32> to vector<16x144xf32>
    %c2_42 = arith.constant 2 : index
    %c0_43 = arith.constant 0 : index
    %c0_44 = arith.constant 0 : index
    %42 = vector.load %arg2[%c2_42, %c0_43, %c0_44] : memref<3x144x128xf32, #tpu.memory_space<vmem>>, vector<1x144x128xf32>
    %43 = vector.shape_cast %42 : vector<1x144x128xf32> to vector<144x128xf32>
    %cst_45 = arith.constant dense<0.000000e+00> : vector<16x128xf32>
    %44 = tpu.matmul %41, %43, %cst_45 {dimension_numbers = #tpu.dot_dimension_numbers<[1], [0], [0], [1], [0, 0, 1, 1], [], []>} : vector<16x144xf32>, vector<144x128xf32>, vector<16x128xf32> -> vector<16x128xf32>
    %45 = arith.addf %39, %44 : vector<16x128xf32>
    %46 = vector.broadcast %0 : vector<1x128xf32> to vector<16x128xf32>
    %47 = arith.addf %45, %46 : vector<16x128xf32>
    %cst_46 = arith.constant 0.000000e+00 : f32
    %48 = vector.broadcast %cst_46 : f32 to vector<16x128xf32>
    %49 = arith.maximumf %47, %48 : vector<16x128xf32>
    %c1_47 = arith.constant 1 : index
    %c0_48 = arith.constant 0 : index
    %c0_49 = arith.constant 0 : index
    %50 = vector.load %arg4[%c1_47, %c0_48, %c0_49] : memref<3x16x128xf32, #tpu.memory_space<vmem>>, vector<1x16x128xf32>
    %51 = vector.shape_cast %50 : vector<1x16x128xf32> to vector<16x128xf32>
    %52 = vector.shape_cast %49 : vector<16x128xf32> to vector<1x16x128xf32>
    tpu.vector_store %arg4[%c1_47, %c0_48, %c0_49], %52 {strides = array<i32>} : memref<3x16x128xf32, #tpu.memory_space<vmem>>, vector<1x16x128xf32>,
    %cst_50 = arith.constant 0.000000e+00 : f32
    %53 = vector.broadcast %cst_50 : f32 to vector<16x128xf32>
    %c2_51 = arith.constant 2 : index
    %c0_52 = arith.constant 0 : index
    %c0_53 = arith.constant 0 : index
    %54 = vector.load %arg1[%c2_51, %c0_52, %c0_53] : memref<3x18x144xf32, #tpu.memory_space<vmem>>, vector<1x16x144xf32>
    %55 = vector.shape_cast %54 : vector<1x16x144xf32> to vector<16x144xf32>
    %c0_54 = arith.constant 0 : index
    %c0_55 = arith.constant 0 : index
    %c0_56 = arith.constant 0 : index
    %56 = vector.load %arg2[%c0_54, %c0_55, %c0_56] : memref<3x144x128xf32, #tpu.memory_space<vmem>>, vector<1x144x128xf32>
    %57 = vector.shape_cast %56 : vector<1x144x128xf32> to vector<144x128xf32>
    %cst_57 = arith.constant dense<0.000000e+00> : vector<16x128xf32>
    %58 = tpu.matmul %55, %57, %cst_57 {dimension_numbers = #tpu.dot_dimension_numbers<[1], [0], [0], [1], [0, 0, 1, 1], [], []>} : vector<16x144xf32>, vector<144x128xf32>, vector<16x128xf32> -> vector<16x128xf32>
    %59 = arith.addf %53, %58 : vector<16x128xf32>
    %c2_58 = arith.constant 2 : index
    %c1_59 = arith.constant 1 : index
    %c0_60 = arith.constant 0 : index
    %60 = vector.load %arg1[%c2_58, %c1_59, %c0_60] : memref<3x18x144xf32, #tpu.memory_space<vmem>>, vector<1x16x144xf32>
    %61 = vector.shape_cast %60 : vector<1x16x144xf32> to vector<16x144xf32>
    %c1_61 = arith.constant 1 : index
    %c0_62 = arith.constant 0 : index
    %c0_63 = arith.constant 0 : index
    %62 = vector.load %arg2[%c1_61, %c0_62, %c0_63] : memref<3x144x128xf32, #tpu.memory_space<vmem>>, vector<1x144x128xf32>
    %63 = vector.shape_cast %62 : vector<1x144x128xf32> to vector<144x128xf32>
    %cst_64 = arith.constant dense<0.000000e+00> : vector<16x128xf32>
    %64 = tpu.matmul %61, %63, %cst_64 {dimension_numbers = #tpu.dot_dimension_numbers<[1], [0], [0], [1], [0, 0, 1, 1], [], []>} : vector<16x144xf32>, vector<144x128xf32>, vector<16x128xf32> -> vector<16x128xf32>
    %65 = arith.addf %59, %64 : vector<16x128xf32>
    %c2_65 = arith.constant 2 : index
    %c2_66 = arith.constant 2 : index
    %c0_67 = arith.constant 0 : index
    %66 = vector.load %arg1[%c2_65, %c2_66, %c0_67] : memref<3x18x144xf32, #tpu.memory_space<vmem>>, vector<1x16x144xf32>
    %67 = vector.shape_cast %66 : vector<1x16x144xf32> to vector<16x144xf32>
    %c2_68 = arith.constant 2 : index
    %c0_69 = arith.constant 0 : index
    %c0_70 = arith.constant 0 : index
    %68 = vector.load %arg2[%c2_68, %c0_69, %c0_70] : memref<3x144x128xf32, #tpu.memory_space<vmem>>, vector<1x144x128xf32>
    %69 = vector.shape_cast %68 : vector<1x144x128xf32> to vector<144x128xf32>
    %cst_71 = arith.constant dense<0.000000e+00> : vector<16x128xf32>
    %70 = tpu.matmul %67, %69, %cst_71 {dimension_numbers = #tpu.dot_dimension_numbers<[1], [0], [0], [1], [0, 0, 1, 1], [], []>} : vector<16x144xf32>, vector<144x128xf32>, vector<16x128xf32> -> vector<16x128xf32>
    %71 = arith.addf %65, %70 : vector<16x128xf32>
    %72 = vector.broadcast %0 : vector<1x128xf32> to vector<16x128xf32>
    %73 = arith.addf %71, %72 : vector<16x128xf32>
    %cst_72 = arith.constant 0.000000e+00 : f32
    %74 = vector.broadcast %cst_72 : f32 to vector<16x128xf32>
    %75 = arith.maximumf %73, %74 : vector<16x128xf32>
    %c2_73 = arith.constant 2 : index
    %c0_74 = arith.constant 0 : index
    %c0_75 = arith.constant 0 : index
    %76 = vector.load %arg4[%c2_73, %c0_74, %c0_75] : memref<3x16x128xf32, #tpu.memory_space<vmem>>, vector<1x16x128xf32>
    %77 = vector.shape_cast %76 : vector<1x16x128xf32> to vector<16x128xf32>
    %78 = vector.shape_cast %75 : vector<16x128xf32> to vector<1x16x128xf32>
    tpu.vector_store %arg4[%c2_73, %c0_74, %c0_75], %78 {strides = array<i32>} : memref<3x16x128xf32, #tpu.memory_space<vmem>>, vector<1x16x128xf32>,
    return
  }
  func.func @transform_0(%arg0: i32) -> (i32, i32, i32) {
    %c0_i32 = arith.constant 0 : i32
    %c0_i32_0 = arith.constant 0 : i32
    %c0_i32_1 = arith.constant 0 : i32
    return %arg0, %c0_i32, %c0_i32_0 : i32, i32, i32
  }
  func.func @transform_1(%arg0: i32) -> (i32, i32, i32) {
    %c0_i32 = arith.constant 0 : i32
    %c0_i32_0 = arith.constant 0 : i32
    %c0_i32_1 = arith.constant 0 : i32
    %c0_i32_2 = arith.constant 0 : i32
    return %c0_i32, %c0_i32_0, %c0_i32_1 : i32, i32, i32
  }
  func.func @transform_2(%arg0: i32) -> (i32, i32) {
    %c0_i32 = arith.constant 0 : i32
    %c0_i32_0 = arith.constant 0 : i32
    %c0_i32_1 = arith.constant 0 : i32
    return %c0_i32, %c0_i32_0 : i32, i32
  }
  func.func @transform_3(%arg0: i32) -> (i32, i32, i32) {
    %c0_i32 = arith.constant 0 : i32
    %c0_i32_0 = arith.constant 0 : i32
    %c0_i32_1 = arith.constant 0 : i32
    return %arg0, %c0_i32, %c0_i32_0 : i32, i32, i32
  }
}

module attributes {stable_mosaic.version = 11 : i64} {
  func.func @_conv_band_kernel(%arg0: i32, %arg1: memref<3x10x80xf32, #tpu.memory_space<vmem>>, %arg2: memref<3x80x64xf32, #tpu.memory_space<vmem>>, %arg3: memref<1x64xf32, #tpu.memory_space<vmem>>, %arg4: memref<3x8x64xf32, #tpu.memory_space<vmem>>) attributes {dimension_semantics = [#tpu.dimension_semantics<parallel>], iteration_bounds = array<i64: 2>, scalar_prefetch = 0 : i64, scratch_operands = 0 : i64, tpu.core_type = #tpu.core_type<tc>, window_params = [{transform_indices = @transform_0, window_bounds = array<i64: 3, 10, 80>}, {pipeline_mode = #tpu.pipeline_mode<synchronous>, transform_indices = @transform_1, window_bounds = array<i64: 3, 80, 64>}, {pipeline_mode = #tpu.pipeline_mode<synchronous>, transform_indices = @transform_2, window_bounds = array<i64: 1, 64>}, {transform_indices = @transform_3, window_bounds = array<i64: 3, 8, 64>}]} {
    %c0 = arith.constant 0 : index
    %c0_0 = arith.constant 0 : index
    %0 = vector.load %arg3[%c0, %c0_0] : memref<1x64xf32, #tpu.memory_space<vmem>>, vector<1x64xf32>
    %cst = arith.constant 0.000000e+00 : f32
    %1 = vector.broadcast %cst : f32 to vector<8x64xf32>
    %c0_1 = arith.constant 0 : index
    %c0_2 = arith.constant 0 : index
    %c0_3 = arith.constant 0 : index
    %2 = vector.load %arg1[%c0_1, %c0_2, %c0_3] : memref<3x10x80xf32, #tpu.memory_space<vmem>>, vector<1x8x80xf32>
    %3 = vector.shape_cast %2 : vector<1x8x80xf32> to vector<8x80xf32>
    %c0_4 = arith.constant 0 : index
    %c0_5 = arith.constant 0 : index
    %c0_6 = arith.constant 0 : index
    %4 = vector.load %arg2[%c0_4, %c0_5, %c0_6] : memref<3x80x64xf32, #tpu.memory_space<vmem>>, vector<1x80x64xf32>
    %5 = vector.shape_cast %4 : vector<1x80x64xf32> to vector<80x64xf32>
    %cst_7 = arith.constant dense<0.000000e+00> : vector<8x64xf32>
    %6 = tpu.matmul %3, %5, %cst_7 {dimension_numbers = #tpu.dot_dimension_numbers<[1], [0], [0], [1], [0, 0, 1, 1], [], []>} : vector<8x80xf32>, vector<80x64xf32>, vector<8x64xf32> -> vector<8x64xf32>
    %7 = arith.addf %1, %6 : vector<8x64xf32>
    %c0_8 = arith.constant 0 : index
    %c1 = arith.constant 1 : index
    %c0_9 = arith.constant 0 : index
    %8 = vector.load %arg1[%c0_8, %c1, %c0_9] : memref<3x10x80xf32, #tpu.memory_space<vmem>>, vector<1x8x80xf32>
    %9 = vector.shape_cast %8 : vector<1x8x80xf32> to vector<8x80xf32>
    %c1_10 = arith.constant 1 : index
    %c0_11 = arith.constant 0 : index
    %c0_12 = arith.constant 0 : index
    %10 = vector.load %arg2[%c1_10, %c0_11, %c0_12] : memref<3x80x64xf32, #tpu.memory_space<vmem>>, vector<1x80x64xf32>
    %11 = vector.shape_cast %10 : vector<1x80x64xf32> to vector<80x64xf32>
    %cst_13 = arith.constant dense<0.000000e+00> : vector<8x64xf32>
    %12 = tpu.matmul %9, %11, %cst_13 {dimension_numbers = #tpu.dot_dimension_numbers<[1], [0], [0], [1], [0, 0, 1, 1], [], []>} : vector<8x80xf32>, vector<80x64xf32>, vector<8x64xf32> -> vector<8x64xf32>
    %13 = arith.addf %7, %12 : vector<8x64xf32>
    %c0_14 = arith.constant 0 : index
    %c2 = arith.constant 2 : index
    %c0_15 = arith.constant 0 : index
    %14 = vector.load %arg1[%c0_14, %c2, %c0_15] : memref<3x10x80xf32, #tpu.memory_space<vmem>>, vector<1x8x80xf32>
    %15 = vector.shape_cast %14 : vector<1x8x80xf32> to vector<8x80xf32>
    %c2_16 = arith.constant 2 : index
    %c0_17 = arith.constant 0 : index
    %c0_18 = arith.constant 0 : index
    %16 = vector.load %arg2[%c2_16, %c0_17, %c0_18] : memref<3x80x64xf32, #tpu.memory_space<vmem>>, vector<1x80x64xf32>
    %17 = vector.shape_cast %16 : vector<1x80x64xf32> to vector<80x64xf32>
    %cst_19 = arith.constant dense<0.000000e+00> : vector<8x64xf32>
    %18 = tpu.matmul %15, %17, %cst_19 {dimension_numbers = #tpu.dot_dimension_numbers<[1], [0], [0], [1], [0, 0, 1, 1], [], []>} : vector<8x80xf32>, vector<80x64xf32>, vector<8x64xf32> -> vector<8x64xf32>
    %19 = arith.addf %13, %18 : vector<8x64xf32>
    %20 = vector.broadcast %0 : vector<1x64xf32> to vector<8x64xf32>
    %21 = arith.addf %19, %20 : vector<8x64xf32>
    %cst_20 = arith.constant 0.000000e+00 : f32
    %22 = vector.broadcast %cst_20 : f32 to vector<8x64xf32>
    %23 = arith.maximumf %21, %22 : vector<8x64xf32>
    %c0_21 = arith.constant 0 : index
    %c0_22 = arith.constant 0 : index
    %c0_23 = arith.constant 0 : index
    %24 = vector.load %arg4[%c0_21, %c0_22, %c0_23] : memref<3x8x64xf32, #tpu.memory_space<vmem>>, vector<1x8x64xf32>
    %25 = vector.shape_cast %24 : vector<1x8x64xf32> to vector<8x64xf32>
    %26 = vector.shape_cast %23 : vector<8x64xf32> to vector<1x8x64xf32>
    tpu.vector_store %arg4[%c0_21, %c0_22, %c0_23], %26 {strides = array<i32>} : memref<3x8x64xf32, #tpu.memory_space<vmem>>, vector<1x8x64xf32>,
    %cst_24 = arith.constant 0.000000e+00 : f32
    %27 = vector.broadcast %cst_24 : f32 to vector<8x64xf32>
    %c1_25 = arith.constant 1 : index
    %c0_26 = arith.constant 0 : index
    %c0_27 = arith.constant 0 : index
    %28 = vector.load %arg1[%c1_25, %c0_26, %c0_27] : memref<3x10x80xf32, #tpu.memory_space<vmem>>, vector<1x8x80xf32>
    %29 = vector.shape_cast %28 : vector<1x8x80xf32> to vector<8x80xf32>
    %c0_28 = arith.constant 0 : index
    %c0_29 = arith.constant 0 : index
    %c0_30 = arith.constant 0 : index
    %30 = vector.load %arg2[%c0_28, %c0_29, %c0_30] : memref<3x80x64xf32, #tpu.memory_space<vmem>>, vector<1x80x64xf32>
    %31 = vector.shape_cast %30 : vector<1x80x64xf32> to vector<80x64xf32>
    %cst_31 = arith.constant dense<0.000000e+00> : vector<8x64xf32>
    %32 = tpu.matmul %29, %31, %cst_31 {dimension_numbers = #tpu.dot_dimension_numbers<[1], [0], [0], [1], [0, 0, 1, 1], [], []>} : vector<8x80xf32>, vector<80x64xf32>, vector<8x64xf32> -> vector<8x64xf32>
    %33 = arith.addf %27, %32 : vector<8x64xf32>
    %c1_32 = arith.constant 1 : index
    %c1_33 = arith.constant 1 : index
    %c0_34 = arith.constant 0 : index
    %34 = vector.load %arg1[%c1_32, %c1_33, %c0_34] : memref<3x10x80xf32, #tpu.memory_space<vmem>>, vector<1x8x80xf32>
    %35 = vector.shape_cast %34 : vector<1x8x80xf32> to vector<8x80xf32>
    %c1_35 = arith.constant 1 : index
    %c0_36 = arith.constant 0 : index
    %c0_37 = arith.constant 0 : index
    %36 = vector.load %arg2[%c1_35, %c0_36, %c0_37] : memref<3x80x64xf32, #tpu.memory_space<vmem>>, vector<1x80x64xf32>
    %37 = vector.shape_cast %36 : vector<1x80x64xf32> to vector<80x64xf32>
    %cst_38 = arith.constant dense<0.000000e+00> : vector<8x64xf32>
    %38 = tpu.matmul %35, %37, %cst_38 {dimension_numbers = #tpu.dot_dimension_numbers<[1], [0], [0], [1], [0, 0, 1, 1], [], []>} : vector<8x80xf32>, vector<80x64xf32>, vector<8x64xf32> -> vector<8x64xf32>
    %39 = arith.addf %33, %38 : vector<8x64xf32>
    %c1_39 = arith.constant 1 : index
    %c2_40 = arith.constant 2 : index
    %c0_41 = arith.constant 0 : index
    %40 = vector.load %arg1[%c1_39, %c2_40, %c0_41] : memref<3x10x80xf32, #tpu.memory_space<vmem>>, vector<1x8x80xf32>
    %41 = vector.shape_cast %40 : vector<1x8x80xf32> to vector<8x80xf32>
    %c2_42 = arith.constant 2 : index
    %c0_43 = arith.constant 0 : index
    %c0_44 = arith.constant 0 : index
    %42 = vector.load %arg2[%c2_42, %c0_43, %c0_44] : memref<3x80x64xf32, #tpu.memory_space<vmem>>, vector<1x80x64xf32>
    %43 = vector.shape_cast %42 : vector<1x80x64xf32> to vector<80x64xf32>
    %cst_45 = arith.constant dense<0.000000e+00> : vector<8x64xf32>
    %44 = tpu.matmul %41, %43, %cst_45 {dimension_numbers = #tpu.dot_dimension_numbers<[1], [0], [0], [1], [0, 0, 1, 1], [], []>} : vector<8x80xf32>, vector<80x64xf32>, vector<8x64xf32> -> vector<8x64xf32>
    %45 = arith.addf %39, %44 : vector<8x64xf32>
    %46 = vector.broadcast %0 : vector<1x64xf32> to vector<8x64xf32>
    %47 = arith.addf %45, %46 : vector<8x64xf32>
    %cst_46 = arith.constant 0.000000e+00 : f32
    %48 = vector.broadcast %cst_46 : f32 to vector<8x64xf32>
    %49 = arith.maximumf %47, %48 : vector<8x64xf32>
    %c1_47 = arith.constant 1 : index
    %c0_48 = arith.constant 0 : index
    %c0_49 = arith.constant 0 : index
    %50 = vector.load %arg4[%c1_47, %c0_48, %c0_49] : memref<3x8x64xf32, #tpu.memory_space<vmem>>, vector<1x8x64xf32>
    %51 = vector.shape_cast %50 : vector<1x8x64xf32> to vector<8x64xf32>
    %52 = vector.shape_cast %49 : vector<8x64xf32> to vector<1x8x64xf32>
    tpu.vector_store %arg4[%c1_47, %c0_48, %c0_49], %52 {strides = array<i32>} : memref<3x8x64xf32, #tpu.memory_space<vmem>>, vector<1x8x64xf32>,
    %cst_50 = arith.constant 0.000000e+00 : f32
    %53 = vector.broadcast %cst_50 : f32 to vector<8x64xf32>
    %c2_51 = arith.constant 2 : index
    %c0_52 = arith.constant 0 : index
    %c0_53 = arith.constant 0 : index
    %54 = vector.load %arg1[%c2_51, %c0_52, %c0_53] : memref<3x10x80xf32, #tpu.memory_space<vmem>>, vector<1x8x80xf32>
    %55 = vector.shape_cast %54 : vector<1x8x80xf32> to vector<8x80xf32>
    %c0_54 = arith.constant 0 : index
    %c0_55 = arith.constant 0 : index
    %c0_56 = arith.constant 0 : index
    %56 = vector.load %arg2[%c0_54, %c0_55, %c0_56] : memref<3x80x64xf32, #tpu.memory_space<vmem>>, vector<1x80x64xf32>
    %57 = vector.shape_cast %56 : vector<1x80x64xf32> to vector<80x64xf32>
    %cst_57 = arith.constant dense<0.000000e+00> : vector<8x64xf32>
    %58 = tpu.matmul %55, %57, %cst_57 {dimension_numbers = #tpu.dot_dimension_numbers<[1], [0], [0], [1], [0, 0, 1, 1], [], []>} : vector<8x80xf32>, vector<80x64xf32>, vector<8x64xf32> -> vector<8x64xf32>
    %59 = arith.addf %53, %58 : vector<8x64xf32>
    %c2_58 = arith.constant 2 : index
    %c1_59 = arith.constant 1 : index
    %c0_60 = arith.constant 0 : index
    %60 = vector.load %arg1[%c2_58, %c1_59, %c0_60] : memref<3x10x80xf32, #tpu.memory_space<vmem>>, vector<1x8x80xf32>
    %61 = vector.shape_cast %60 : vector<1x8x80xf32> to vector<8x80xf32>
    %c1_61 = arith.constant 1 : index
    %c0_62 = arith.constant 0 : index
    %c0_63 = arith.constant 0 : index
    %62 = vector.load %arg2[%c1_61, %c0_62, %c0_63] : memref<3x80x64xf32, #tpu.memory_space<vmem>>, vector<1x80x64xf32>
    %63 = vector.shape_cast %62 : vector<1x80x64xf32> to vector<80x64xf32>
    %cst_64 = arith.constant dense<0.000000e+00> : vector<8x64xf32>
    %64 = tpu.matmul %61, %63, %cst_64 {dimension_numbers = #tpu.dot_dimension_numbers<[1], [0], [0], [1], [0, 0, 1, 1], [], []>} : vector<8x80xf32>, vector<80x64xf32>, vector<8x64xf32> -> vector<8x64xf32>
    %65 = arith.addf %59, %64 : vector<8x64xf32>
    %c2_65 = arith.constant 2 : index
    %c2_66 = arith.constant 2 : index
    %c0_67 = arith.constant 0 : index
    %66 = vector.load %arg1[%c2_65, %c2_66, %c0_67] : memref<3x10x80xf32, #tpu.memory_space<vmem>>, vector<1x8x80xf32>
    %67 = vector.shape_cast %66 : vector<1x8x80xf32> to vector<8x80xf32>
    %c2_68 = arith.constant 2 : index
    %c0_69 = arith.constant 0 : index
    %c0_70 = arith.constant 0 : index
    %68 = vector.load %arg2[%c2_68, %c0_69, %c0_70] : memref<3x80x64xf32, #tpu.memory_space<vmem>>, vector<1x80x64xf32>
    %69 = vector.shape_cast %68 : vector<1x80x64xf32> to vector<80x64xf32>
    %cst_71 = arith.constant dense<0.000000e+00> : vector<8x64xf32>
    %70 = tpu.matmul %67, %69, %cst_71 {dimension_numbers = #tpu.dot_dimension_numbers<[1], [0], [0], [1], [0, 0, 1, 1], [], []>} : vector<8x80xf32>, vector<80x64xf32>, vector<8x64xf32> -> vector<8x64xf32>
    %71 = arith.addf %65, %70 : vector<8x64xf32>
    %72 = vector.broadcast %0 : vector<1x64xf32> to vector<8x64xf32>
    %73 = arith.addf %71, %72 : vector<8x64xf32>
    %cst_72 = arith.constant 0.000000e+00 : f32
    %74 = vector.broadcast %cst_72 : f32 to vector<8x64xf32>
    %75 = arith.maximumf %73, %74 : vector<8x64xf32>
    %c2_73 = arith.constant 2 : index
    %c0_74 = arith.constant 0 : index
    %c0_75 = arith.constant 0 : index
    %76 = vector.load %arg4[%c2_73, %c0_74, %c0_75] : memref<3x8x64xf32, #tpu.memory_space<vmem>>, vector<1x8x64xf32>
    %77 = vector.shape_cast %76 : vector<1x8x64xf32> to vector<8x64xf32>
    %78 = vector.shape_cast %75 : vector<8x64xf32> to vector<1x8x64xf32>
    tpu.vector_store %arg4[%c2_73, %c0_74, %c0_75], %78 {strides = array<i32>} : memref<3x8x64xf32, #tpu.memory_space<vmem>>, vector<1x8x64xf32>,
    return
  }
  func.func @transform_0(%arg0: i32) -> (i32, i32, i32) {
    %c0_i32 = arith.constant 0 : i32
    %c0_i32_0 = arith.constant 0 : i32
    %c0_i32_1 = arith.constant 0 : i32
    return %arg0, %c0_i32, %c0_i32_0 : i32, i32, i32
  }
  func.func @transform_1(%arg0: i32) -> (i32, i32, i32) {
    %c0_i32 = arith.constant 0 : i32
    %c0_i32_0 = arith.constant 0 : i32
    %c0_i32_1 = arith.constant 0 : i32
    %c0_i32_2 = arith.constant 0 : i32
    return %c0_i32, %c0_i32_0, %c0_i32_1 : i32, i32, i32
  }
  func.func @transform_2(%arg0: i32) -> (i32, i32) {
    %c0_i32 = arith.constant 0 : i32
    %c0_i32_0 = arith.constant 0 : i32
    %c0_i32_1 = arith.constant 0 : i32
    return %c0_i32, %c0_i32_0 : i32, i32
  }
  func.func @transform_3(%arg0: i32) -> (i32, i32, i32) {
    %c0_i32 = arith.constant 0 : i32
    %c0_i32_0 = arith.constant 0 : i32
    %c0_i32_1 = arith.constant 0 : i32
    return %arg0, %c0_i32, %c0_i32_0 : i32, i32, i32
  }
}

module attributes {stable_mosaic.version = 11 : i64} {
  func.func @_conv_band_kernel(%arg0: i32, %arg1: memref<3x6x48xf32, #tpu.memory_space<vmem>>, %arg2: memref<3x48x64xf32, #tpu.memory_space<vmem>>, %arg3: memref<1x64xf32, #tpu.memory_space<vmem>>, %arg4: memref<3x4x64xf32, #tpu.memory_space<vmem>>) attributes {dimension_semantics = [#tpu.dimension_semantics<parallel>], iteration_bounds = array<i64: 2>, scalar_prefetch = 0 : i64, scratch_operands = 0 : i64, tpu.core_type = #tpu.core_type<tc>, window_params = [{transform_indices = @transform_0, window_bounds = array<i64: 3, 6, 48>}, {pipeline_mode = #tpu.pipeline_mode<synchronous>, transform_indices = @transform_1, window_bounds = array<i64: 3, 48, 64>}, {pipeline_mode = #tpu.pipeline_mode<synchronous>, transform_indices = @transform_2, window_bounds = array<i64: 1, 64>}, {transform_indices = @transform_3, window_bounds = array<i64: 3, 4, 64>}]} {
    %c0 = arith.constant 0 : index
    %c0_0 = arith.constant 0 : index
    %0 = vector.load %arg3[%c0, %c0_0] : memref<1x64xf32, #tpu.memory_space<vmem>>, vector<1x64xf32>
    %cst = arith.constant 0.000000e+00 : f32
    %1 = vector.broadcast %cst : f32 to vector<4x64xf32>
    %c0_1 = arith.constant 0 : index
    %c0_2 = arith.constant 0 : index
    %c0_3 = arith.constant 0 : index
    %2 = vector.load %arg1[%c0_1, %c0_2, %c0_3] : memref<3x6x48xf32, #tpu.memory_space<vmem>>, vector<1x4x48xf32>
    %3 = vector.shape_cast %2 : vector<1x4x48xf32> to vector<4x48xf32>
    %c0_4 = arith.constant 0 : index
    %c0_5 = arith.constant 0 : index
    %c0_6 = arith.constant 0 : index
    %4 = vector.load %arg2[%c0_4, %c0_5, %c0_6] : memref<3x48x64xf32, #tpu.memory_space<vmem>>, vector<1x48x64xf32>
    %5 = vector.shape_cast %4 : vector<1x48x64xf32> to vector<48x64xf32>
    %cst_7 = arith.constant dense<0.000000e+00> : vector<4x64xf32>
    %6 = tpu.matmul %3, %5, %cst_7 {dimension_numbers = #tpu.dot_dimension_numbers<[1], [0], [0], [1], [0, 0, 1, 1], [], []>} : vector<4x48xf32>, vector<48x64xf32>, vector<4x64xf32> -> vector<4x64xf32>
    %7 = arith.addf %1, %6 : vector<4x64xf32>
    %c0_8 = arith.constant 0 : index
    %c1 = arith.constant 1 : index
    %c0_9 = arith.constant 0 : index
    %8 = vector.load %arg1[%c0_8, %c1, %c0_9] : memref<3x6x48xf32, #tpu.memory_space<vmem>>, vector<1x4x48xf32>
    %9 = vector.shape_cast %8 : vector<1x4x48xf32> to vector<4x48xf32>
    %c1_10 = arith.constant 1 : index
    %c0_11 = arith.constant 0 : index
    %c0_12 = arith.constant 0 : index
    %10 = vector.load %arg2[%c1_10, %c0_11, %c0_12] : memref<3x48x64xf32, #tpu.memory_space<vmem>>, vector<1x48x64xf32>
    %11 = vector.shape_cast %10 : vector<1x48x64xf32> to vector<48x64xf32>
    %cst_13 = arith.constant dense<0.000000e+00> : vector<4x64xf32>
    %12 = tpu.matmul %9, %11, %cst_13 {dimension_numbers = #tpu.dot_dimension_numbers<[1], [0], [0], [1], [0, 0, 1, 1], [], []>} : vector<4x48xf32>, vector<48x64xf32>, vector<4x64xf32> -> vector<4x64xf32>
    %13 = arith.addf %7, %12 : vector<4x64xf32>
    %c0_14 = arith.constant 0 : index
    %c2 = arith.constant 2 : index
    %c0_15 = arith.constant 0 : index
    %14 = vector.load %arg1[%c0_14, %c2, %c0_15] : memref<3x6x48xf32, #tpu.memory_space<vmem>>, vector<1x4x48xf32>
    %15 = vector.shape_cast %14 : vector<1x4x48xf32> to vector<4x48xf32>
    %c2_16 = arith.constant 2 : index
    %c0_17 = arith.constant 0 : index
    %c0_18 = arith.constant 0 : index
    %16 = vector.load %arg2[%c2_16, %c0_17, %c0_18] : memref<3x48x64xf32, #tpu.memory_space<vmem>>, vector<1x48x64xf32>
    %17 = vector.shape_cast %16 : vector<1x48x64xf32> to vector<48x64xf32>
    %cst_19 = arith.constant dense<0.000000e+00> : vector<4x64xf32>
    %18 = tpu.matmul %15, %17, %cst_19 {dimension_numbers = #tpu.dot_dimension_numbers<[1], [0], [0], [1], [0, 0, 1, 1], [], []>} : vector<4x48xf32>, vector<48x64xf32>, vector<4x64xf32> -> vector<4x64xf32>
    %19 = arith.addf %13, %18 : vector<4x64xf32>
    %20 = vector.broadcast %0 : vector<1x64xf32> to vector<4x64xf32>
    %21 = arith.addf %19, %20 : vector<4x64xf32>
    %cst_20 = arith.constant 0.000000e+00 : f32
    %22 = vector.broadcast %cst_20 : f32 to vector<4x64xf32>
    %23 = arith.maximumf %21, %22 : vector<4x64xf32>
    %c0_21 = arith.constant 0 : index
    %c0_22 = arith.constant 0 : index
    %c0_23 = arith.constant 0 : index
    %24 = vector.load %arg4[%c0_21, %c0_22, %c0_23] : memref<3x4x64xf32, #tpu.memory_space<vmem>>, vector<1x4x64xf32>
    %25 = vector.shape_cast %24 : vector<1x4x64xf32> to vector<4x64xf32>
    %26 = vector.shape_cast %23 : vector<4x64xf32> to vector<1x4x64xf32>
    tpu.vector_store %arg4[%c0_21, %c0_22, %c0_23], %26 {strides = array<i32>} : memref<3x4x64xf32, #tpu.memory_space<vmem>>, vector<1x4x64xf32>,
    %cst_24 = arith.constant 0.000000e+00 : f32
    %27 = vector.broadcast %cst_24 : f32 to vector<4x64xf32>
    %c1_25 = arith.constant 1 : index
    %c0_26 = arith.constant 0 : index
    %c0_27 = arith.constant 0 : index
    %28 = vector.load %arg1[%c1_25, %c0_26, %c0_27] : memref<3x6x48xf32, #tpu.memory_space<vmem>>, vector<1x4x48xf32>
    %29 = vector.shape_cast %28 : vector<1x4x48xf32> to vector<4x48xf32>
    %c0_28 = arith.constant 0 : index
    %c0_29 = arith.constant 0 : index
    %c0_30 = arith.constant 0 : index
    %30 = vector.load %arg2[%c0_28, %c0_29, %c0_30] : memref<3x48x64xf32, #tpu.memory_space<vmem>>, vector<1x48x64xf32>
    %31 = vector.shape_cast %30 : vector<1x48x64xf32> to vector<48x64xf32>
    %cst_31 = arith.constant dense<0.000000e+00> : vector<4x64xf32>
    %32 = tpu.matmul %29, %31, %cst_31 {dimension_numbers = #tpu.dot_dimension_numbers<[1], [0], [0], [1], [0, 0, 1, 1], [], []>} : vector<4x48xf32>, vector<48x64xf32>, vector<4x64xf32> -> vector<4x64xf32>
    %33 = arith.addf %27, %32 : vector<4x64xf32>
    %c1_32 = arith.constant 1 : index
    %c1_33 = arith.constant 1 : index
    %c0_34 = arith.constant 0 : index
    %34 = vector.load %arg1[%c1_32, %c1_33, %c0_34] : memref<3x6x48xf32, #tpu.memory_space<vmem>>, vector<1x4x48xf32>
    %35 = vector.shape_cast %34 : vector<1x4x48xf32> to vector<4x48xf32>
    %c1_35 = arith.constant 1 : index
    %c0_36 = arith.constant 0 : index
    %c0_37 = arith.constant 0 : index
    %36 = vector.load %arg2[%c1_35, %c0_36, %c0_37] : memref<3x48x64xf32, #tpu.memory_space<vmem>>, vector<1x48x64xf32>
    %37 = vector.shape_cast %36 : vector<1x48x64xf32> to vector<48x64xf32>
    %cst_38 = arith.constant dense<0.000000e+00> : vector<4x64xf32>
    %38 = tpu.matmul %35, %37, %cst_38 {dimension_numbers = #tpu.dot_dimension_numbers<[1], [0], [0], [1], [0, 0, 1, 1], [], []>} : vector<4x48xf32>, vector<48x64xf32>, vector<4x64xf32> -> vector<4x64xf32>
    %39 = arith.addf %33, %38 : vector<4x64xf32>
    %c1_39 = arith.constant 1 : index
    %c2_40 = arith.constant 2 : index
    %c0_41 = arith.constant 0 : index
    %40 = vector.load %arg1[%c1_39, %c2_40, %c0_41] : memref<3x6x48xf32, #tpu.memory_space<vmem>>, vector<1x4x48xf32>
    %41 = vector.shape_cast %40 : vector<1x4x48xf32> to vector<4x48xf32>
    %c2_42 = arith.constant 2 : index
    %c0_43 = arith.constant 0 : index
    %c0_44 = arith.constant 0 : index
    %42 = vector.load %arg2[%c2_42, %c0_43, %c0_44] : memref<3x48x64xf32, #tpu.memory_space<vmem>>, vector<1x48x64xf32>
    %43 = vector.shape_cast %42 : vector<1x48x64xf32> to vector<48x64xf32>
    %cst_45 = arith.constant dense<0.000000e+00> : vector<4x64xf32>
    %44 = tpu.matmul %41, %43, %cst_45 {dimension_numbers = #tpu.dot_dimension_numbers<[1], [0], [0], [1], [0, 0, 1, 1], [], []>} : vector<4x48xf32>, vector<48x64xf32>, vector<4x64xf32> -> vector<4x64xf32>
    %45 = arith.addf %39, %44 : vector<4x64xf32>
    %46 = vector.broadcast %0 : vector<1x64xf32> to vector<4x64xf32>
    %47 = arith.addf %45, %46 : vector<4x64xf32>
    %cst_46 = arith.constant 0.000000e+00 : f32
    %48 = vector.broadcast %cst_46 : f32 to vector<4x64xf32>
    %49 = arith.maximumf %47, %48 : vector<4x64xf32>
    %c1_47 = arith.constant 1 : index
    %c0_48 = arith.constant 0 : index
    %c0_49 = arith.constant 0 : index
    %50 = vector.load %arg4[%c1_47, %c0_48, %c0_49] : memref<3x4x64xf32, #tpu.memory_space<vmem>>, vector<1x4x64xf32>
    %51 = vector.shape_cast %50 : vector<1x4x64xf32> to vector<4x64xf32>
    %52 = vector.shape_cast %49 : vector<4x64xf32> to vector<1x4x64xf32>
    tpu.vector_store %arg4[%c1_47, %c0_48, %c0_49], %52 {strides = array<i32>} : memref<3x4x64xf32, #tpu.memory_space<vmem>>, vector<1x4x64xf32>,
    %cst_50 = arith.constant 0.000000e+00 : f32
    %53 = vector.broadcast %cst_50 : f32 to vector<4x64xf32>
    %c2_51 = arith.constant 2 : index
    %c0_52 = arith.constant 0 : index
    %c0_53 = arith.constant 0 : index
    %54 = vector.load %arg1[%c2_51, %c0_52, %c0_53] : memref<3x6x48xf32, #tpu.memory_space<vmem>>, vector<1x4x48xf32>
    %55 = vector.shape_cast %54 : vector<1x4x48xf32> to vector<4x48xf32>
    %c0_54 = arith.constant 0 : index
    %c0_55 = arith.constant 0 : index
    %c0_56 = arith.constant 0 : index
    %56 = vector.load %arg2[%c0_54, %c0_55, %c0_56] : memref<3x48x64xf32, #tpu.memory_space<vmem>>, vector<1x48x64xf32>
    %57 = vector.shape_cast %56 : vector<1x48x64xf32> to vector<48x64xf32>
    %cst_57 = arith.constant dense<0.000000e+00> : vector<4x64xf32>
    %58 = tpu.matmul %55, %57, %cst_57 {dimension_numbers = #tpu.dot_dimension_numbers<[1], [0], [0], [1], [0, 0, 1, 1], [], []>} : vector<4x48xf32>, vector<48x64xf32>, vector<4x64xf32> -> vector<4x64xf32>
    %59 = arith.addf %53, %58 : vector<4x64xf32>
    %c2_58 = arith.constant 2 : index
    %c1_59 = arith.constant 1 : index
    %c0_60 = arith.constant 0 : index
    %60 = vector.load %arg1[%c2_58, %c1_59, %c0_60] : memref<3x6x48xf32, #tpu.memory_space<vmem>>, vector<1x4x48xf32>
    %61 = vector.shape_cast %60 : vector<1x4x48xf32> to vector<4x48xf32>
    %c1_61 = arith.constant 1 : index
    %c0_62 = arith.constant 0 : index
    %c0_63 = arith.constant 0 : index
    %62 = vector.load %arg2[%c1_61, %c0_62, %c0_63] : memref<3x48x64xf32, #tpu.memory_space<vmem>>, vector<1x48x64xf32>
    %63 = vector.shape_cast %62 : vector<1x48x64xf32> to vector<48x64xf32>
    %cst_64 = arith.constant dense<0.000000e+00> : vector<4x64xf32>
    %64 = tpu.matmul %61, %63, %cst_64 {dimension_numbers = #tpu.dot_dimension_numbers<[1], [0], [0], [1], [0, 0, 1, 1], [], []>} : vector<4x48xf32>, vector<48x64xf32>, vector<4x64xf32> -> vector<4x64xf32>
    %65 = arith.addf %59, %64 : vector<4x64xf32>
    %c2_65 = arith.constant 2 : index
    %c2_66 = arith.constant 2 : index
    %c0_67 = arith.constant 0 : index
    %66 = vector.load %arg1[%c2_65, %c2_66, %c0_67] : memref<3x6x48xf32, #tpu.memory_space<vmem>>, vector<1x4x48xf32>
    %67 = vector.shape_cast %66 : vector<1x4x48xf32> to vector<4x48xf32>
    %c2_68 = arith.constant 2 : index
    %c0_69 = arith.constant 0 : index
    %c0_70 = arith.constant 0 : index
    %68 = vector.load %arg2[%c2_68, %c0_69, %c0_70] : memref<3x48x64xf32, #tpu.memory_space<vmem>>, vector<1x48x64xf32>
    %69 = vector.shape_cast %68 : vector<1x48x64xf32> to vector<48x64xf32>
    %cst_71 = arith.constant dense<0.000000e+00> : vector<4x64xf32>
    %70 = tpu.matmul %67, %69, %cst_71 {dimension_numbers = #tpu.dot_dimension_numbers<[1], [0], [0], [1], [0, 0, 1, 1], [], []>} : vector<4x48xf32>, vector<48x64xf32>, vector<4x64xf32> -> vector<4x64xf32>
    %71 = arith.addf %65, %70 : vector<4x64xf32>
    %72 = vector.broadcast %0 : vector<1x64xf32> to vector<4x64xf32>
    %73 = arith.addf %71, %72 : vector<4x64xf32>
    %cst_72 = arith.constant 0.000000e+00 : f32
    %74 = vector.broadcast %cst_72 : f32 to vector<4x64xf32>
    %75 = arith.maximumf %73, %74 : vector<4x64xf32>
    %c2_73 = arith.constant 2 : index
    %c0_74 = arith.constant 0 : index
    %c0_75 = arith.constant 0 : index
    %76 = vector.load %arg4[%c2_73, %c0_74, %c0_75] : memref<3x4x64xf32, #tpu.memory_space<vmem>>, vector<1x4x64xf32>
    %77 = vector.shape_cast %76 : vector<1x4x64xf32> to vector<4x64xf32>
    %78 = vector.shape_cast %75 : vector<4x64xf32> to vector<1x4x64xf32>
    tpu.vector_store %arg4[%c2_73, %c0_74, %c0_75], %78 {strides = array<i32>} : memref<3x4x64xf32, #tpu.memory_space<vmem>>, vector<1x4x64xf32>,
    return
  }
  func.func @transform_0(%arg0: i32) -> (i32, i32, i32) {
    %c0_i32 = arith.constant 0 : i32
    %c0_i32_0 = arith.constant 0 : i32
    %c0_i32_1 = arith.constant 0 : i32
    return %arg0, %c0_i32, %c0_i32_0 : i32, i32, i32
  }
  func.func @transform_1(%arg0: i32) -> (i32, i32, i32) {
    %c0_i32 = arith.constant 0 : i32
    %c0_i32_0 = arith.constant 0 : i32
    %c0_i32_1 = arith.constant 0 : i32
    %c0_i32_2 = arith.constant 0 : i32
    return %c0_i32, %c0_i32_0, %c0_i32_1 : i32, i32, i32
  }
  func.func @transform_2(%arg0: i32) -> (i32, i32) {
    %c0_i32 = arith.constant 0 : i32
    %c0_i32_0 = arith.constant 0 : i32
    %c0_i32_1 = arith.constant 0 : i32
    return %c0_i32, %c0_i32_0 : i32, i32
  }
  func.func @transform_3(%arg0: i32) -> (i32, i32, i32) {
    %c0_i32 = arith.constant 0 : i32
    %c0_i32_0 = arith.constant 0 : i32
    %c0_i32_1 = arith.constant 0 : i32
    return %arg0, %c0_i32, %c0_i32_0 : i32, i32, i32
  }
}

module attributes {stable_mosaic.version = 11 : i64} {
  func.func @_conv_band_kernel(%arg0: i32, %arg1: memref<3x6x96xf32, #tpu.memory_space<vmem>>, %arg2: memref<3x96x64xf32, #tpu.memory_space<vmem>>, %arg3: memref<1x64xf32, #tpu.memory_space<vmem>>, %arg4: memref<3x4x64xf32, #tpu.memory_space<vmem>>) attributes {dimension_semantics = [#tpu.dimension_semantics<parallel>], iteration_bounds = array<i64: 2>, scalar_prefetch = 0 : i64, scratch_operands = 0 : i64, tpu.core_type = #tpu.core_type<tc>, window_params = [{transform_indices = @transform_0, window_bounds = array<i64: 3, 6, 96>}, {pipeline_mode = #tpu.pipeline_mode<synchronous>, transform_indices = @transform_1, window_bounds = array<i64: 3, 96, 64>}, {pipeline_mode = #tpu.pipeline_mode<synchronous>, transform_indices = @transform_2, window_bounds = array<i64: 1, 64>}, {transform_indices = @transform_3, window_bounds = array<i64: 3, 4, 64>}]} {
    %c0 = arith.constant 0 : index
    %c0_0 = arith.constant 0 : index
    %0 = vector.load %arg3[%c0, %c0_0] : memref<1x64xf32, #tpu.memory_space<vmem>>, vector<1x64xf32>
    %cst = arith.constant 0.000000e+00 : f32
    %1 = vector.broadcast %cst : f32 to vector<4x64xf32>
    %c0_1 = arith.constant 0 : index
    %c0_2 = arith.constant 0 : index
    %c0_3 = arith.constant 0 : index
    %2 = vector.load %arg1[%c0_1, %c0_2, %c0_3] : memref<3x6x96xf32, #tpu.memory_space<vmem>>, vector<1x4x96xf32>
    %3 = vector.shape_cast %2 : vector<1x4x96xf32> to vector<4x96xf32>
    %c0_4 = arith.constant 0 : index
    %c0_5 = arith.constant 0 : index
    %c0_6 = arith.constant 0 : index
    %4 = vector.load %arg2[%c0_4, %c0_5, %c0_6] : memref<3x96x64xf32, #tpu.memory_space<vmem>>, vector<1x96x64xf32>
    %5 = vector.shape_cast %4 : vector<1x96x64xf32> to vector<96x64xf32>
    %cst_7 = arith.constant dense<0.000000e+00> : vector<4x64xf32>
    %6 = tpu.matmul %3, %5, %cst_7 {dimension_numbers = #tpu.dot_dimension_numbers<[1], [0], [0], [1], [0, 0, 1, 1], [], []>} : vector<4x96xf32>, vector<96x64xf32>, vector<4x64xf32> -> vector<4x64xf32>
    %7 = arith.addf %1, %6 : vector<4x64xf32>
    %c0_8 = arith.constant 0 : index
    %c1 = arith.constant 1 : index
    %c0_9 = arith.constant 0 : index
    %8 = vector.load %arg1[%c0_8, %c1, %c0_9] : memref<3x6x96xf32, #tpu.memory_space<vmem>>, vector<1x4x96xf32>
    %9 = vector.shape_cast %8 : vector<1x4x96xf32> to vector<4x96xf32>
    %c1_10 = arith.constant 1 : index
    %c0_11 = arith.constant 0 : index
    %c0_12 = arith.constant 0 : index
    %10 = vector.load %arg2[%c1_10, %c0_11, %c0_12] : memref<3x96x64xf32, #tpu.memory_space<vmem>>, vector<1x96x64xf32>
    %11 = vector.shape_cast %10 : vector<1x96x64xf32> to vector<96x64xf32>
    %cst_13 = arith.constant dense<0.000000e+00> : vector<4x64xf32>
    %12 = tpu.matmul %9, %11, %cst_13 {dimension_numbers = #tpu.dot_dimension_numbers<[1], [0], [0], [1], [0, 0, 1, 1], [], []>} : vector<4x96xf32>, vector<96x64xf32>, vector<4x64xf32> -> vector<4x64xf32>
    %13 = arith.addf %7, %12 : vector<4x64xf32>
    %c0_14 = arith.constant 0 : index
    %c2 = arith.constant 2 : index
    %c0_15 = arith.constant 0 : index
    %14 = vector.load %arg1[%c0_14, %c2, %c0_15] : memref<3x6x96xf32, #tpu.memory_space<vmem>>, vector<1x4x96xf32>
    %15 = vector.shape_cast %14 : vector<1x4x96xf32> to vector<4x96xf32>
    %c2_16 = arith.constant 2 : index
    %c0_17 = arith.constant 0 : index
    %c0_18 = arith.constant 0 : index
    %16 = vector.load %arg2[%c2_16, %c0_17, %c0_18] : memref<3x96x64xf32, #tpu.memory_space<vmem>>, vector<1x96x64xf32>
    %17 = vector.shape_cast %16 : vector<1x96x64xf32> to vector<96x64xf32>
    %cst_19 = arith.constant dense<0.000000e+00> : vector<4x64xf32>
    %18 = tpu.matmul %15, %17, %cst_19 {dimension_numbers = #tpu.dot_dimension_numbers<[1], [0], [0], [1], [0, 0, 1, 1], [], []>} : vector<4x96xf32>, vector<96x64xf32>, vector<4x64xf32> -> vector<4x64xf32>
    %19 = arith.addf %13, %18 : vector<4x64xf32>
    %20 = vector.broadcast %0 : vector<1x64xf32> to vector<4x64xf32>
    %21 = arith.addf %19, %20 : vector<4x64xf32>
    %cst_20 = arith.constant 0.000000e+00 : f32
    %22 = vector.broadcast %cst_20 : f32 to vector<4x64xf32>
    %23 = arith.maximumf %21, %22 : vector<4x64xf32>
    %c0_21 = arith.constant 0 : index
    %c0_22 = arith.constant 0 : index
    %c0_23 = arith.constant 0 : index
    %24 = vector.load %arg4[%c0_21, %c0_22, %c0_23] : memref<3x4x64xf32, #tpu.memory_space<vmem>>, vector<1x4x64xf32>
    %25 = vector.shape_cast %24 : vector<1x4x64xf32> to vector<4x64xf32>
    %26 = vector.shape_cast %23 : vector<4x64xf32> to vector<1x4x64xf32>
    tpu.vector_store %arg4[%c0_21, %c0_22, %c0_23], %26 {strides = array<i32>} : memref<3x4x64xf32, #tpu.memory_space<vmem>>, vector<1x4x64xf32>,
    %cst_24 = arith.constant 0.000000e+00 : f32
    %27 = vector.broadcast %cst_24 : f32 to vector<4x64xf32>
    %c1_25 = arith.constant 1 : index
    %c0_26 = arith.constant 0 : index
    %c0_27 = arith.constant 0 : index
    %28 = vector.load %arg1[%c1_25, %c0_26, %c0_27] : memref<3x6x96xf32, #tpu.memory_space<vmem>>, vector<1x4x96xf32>
    %29 = vector.shape_cast %28 : vector<1x4x96xf32> to vector<4x96xf32>
    %c0_28 = arith.constant 0 : index
    %c0_29 = arith.constant 0 : index
    %c0_30 = arith.constant 0 : index
    %30 = vector.load %arg2[%c0_28, %c0_29, %c0_30] : memref<3x96x64xf32, #tpu.memory_space<vmem>>, vector<1x96x64xf32>
    %31 = vector.shape_cast %30 : vector<1x96x64xf32> to vector<96x64xf32>
    %cst_31 = arith.constant dense<0.000000e+00> : vector<4x64xf32>
    %32 = tpu.matmul %29, %31, %cst_31 {dimension_numbers = #tpu.dot_dimension_numbers<[1], [0], [0], [1], [0, 0, 1, 1], [], []>} : vector<4x96xf32>, vector<96x64xf32>, vector<4x64xf32> -> vector<4x64xf32>
    %33 = arith.addf %27, %32 : vector<4x64xf32>
    %c1_32 = arith.constant 1 : index
    %c1_33 = arith.constant 1 : index
    %c0_34 = arith.constant 0 : index
    %34 = vector.load %arg1[%c1_32, %c1_33, %c0_34] : memref<3x6x96xf32, #tpu.memory_space<vmem>>, vector<1x4x96xf32>
    %35 = vector.shape_cast %34 : vector<1x4x96xf32> to vector<4x96xf32>
    %c1_35 = arith.constant 1 : index
    %c0_36 = arith.constant 0 : index
    %c0_37 = arith.constant 0 : index
    %36 = vector.load %arg2[%c1_35, %c0_36, %c0_37] : memref<3x96x64xf32, #tpu.memory_space<vmem>>, vector<1x96x64xf32>
    %37 = vector.shape_cast %36 : vector<1x96x64xf32> to vector<96x64xf32>
    %cst_38 = arith.constant dense<0.000000e+00> : vector<4x64xf32>
    %38 = tpu.matmul %35, %37, %cst_38 {dimension_numbers = #tpu.dot_dimension_numbers<[1], [0], [0], [1], [0, 0, 1, 1], [], []>} : vector<4x96xf32>, vector<96x64xf32>, vector<4x64xf32> -> vector<4x64xf32>
    %39 = arith.addf %33, %38 : vector<4x64xf32>
    %c1_39 = arith.constant 1 : index
    %c2_40 = arith.constant 2 : index
    %c0_41 = arith.constant 0 : index
    %40 = vector.load %arg1[%c1_39, %c2_40, %c0_41] : memref<3x6x96xf32, #tpu.memory_space<vmem>>, vector<1x4x96xf32>
    %41 = vector.shape_cast %40 : vector<1x4x96xf32> to vector<4x96xf32>
    %c2_42 = arith.constant 2 : index
    %c0_43 = arith.constant 0 : index
    %c0_44 = arith.constant 0 : index
    %42 = vector.load %arg2[%c2_42, %c0_43, %c0_44] : memref<3x96x64xf32, #tpu.memory_space<vmem>>, vector<1x96x64xf32>
    %43 = vector.shape_cast %42 : vector<1x96x64xf32> to vector<96x64xf32>
    %cst_45 = arith.constant dense<0.000000e+00> : vector<4x64xf32>
    %44 = tpu.matmul %41, %43, %cst_45 {dimension_numbers = #tpu.dot_dimension_numbers<[1], [0], [0], [1], [0, 0, 1, 1], [], []>} : vector<4x96xf32>, vector<96x64xf32>, vector<4x64xf32> -> vector<4x64xf32>
    %45 = arith.addf %39, %44 : vector<4x64xf32>
    %46 = vector.broadcast %0 : vector<1x64xf32> to vector<4x64xf32>
    %47 = arith.addf %45, %46 : vector<4x64xf32>
    %cst_46 = arith.constant 0.000000e+00 : f32
    %48 = vector.broadcast %cst_46 : f32 to vector<4x64xf32>
    %49 = arith.maximumf %47, %48 : vector<4x64xf32>
    %c1_47 = arith.constant 1 : index
    %c0_48 = arith.constant 0 : index
    %c0_49 = arith.constant 0 : index
    %50 = vector.load %arg4[%c1_47, %c0_48, %c0_49] : memref<3x4x64xf32, #tpu.memory_space<vmem>>, vector<1x4x64xf32>
    %51 = vector.shape_cast %50 : vector<1x4x64xf32> to vector<4x64xf32>
    %52 = vector.shape_cast %49 : vector<4x64xf32> to vector<1x4x64xf32>
    tpu.vector_store %arg4[%c1_47, %c0_48, %c0_49], %52 {strides = array<i32>} : memref<3x4x64xf32, #tpu.memory_space<vmem>>, vector<1x4x64xf32>,
    %cst_50 = arith.constant 0.000000e+00 : f32
    %53 = vector.broadcast %cst_50 : f32 to vector<4x64xf32>
    %c2_51 = arith.constant 2 : index
    %c0_52 = arith.constant 0 : index
    %c0_53 = arith.constant 0 : index
    %54 = vector.load %arg1[%c2_51, %c0_52, %c0_53] : memref<3x6x96xf32, #tpu.memory_space<vmem>>, vector<1x4x96xf32>
    %55 = vector.shape_cast %54 : vector<1x4x96xf32> to vector<4x96xf32>
    %c0_54 = arith.constant 0 : index
    %c0_55 = arith.constant 0 : index
    %c0_56 = arith.constant 0 : index
    %56 = vector.load %arg2[%c0_54, %c0_55, %c0_56] : memref<3x96x64xf32, #tpu.memory_space<vmem>>, vector<1x96x64xf32>
    %57 = vector.shape_cast %56 : vector<1x96x64xf32> to vector<96x64xf32>
    %cst_57 = arith.constant dense<0.000000e+00> : vector<4x64xf32>
    %58 = tpu.matmul %55, %57, %cst_57 {dimension_numbers = #tpu.dot_dimension_numbers<[1], [0], [0], [1], [0, 0, 1, 1], [], []>} : vector<4x96xf32>, vector<96x64xf32>, vector<4x64xf32> -> vector<4x64xf32>
    %59 = arith.addf %53, %58 : vector<4x64xf32>
    %c2_58 = arith.constant 2 : index
    %c1_59 = arith.constant 1 : index
    %c0_60 = arith.constant 0 : index
    %60 = vector.load %arg1[%c2_58, %c1_59, %c0_60] : memref<3x6x96xf32, #tpu.memory_space<vmem>>, vector<1x4x96xf32>
    %61 = vector.shape_cast %60 : vector<1x4x96xf32> to vector<4x96xf32>
    %c1_61 = arith.constant 1 : index
    %c0_62 = arith.constant 0 : index
    %c0_63 = arith.constant 0 : index
    %62 = vector.load %arg2[%c1_61, %c0_62, %c0_63] : memref<3x96x64xf32, #tpu.memory_space<vmem>>, vector<1x96x64xf32>
    %63 = vector.shape_cast %62 : vector<1x96x64xf32> to vector<96x64xf32>
    %cst_64 = arith.constant dense<0.000000e+00> : vector<4x64xf32>
    %64 = tpu.matmul %61, %63, %cst_64 {dimension_numbers = #tpu.dot_dimension_numbers<[1], [0], [0], [1], [0, 0, 1, 1], [], []>} : vector<4x96xf32>, vector<96x64xf32>, vector<4x64xf32> -> vector<4x64xf32>
    %65 = arith.addf %59, %64 : vector<4x64xf32>
    %c2_65 = arith.constant 2 : index
    %c2_66 = arith.constant 2 : index
    %c0_67 = arith.constant 0 : index
    %66 = vector.load %arg1[%c2_65, %c2_66, %c0_67] : memref<3x6x96xf32, #tpu.memory_space<vmem>>, vector<1x4x96xf32>
    %67 = vector.shape_cast %66 : vector<1x4x96xf32> to vector<4x96xf32>
    %c2_68 = arith.constant 2 : index
    %c0_69 = arith.constant 0 : index
    %c0_70 = arith.constant 0 : index
    %68 = vector.load %arg2[%c2_68, %c0_69, %c0_70] : memref<3x96x64xf32, #tpu.memory_space<vmem>>, vector<1x96x64xf32>
    %69 = vector.shape_cast %68 : vector<1x96x64xf32> to vector<96x64xf32>
    %cst_71 = arith.constant dense<0.000000e+00> : vector<4x64xf32>
    %70 = tpu.matmul %67, %69, %cst_71 {dimension_numbers = #tpu.dot_dimension_numbers<[1], [0], [0], [1], [0, 0, 1, 1], [], []>} : vector<4x96xf32>, vector<96x64xf32>, vector<4x64xf32> -> vector<4x64xf32>
    %71 = arith.addf %65, %70 : vector<4x64xf32>
    %72 = vector.broadcast %0 : vector<1x64xf32> to vector<4x64xf32>
    %73 = arith.addf %71, %72 : vector<4x64xf32>
    %cst_72 = arith.constant 0.000000e+00 : f32
    %74 = vector.broadcast %cst_72 : f32 to vector<4x64xf32>
    %75 = arith.maximumf %73, %74 : vector<4x64xf32>
    %c2_73 = arith.constant 2 : index
    %c0_74 = arith.constant 0 : index
    %c0_75 = arith.constant 0 : index
    %76 = vector.load %arg4[%c2_73, %c0_74, %c0_75] : memref<3x4x64xf32, #tpu.memory_space<vmem>>, vector<1x4x64xf32>
    %77 = vector.shape_cast %76 : vector<1x4x64xf32> to vector<4x64xf32>
    %78 = vector.shape_cast %75 : vector<4x64xf32> to vector<1x4x64xf32>
    tpu.vector_store %arg4[%c2_73, %c0_74, %c0_75], %78 {strides = array<i32>} : memref<3x4x64xf32, #tpu.memory_space<vmem>>, vector<1x4x64xf32>,
    return
  }
  func.func @transform_0(%arg0: i32) -> (i32, i32, i32) {
    %c0_i32 = arith.constant 0 : i32
    %c0_i32_0 = arith.constant 0 : i32
    %c0_i32_1 = arith.constant 0 : i32
    return %arg0, %c0_i32, %c0_i32_0 : i32, i32, i32
  }
  func.func @transform_1(%arg0: i32) -> (i32, i32, i32) {
    %c0_i32 = arith.constant 0 : i32
    %c0_i32_0 = arith.constant 0 : i32
    %c0_i32_1 = arith.constant 0 : i32
    %c0_i32_2 = arith.constant 0 : i32
    return %c0_i32, %c0_i32_0, %c0_i32_1 : i32, i32, i32
  }
  func.func @transform_2(%arg0: i32) -> (i32, i32) {
    %c0_i32 = arith.constant 0 : i32
    %c0_i32_0 = arith.constant 0 : i32
    %c0_i32_1 = arith.constant 0 : i32
    return %c0_i32, %c0_i32_0 : i32, i32
  }
  func.func @transform_3(%arg0: i32) -> (i32, i32, i32) {
    %c0_i32 = arith.constant 0 : i32
    %c0_i32_0 = arith.constant 0 : i32
    %c0_i32_1 = arith.constant 0 : i32
    return %arg0, %c0_i32, %c0_i32_0 : i32, i32, i32
  }
}

module attributes {stable_mosaic.version = 11 : i64} {
  func.func @_dense_tail_kernel(%arg0: i32, %arg1: memref<6x64xf32, #tpu.memory_space<vmem>>, %arg2: memref<64x32xf32, #tpu.memory_space<vmem>>, %arg3: memref<1x32xf32, #tpu.memory_space<vmem>>, %arg4: memref<32x16xf32, #tpu.memory_space<vmem>>, %arg5: memref<1x16xf32, #tpu.memory_space<vmem>>, %arg6: memref<16x10xf32, #tpu.memory_space<vmem>>, %arg7: memref<1x10xf32, #tpu.memory_space<vmem>>, %arg8: memref<6x10xf32, #tpu.memory_space<vmem>>) attributes {dimension_semantics = [#tpu.dimension_semantics<arbitrary>], iteration_bounds = array<i64: 1>, scalar_prefetch = 0 : i64, scratch_operands = 0 : i64, tpu.core_type = #tpu.core_type<tc>, window_params = [{pipeline_mode = #tpu.pipeline_mode<synchronous>, transform_indices = @transform_0, window_bounds = array<i64: 6, 64>}, {pipeline_mode = #tpu.pipeline_mode<synchronous>, transform_indices = @transform_1, window_bounds = array<i64: 64, 32>}, {pipeline_mode = #tpu.pipeline_mode<synchronous>, transform_indices = @transform_2, window_bounds = array<i64: 1, 32>}, {pipeline_mode = #tpu.pipeline_mode<synchronous>, transform_indices = @transform_3, window_bounds = array<i64: 32, 16>}, {pipeline_mode = #tpu.pipeline_mode<synchronous>, transform_indices = @transform_4, window_bounds = array<i64: 1, 16>}, {pipeline_mode = #tpu.pipeline_mode<synchronous>, transform_indices = @transform_5, window_bounds = array<i64: 16, 10>}, {pipeline_mode = #tpu.pipeline_mode<synchronous>, transform_indices = @transform_6, window_bounds = array<i64: 1, 10>}, {pipeline_mode = #tpu.pipeline_mode<synchronous>, transform_indices = @transform_7, window_bounds = array<i64: 6, 10>}]} {
    %c0 = arith.constant 0 : index
    %c0_0 = arith.constant 0 : index
    %0 = vector.load %arg1[%c0, %c0_0] : memref<6x64xf32, #tpu.memory_space<vmem>>, vector<6x64xf32>
    %c0_1 = arith.constant 0 : index
    %c0_2 = arith.constant 0 : index
    %1 = vector.load %arg2[%c0_1, %c0_2] : memref<64x32xf32, #tpu.memory_space<vmem>>, vector<64x32xf32>
    %cst = arith.constant dense<0.000000e+00> : vector<6x32xf32>
    %2 = tpu.matmul %0, %1, %cst {dimension_numbers = #tpu.dot_dimension_numbers<[1], [0], [0], [1], [0, 0, 1, 1], [], []>} : vector<6x64xf32>, vector<64x32xf32>, vector<6x32xf32> -> vector<6x32xf32>
    %c0_3 = arith.constant 0 : index
    %c0_4 = arith.constant 0 : index
    %3 = vector.load %arg3[%c0_3, %c0_4] : memref<1x32xf32, #tpu.memory_space<vmem>>, vector<1x32xf32>
    %4 = vector.broadcast %3 : vector<1x32xf32> to vector<6x32xf32>
    %5 = arith.addf %2, %4 : vector<6x32xf32>
    %cst_5 = arith.constant 0.000000e+00 : f32
    %6 = vector.broadcast %cst_5 : f32 to vector<6x32xf32>
    %7 = arith.maximumf %5, %6 : vector<6x32xf32>
    %c0_6 = arith.constant 0 : index
    %c0_7 = arith.constant 0 : index
    %8 = vector.load %arg4[%c0_6, %c0_7] : memref<32x16xf32, #tpu.memory_space<vmem>>, vector<32x16xf32>
    %cst_8 = arith.constant dense<0.000000e+00> : vector<6x16xf32>
    %9 = tpu.matmul %7, %8, %cst_8 {dimension_numbers = #tpu.dot_dimension_numbers<[1], [0], [0], [1], [0, 0, 1, 1], [], []>} : vector<6x32xf32>, vector<32x16xf32>, vector<6x16xf32> -> vector<6x16xf32>
    %c0_9 = arith.constant 0 : index
    %c0_10 = arith.constant 0 : index
    %10 = vector.load %arg5[%c0_9, %c0_10] : memref<1x16xf32, #tpu.memory_space<vmem>>, vector<1x16xf32>
    %11 = vector.broadcast %10 : vector<1x16xf32> to vector<6x16xf32>
    %12 = arith.addf %9, %11 : vector<6x16xf32>
    %cst_11 = arith.constant 0.000000e+00 : f32
    %13 = vector.broadcast %cst_11 : f32 to vector<6x16xf32>
    %14 = arith.maximumf %12, %13 : vector<6x16xf32>
    %c0_12 = arith.constant 0 : index
    %c0_13 = arith.constant 0 : index
    %15 = vector.load %arg6[%c0_12, %c0_13] : memref<16x10xf32, #tpu.memory_space<vmem>>, vector<16x10xf32>
    %cst_14 = arith.constant dense<0.000000e+00> : vector<6x10xf32>
    %16 = tpu.matmul %14, %15, %cst_14 {dimension_numbers = #tpu.dot_dimension_numbers<[1], [0], [0], [1], [0, 0, 1, 1], [], []>} : vector<6x16xf32>, vector<16x10xf32>, vector<6x10xf32> -> vector<6x10xf32>
    %c0_15 = arith.constant 0 : index
    %c0_16 = arith.constant 0 : index
    %17 = vector.load %arg7[%c0_15, %c0_16] : memref<1x10xf32, #tpu.memory_space<vmem>>, vector<1x10xf32>
    %18 = vector.broadcast %17 : vector<1x10xf32> to vector<6x10xf32>
    %19 = arith.addf %16, %18 : vector<6x10xf32>
    %c0_17 = arith.constant 0 : index
    %c0_18 = arith.constant 0 : index
    %20 = vector.load %arg8[%c0_17, %c0_18] : memref<6x10xf32, #tpu.memory_space<vmem>>, vector<6x10xf32>
    tpu.vector_store %arg8[%c0_17, %c0_18], %19 {strides = array<i32>} : memref<6x10xf32, #tpu.memory_space<vmem>>, vector<6x10xf32>,
    return
  }
  func.func @transform_0(%arg0: i32) -> (i32, i32) {
    %c0_i32 = arith.constant 0 : i32
    %c0_i32_0 = arith.constant 0 : i32
    %c0_i32_1 = arith.constant 0 : i32
    return %c0_i32, %c0_i32_0 : i32, i32
  }
  func.func @transform_1(%arg0: i32) -> (i32, i32) {
    %c0_i32 = arith.constant 0 : i32
    %c0_i32_0 = arith.constant 0 : i32
    %c0_i32_1 = arith.constant 0 : i32
    return %c0_i32, %c0_i32_0 : i32, i32
  }
  func.func @transform_2(%arg0: i32) -> (i32, i32) {
    %c0_i32 = arith.constant 0 : i32
    %c0_i32_0 = arith.constant 0 : i32
    %c0_i32_1 = arith.constant 0 : i32
    return %c0_i32, %c0_i32_0 : i32, i32
  }
  func.func @transform_3(%arg0: i32) -> (i32, i32) {
    %c0_i32 = arith.constant 0 : i32
    %c0_i32_0 = arith.constant 0 : i32
    %c0_i32_1 = arith.constant 0 : i32
    return %c0_i32, %c0_i32_0 : i32, i32
  }
  func.func @transform_4(%arg0: i32) -> (i32, i32) {
    %c0_i32 = arith.constant 0 : i32
    %c0_i32_0 = arith.constant 0 : i32
    %c0_i32_1 = arith.constant 0 : i32
    return %c0_i32, %c0_i32_0 : i32, i32
  }
  func.func @transform_5(%arg0: i32) -> (i32, i32) {
    %c0_i32 = arith.constant 0 : i32
    %c0_i32_0 = arith.constant 0 : i32
    %c0_i32_1 = arith.constant 0 : i32
    return %c0_i32, %c0_i32_0 : i32, i32
  }
  func.func @transform_6(%arg0: i32) -> (i32, i32) {
    %c0_i32 = arith.constant 0 : i32
    %c0_i32_0 = arith.constant 0 : i32
    %c0_i32_1 = arith.constant 0 : i32
    return %c0_i32, %c0_i32_0 : i32, i32
  }
  func.func @transform_7(%arg0: i32) -> (i32, i32) {
    %c0_i32 = arith.constant 0 : i32
    %c0_i32_0 = arith.constant 0 : i32
    %c0_i32_1 = arith.constant 0 : i32
    return %c0_i32, %c0_i32_0 : i32, i32
  }
}

</mosaic_0001>

<bundles_post_ra>
// kernel: forward.7
= control target key start
LH: loop header
LB: loop body
LE: loop exit
PB: predicated region body
PF: predicated region fallthrough
CT: control target
= control target key end

     0   :  { %s719_s12 = smov 0   ;;  %s844_s0 = inlined_call_operand.vmem [shape: f32[6,18,18], index: 0, kind: input, shape index: {}]   ;;  %s845_s1 = inlined_call_operand.vmem [shape: f32[3,18,128], index: 1, kind: input, shape index: {}]   ;;  %s846_s2 = inlined_call_operand.vmem [shape: f32[1,128], index: 2, kind: input, shape index: {}]   ;;  %s847_s3 = inlined_call_operand.vmem [shape: f32[6,16,128], index: 3, kind: output, shape index: {}]  }
   0x1 LB: > { %s606_s13 = sadd.s32 4294967295, %s697_s12   ;;  %p610_p0 = scmp.ge.s32.totalorder %s697_s12, 1  ;;  %s697_s12 = sphi %s719_s12, %s13_s12  }
   0x2   : > { %p139_p1 = scmp.lt.s32.totalorder %s697_s12, 3 }
   0x4   : > { %p140_p2 = pnand %p610_p0, %p139_p1 }
   0x5   : > { %s165_s24 = smul.u32 (!%p140_p2), 3, %s606_s13 }
   0x6   : > { %143 = sbr.rel (%p140_p2) target bundleno = 189 (0xbd), region = 32 }
   0x7   : > { %p166_p3 = scmp.lt.s32.totalorder (!%p140_p2), %s165_s24, 5 }
   0xb   : > { %v616_v0 = vld [vmem:[%s845_s1 + $0x28] sm:$0x3]  ;;  %vm198_vm0 = vcmask 1041408   ;;  %v625_v1 = vld [vmem:[%s845_s1 + $0x40] sm:$0x3]  ;;  %v624_v4 = vld [vmem:[%s845_s1 + $0x38] sm:$0xff] }
   0xc   : > { %v615_v2 = vld [vmem:[%s845_s1 + $0x20] sm:$0xff]  ;;  %617 = vmatpush.msk.msra.mxu0 %vm198_vm0, %v616_v0  ;;  %678 = vmatpush.msk.msra.mxu1 %vm198_vm0, %v616_v0  ;;  %v635_v3 = vld [vmem:[%s845_s1 + $0x28] sm:$0x3]  ;;  %v614_v5 = vld [vmem:[%s845_s1 + $0x18] sm:$0xff]  ;;  %s849_s24 = smov (!%p166_p3, %s165_s24), 5  ;;  %vm191_vm1 = vcmask 146432  }
   0xd   : > { %626 = vmatpush.msk.msra.mxu2 %vm198_vm0, %v625_v1  ;;  %636 = vmatpush.msk.msra.mxu3 %vm198_vm0, %v635_v3  ;;  %v623_v6 = vld [vmem:[%s845_s1 + $0x30] sm:$0xff]  ;;  %v658_v9 = vld [vmem:[%s845_s1 + $0x28] sm:$0x3]  ;;  %s681_s13 = smul.u32 24, %s849_s24  ;;  %v182_v12 = vld [vmem:[%s845_s1] sm:$0xff]  ;;  %s677_s26 = sshll.u32 %s849_s24, 4 }
   0xe   : > { %216 = vmatpush.msra.mxu0 %v615_v2  ;;  %679 = vmatpush.msra.mxu1 %v615_v2  ;;  %v184_v7 = vld [vmem:[%s845_s1 + $0x10] sm:$0x3]  ;;  %v183_v11 = vld [vmem:[%s845_s1 + $0x8] sm:$0xff]  ;;  %v646_v17 = vld [vmem:[%s845_s1 + $0x40] sm:$0x3]  ;;  %s833_s29 = scalar_lea.vmem %s847_s3, %s677_s26 }
   0xf   : > { %286 = vmatpush.msra.mxu2 %v624_v4  ;;  %340 = vmatpush.msra.mxu3 %v615_v2  ;;  %v311_v8 = vld [vmem:[%s845_s1 + $0x10] sm:$0x3]  ;;  %s777_s16 = scalar_lea.vmem %s844_s0, %s681_s13  ;;  %v669_v18 = vld [vmem:[%s845_s1 + $0x40] sm:$0x3] }
  0x10   : > { %217 = vmatpush.msra.mxu0 %v614_v5  ;;  %680 = vmatpush.msra.mxu1 %v614_v5  ;;  %v432_v10 = vld [vmem:[%s845_s1 + $0x10] sm:$0x3]  ;;  %v185_v13 = vld [vmem:[%s777_s16 + $0x1] sm:$0xff]  ;;  %v631_v16 = vld [vmem:[%s777_s16 + $0x19] sm:$0xff] }
  0x11   : > { %287 = vmatpush.msra.mxu2 %v623_v6  ;;  %341 = vmatpush.msra.mxu3 %v614_v5  ;;  %v186_v14 = vld [vmem:[%s777_s16 + $0x9] sm:$0xff]  ;;  %v180_v19 = vld [vmem:[%s777_s16] sm:$0xff]  ;;  %v629_v20 = vld [vmem:[%s777_s16 + $0x18] sm:$0xff] }
  0x12   : > { %620 = vmatpush.msk.msrb.mxu1 %vm198_vm0, %v184_v7  ;;  %639 = vmatpush.msk.msrb.mxu0 %vm198_vm0, %v311_v8  ;;  %v257_v15 = vld [vmem:[%s777_s16 + $0x2] sm:$0xff]  ;;  %v258_v21 = vld [vmem:[%s777_s16 + $0xa] sm:$0xff]  ;;  %v642_v27 = vld [vmem:[%s777_s16 + $0x1a] sm:$0xff] }
  0x13   : > { %659 = vmatpush.msk.msrb.mxu2 %vm198_vm0, %v658_v9  ;;  %662 = vmatpush.msk.msrb.mxu3 %vm198_vm0, %v432_v10  ;;  %v632_v22 = vld [vmem:[%s777_s16 + $0x21] sm:$0xff]  ;;  %v654_v25 = vld [vmem:[%s777_s16 + $0x31] sm:$0xff]  ;;  %v655_v29 = vld [vmem:[%s777_s16 + $0x39] sm:$0xff] }
  0x14   : > { %248 = vmatpush.msrb.mxu1 %v183_v11  ;;  %372 = vmatpush.msrb.mxu0 %v183_v11  ;;  %v181_v23 = vld [vmem:[%s777_s16 + $0x8] sm:$0xff]  ;;  %v630_v24 = vld [vmem:[%s777_s16 + $0x20] sm:$0xff]  ;;  %v652_v26 = vld [vmem:[%s777_s16 + $0x30] sm:$0xff] }
  0x15   : > { %461 = vmatpush.msrb.mxu2 %v615_v2  ;;  %493 = vmatpush.msrb.mxu3 %v183_v11  ;;  %v665_v28 = vld [vmem:[%s777_s16 + $0x32] sm:$0xff]  ;;  %v643_v31 = vld [vmem:[%s777_s16 + $0x22] sm:$0xff]  ;;  %v666_v32 = vld [vmem:[%s777_s16 + $0x3a] sm:$0xff] }
  0x16   : > { %618 = vmatmul.msk.f32.vlgmr.msra.gmra.mxu0 %vm191_vm1, %v185_v13  ;;  %619 = vmatmul.msk.f32.vlgmr.msra.gmra.mxu1 %vm191_vm1, %v186_v14  ;;  %v653_v30 = vld [vmem:[%s777_s16 + $0x38] sm:$0xff]  ;;  %v690_v40 = vld [vmem:[%s846_s2] ss:$0 sm:$0xff] }
  0x17   : > { %627 = vmatmul.msk.f32.vlgmr.msra.gmra.mxu2 %vm191_vm1, %v257_v15  ;;  %637 = vmatmul.msk.f32.vlgmr.msra.gmra.mxu3 %vm191_vm1, %v631_v16 }
  0x18   : > { %249 = vmatpush.msrb.mxu1 %v182_v12  ;;  %373 = vmatpush.msrb.mxu0 %v182_v12 }
  0x19   : > { %462 = vmatpush.msrb.mxu2 %v614_v5  ;;  %494 = vmatpush.msrb.mxu3 %v182_v12 }
  0x1a   : > { %647 = vmatpush.msk.msra.mxu1 %vm198_vm0, %v646_v17  ;;  %670 = vmatpush.msk.msra.mxu0 %vm198_vm0, %v669_v18 }
  0x1c   : > { %409 = vmatpush.msra.mxu1 %v624_v4  ;;  %530 = vmatpush.msra.mxu0 %v624_v4 }
  0x1e   : > { %410 = vmatpush.msra.mxu1 %v623_v6  ;;  %531 = vmatpush.msra.mxu0 %v623_v6 }
  0x1f   : > { %621 = vmatmul.msk.f32.vlgmr.msrb.gmra.mxu1 %vm191_vm1, %v180_v19  ;;  %640 = vmatmul.msk.f32.vlgmr.msrb.gmra.mxu0 %vm191_vm1, %v629_v20 }
  0x20   : > { %628 = vmatmul.msk.f32.gmra.mxu2 %vm191_vm1, %v258_v21  ;;  %638 = vmatmul.msk.f32.gmra.mxu3 %vm191_vm1, %v632_v22 }
  0x27   : > { %622 = vmatmul.msk.f32.gmra.mxu1 %vm191_vm1, %v181_v23  ;;  %641 = vmatmul.msk.f32.gmra.mxu0 %vm191_vm1, %v630_v24 }
  0x28   : > { %660 = vmatmul.msk.f32.vlgmr.msrb.gmra.mxu2 %vm191_vm1, %v654_v25  ;;  %663 = vmatmul.msk.f32.vlgmr.msrb.gmra.mxu3 %vm191_vm1, %v652_v26 }
  0x2f   : > { %648 = vmatmul.msk.f32.vlgmr.msra.gmra.mxu1 %vm191_vm1, %v642_v27  ;;  %671 = vmatmul.msk.f32.vlgmr.msra.gmra.mxu0 %vm191_vm1, %v665_v28 }
  0x30   : > { %661 = vmatmul.msk.f32.gmra.mxu2 %vm191_vm1, %v655_v29  ;;  %664 = vmatmul.msk.f32.gmra.mxu3 %vm191_vm1, %v653_v30 }
  0x37   : > { %649 = vmatmul.msk.f32.gmra.mxu1 %vm191_vm1, %v643_v31  ;;  %672 = vmatmul.msk.f32.gmra.mxu0 %vm191_vm1, %v666_v32 }
  0x93   : > { %v219_v33 = vpop.f32.mrf.mxu0  ;;  %v222_v34 = vpop.f32.mrf.mxu1 }
  0x9a   : > { %v289_v35 = vpop.f32.mrf.mxu2  ;;  %v343_v36 = vpop.f32.mrf.mxu3 }
  0x9c   : > { %v251_v37 = vpop.f32.mrf.mxu1  ;;  %v375_v38 = vpop.f32.mrf.mxu0 }
  0x9d   : > { %v252_v39 = vadd.f32 %v251_v37, %v219_v33  ;;  %v376_v51 = vadd.f32 %v375_v38, %v343_v36 }
  0x9f   : > { %v295_v41 = vadd.f32 %v289_v35, %v252_v39 }
  0xa1   : > { %v300_v42 = vadd.f32 %v690_v40, %v295_v41 }
  0xa3   : > { %v302_v43 = vmax.f32 %v300_v42, 0.0  ;;  %v292_v44 = vpop.f32.mrf.mxu2  ;;  %v346_v45 = vpop.f32.mrf.mxu3 }
  0xa4   : > { %v254_v46 = vpop.f32.mrf.mxu1  ;;  %v378_v47 = vpop.f32.mrf.mxu0 }
  0xa5   : > { %304 = vst [vmem:[%s833_s29] sm:$0xff] %v302_v43  ;;  %v255_v48 = vadd.f32 %v254_v46, %v222_v34  ;;  %v379_v0 = vadd.f32 %v378_v47, %v346_v45 }
  0xa7   : > { %v296_v49 = vadd.f32 %v292_v44, %v255_v48 }
  0xa9   : > { %v301_v50 = vadd.f32 %v690_v40, %v296_v49 }
  0xab   : > { %v303_v52 = vmax.f32 %v301_v50, 0.0  ;;  %v464_v53 = vpop.f32.mrf.mxu2  ;;  %v496_v54 = vpop.f32.mrf.mxu3 }
  0xac   : > { %v497_v55 = vadd.f32 %v496_v54, %v464_v53  ;;  %v412_v56 = vpop.f32.mrf.mxu1  ;;  %v533_v57 = vpop.f32.mrf.mxu0 }
  0xad   : > { %305 = vst [vmem:[%s833_s29 + $0x8] sm:$0xff] %v303_v52  ;;  %v418_v58 = vadd.f32 %v412_v56, %v376_v51 }
  0xae   : > { %v539_v59 = vadd.f32 %v533_v57, %v497_v55 }
  0xaf   : > { %v420_v60 = vadd.f32 %v690_v40, %v418_v58 }
  0xb0   : > { %v541_v61 = vadd.f32 %v690_v40, %v539_v59 }
  0xb1   : > { %v422_v62 = vmax.f32 %v420_v60, 0.0 }
  0xb2   : > { %v543_v63 = vmax.f32 %v541_v61, 0.0 }
  0xb3   : > { %650 = vst [vmem:[%s833_s29 + $0x10] sm:$0xff] %v422_v62  ;;  %v467_v1 = vpop.f32.mrf.mxu2  ;;  %v499_v2 = vpop.f32.mrf.mxu3 }
  0xb4   : > { %673 = vst [vmem:[%s833_s29 + $0x20] sm:$0xff] %v543_v63  ;;  %v500_v3 = vadd.f32 %v499_v2, %v467_v1  ;;  %v415_v4 = vpop.f32.mrf.mxu1  ;;  %v536_v5 = vpop.f32.mrf.mxu0 }
  0xb5   : > { %v419_v6 = vadd.f32 %v415_v4, %v379_v0 }
  0xb6   : > { %v540_v7 = vadd.f32 %v536_v5, %v500_v3 }
  0xb7   : > { %v421_v8 = vadd.f32 %v690_v40, %v419_v6 }
  0xb8   : > { %v542_v9 = vadd.f32 %v690_v40, %v540_v7 }
  0xb9   : > { %v423_v10 = vmax.f32 %v421_v8, 0.0 }
  0xba   : > { %v544_v11 = vmax.f32 %v542_v9, 0.0 }
  0xbb   : > { %651 = vst [vmem:[%s833_s29 + $0x18] sm:$0xff] %v423_v10 }
  0xbc   : > { %674 = vst [vmem:[%s833_s29 + $0x28] sm:$0xff] %v544_v11 }
  0xbd PF: > { %s13_s12 = sadd.s32 1, %s697_s12  }
  0xbe   : > { %p10_p4 = scmp.ge.s32.totalorder %s13_s12, 4  }
  0xc0   :  { %12 = sbr.rel (!%p10_p4) target bundleno = 1 (0x1), region = 68 }

// kernel: forward.8
= control target key start
LH: loop header
LB: loop body
LE: loop exit
PB: predicated region body
PF: predicated region fallthrough
CT: control target
= control target key end

     0   :  { %s1230_s12 = smov 0   ;;  %s1812_s0 = inlined_call_operand.vmem [shape: f32[6,18,144], index: 0, kind: input, shape index: {}]   ;;  %s1813_s1 = inlined_call_operand.vmem [shape: f32[3,144,128], index: 1, kind: input, shape index: {}]   ;;  %s1814_s2 = inlined_call_operand.vmem [shape: f32[1,128], index: 2, kind: input, shape index: {}]   ;;  %s1815_s3 = inlined_call_operand.vmem [shape: f32[6,16,128], index: 3, kind: output, shape index: {}]  }
   0x1 LB: > { %s1027_s13 = sadd.s32 4294967295, %s1208_s12   ;;  %p1031_p0 = scmp.ge.s32.totalorder %s1208_s12, 1  ;;  %s1208_s12 = sphi %s1230_s12, %s13_s12  }
   0x2   : > { %p139_p1 = scmp.lt.s32.totalorder %s1208_s12, 3 }
   0x4   : > { %p140_p2 = pnand %p1031_p0, %p139_p1 }
   0x6   : > { %143 = sbr.rel (%p140_p2) target bundleno = 265 (0x109), region = 32 }
   0xb   : > { %v1241_v0 = vld [vmem:[%s1813_s1 + $0x78] sm:$0xff]  ;;  %v1246_v1 = vld [vmem:[%s1813_s1 + $0x70] sm:$0xff]  ;;  %v1251_v2 = vld [vmem:[%s1813_s1 + $0x108] sm:$0xff]  ;;  %s165_s20 = smul.u32 3, %s1027_s13  ;;  %vm244_vm0 = vcmask 130048   ;;  %vm231_vm1 = vcmask 1046528  }
   0xc   : > { %300 = vmatpush.msra.mxu2 %v1241_v0  ;;  %249 = vmatpush.msra.mxu0 %v1251_v2  ;;  %v1258_v3 = vld [vmem:[%s1813_s1 + $0x118] sm:$0xff]  ;;  %v1263_v4 = vld [vmem:[%s1813_s1 + $0x100] sm:$0xff]  ;;  %v1269_v5 = vld [vmem:[%s1813_s1 + $0x68] sm:$0xff]  ;;  %vm373_vm2 = vcmask 1045504  }
   0xd   : > { %286 = vmatpush.msra.mxu1 %v1258_v3  ;;  %v1274_v6 = vld [vmem:[%s1813_s1 + $0x110] sm:$0xff]  ;;  %v1279_v7 = vld [vmem:[%s1813_s1 + $0x198] sm:$0xff]  ;;  %p166_p3 = scmp.lt.s32.totalorder %s165_s20, 5  ;;  %v1292_v9 = vld [vmem:[%s1813_s1 + $0x60] sm:$0xff] }
   0xe   : > { %301 = vmatpush.msra.mxu2 %v1246_v1  ;;  %250 = vmatpush.msra.mxu0 %v1263_v4  ;;  %v1286_v8 = vld [vmem:[%s1813_s1 + $0xf8] sm:$0xff]  ;;  %v1297_v10 = vld [vmem:[%s1813_s1 + $0x190] sm:$0xff]  ;;  %v1311_v12 = vld [vmem:[%s1813_s1 + $0x88] sm:$0xff] }
   0xf   : > { %287 = vmatpush.msra.mxu1 %v1274_v6  ;;  %s1821_s20 = smov (!%p166_p3, %s165_s20), 5  ;;  %v1306_v11 = vld [vmem:[%s1813_s1 + $0xf0] sm:$0xff]  ;;  %v1317_v13 = vld [vmem:[%s1813_s1 + $0x58] sm:$0xff]  ;;  %v1322_v14 = vld [vmem:[%s1813_s1 + $0x188] sm:$0xff]  ;;  %337 = vmatpush.msra.mxu3 %v1311_v12 }
  0x10   : > { %302 = vmatpush.msra.mxu2 %v1269_v5  ;;  %251 = vmatpush.msra.mxu0 %v1286_v8  ;;  %s1192_s19 = smul.u32 48, %s1821_s20  ;;  %v1331_v15 = vld [vmem:[%s1813_s1 + $0xe8] sm:$0xff]  ;;  %v1336_v16 = vld [vmem:[%s1813_s1 + $0x80] sm:$0xff]  ;;  %v1347_v18 = vld [vmem:[%s1813_s1 + $0x50] sm:$0xff]  ;;  %s1191_s30 = sshll.u32 %s1821_s20, 4 }
  0x11   : > { %390 = vmatpush.msrb.mxu1 %v1279_v7  ;;  %v1341_v17 = vld [vmem:[%s1813_s1 + $0x1a8] sm:$0xff]  ;;  %v1352_v19 = vld [vmem:[%s1813_s1 + $0x180] sm:$0xff]  ;;  %338 = vmatpush.msra.mxu3 %v1336_v16  ;;  %v1377_v23 = vld [vmem:[%s1813_s1 + $0x178] sm:$0xff]  ;;  %s1796_s7 = scalar_lea.vmem %s1815_s3, %s1191_s30 }
  0x12   : > { %303 = vmatpush.msra.mxu2 %v1292_v9  ;;  %252 = vmatpush.msra.mxu0 %v1306_v11  ;;  %s1358_s6 = scalar_lea.vmem %s1812_s0, %s1192_s19  ;;  %v1365_v20 = vld [vmem:[%s1813_s1 + $0xe0] sm:$0xff]  ;;  %v1372_v22 = vld [vmem:[%s1813_s1 + $0x48] sm:$0xff]  ;;  %v1390_v25 = vld [vmem:[%s1813_s1 + $0xd8] sm:$0xff] }
  0x13   : > { %391 = vmatpush.msrb.mxu1 %v1297_v10  ;;  %v181_v21 = vld [vmem:[%s1358_s6 + $0x8] sm:$0xff]  ;;  %427 = vmatpush.msrb.mxu3 %v1341_v17  ;;  %v1385_v24 = vld [vmem:[%s1813_s1 + $0x40] sm:$0xff]  ;;  %v1402_v27 = vld [vmem:[%s1813_s1 + $0x170] sm:$0xff] }
  0x14   : > { %304 = vmatpush.msra.mxu2 %v1317_v13  ;;  %253 = vmatpush.msra.mxu0 %v1331_v15  ;;  %v1395_v26 = vld [vmem:[%s1813_s1 + $0x1a0] sm:$0xff]  ;;  %v1405_v28 = vld [vmem:[%s1358_s6 + $0x18] sm:$0xff]  ;;  %v203_v29 = vld [vmem:[%s1358_s6 + $0x8] sm:$0xfe] }
  0x15   : > { %392 = vmatpush.msrb.mxu1 %v1322_v14  ;;  %1055 = vmatmul.msk.f32.vlgmr.msra.gmra.mxu3 %vm244_vm0, %v181_v21  ;;  %v1413_v30 = vld [vmem:[%s1813_s1 + $0xd0] sm:$0xff]  ;;  %v235_v31 = vrot.slane %v203_v29, 1  ;;  %v236_v32 = vrot.slane %v1405_v28, 1  ;;  %v1420_v33 = vld [vmem:[%s1813_s1 + $0x38] sm:$0xff]  ;;  %v1426_v34 = vld [vmem:[%s1813_s1 + $0x168] sm:$0xff]  ;;  %v378_v60 = vrot.slane %v1405_v28, 2 }
  0x16   : > { %305 = vmatpush.msra.mxu2 %v1347_v18  ;;  %254 = vmatpush.msra.mxu0 %v1365_v20  ;;  %v1433_v35 = vld [vmem:[%s1813_s1 + $0xc8] sm:$0xff]  ;;  %v1439_v36 = vld [vmem:[%s1813_s1 + $0x30] sm:$0xff]  ;;  %v1445_v37 = vld [vmem:[%s1813_s1 + $0x160] sm:$0xff] }
  0x17   : > { %393 = vmatpush.msrb.mxu1 %v1352_v19  ;;  %428 = vmatpush.msrb.mxu3 %v1395_v26  ;;  %v1452_v38 = vld [vmem:[%s1813_s1 + $0xc0] sm:$0xff]  ;;  %v237_v39 = vsel %vm231_vm1, %v235_v31, %v236_v32  ;;  %v1459_v40 = vld [vmem:[%s1813_s1 + $0x28] sm:$0xff]  ;;  %v1467_v41 = vld [vmem:[%s1813_s1 + $0x158] sm:$0xff] }
  0x18   : > { %306 = vmatpush.msra.mxu2 %v1372_v22  ;;  %255 = vmatpush.msra.mxu0 %v1390_v25  ;;  %v1472_v42 = vld [vmem:[%s1813_s1 + $0xb8] sm:$0xff]  ;;  %v1479_v43 = vld [vmem:[%s1813_s1 + $0x20] sm:$0xff]  ;;  %v205_v44 = vld [vmem:[%s1358_s6 + $0x28] sm:$0x1] }
  0x19   : > { %394 = vmatpush.msrb.mxu1 %v1377_v23  ;;  %514 = vmatpush.msra.mxu3 %v1251_v2  ;;  %v1487_v45 = vld [vmem:[%s1813_s1 + $0x150] sm:$0xff]  ;;  %v1494_v46 = vld [vmem:[%s1813_s1 + $0x18] sm:$0xff]  ;;  %v1506_v48 = vld [vmem:[%s1813_s1 + $0x148] sm:$0xff]  ;;  %v240_v49 = vrot.slane %v205_v44, 1 }
  0x1a   : > { %307 = vmatpush.msra.mxu2 %v1385_v24  ;;  %256 = vmatpush.msra.mxu0 %v1413_v30  ;;  %v1499_v47 = vld [vmem:[%s1813_s1 + $0xb0] sm:$0xff]  ;;  %v1519_v51 = vld [vmem:[%s1813_s1 + $0xa8] sm:$0xff]  ;;  %v1532_v54 = vld [vmem:[%s1813_s1 + $0x140] sm:$0xff] }
  0x1b   : > { %395 = vmatpush.msrb.mxu1 %v1402_v27  ;;  %515 = vmatpush.msra.mxu3 %v1263_v4  ;;  %v1514_v50 = vld [vmem:[%s1813_s1 + $0x10] sm:$0xff]  ;;  %v347_v52 = vld [vmem:[%s1358_s6 + $0x8] sm:$0xfc]  ;;  %v1539_v55 = vld [vmem:[%s1813_s1 + $0xa0] sm:$0xff]  ;;  %v241_v58 = vsel %vm231_vm1, %v236_v32, %v240_v49 }
  0x1c   : > { %308 = vmatpush.msra.mxu2 %v1420_v33  ;;  %257 = vmatpush.msra.mxu0 %v1433_v35  ;;  %v1527_v53 = vld [vmem:[%s1813_s1 + $0x8] sm:$0xff]  ;;  %v1542_v56 = vld [vmem:[%s1358_s6 + $0x10] sm:$0xff]  ;;  %v202_v57 = vld [vmem:[%s1358_s6] sm:$0xfe]  ;;  %v377_v59 = vrot.slane %v347_v52, 2 }
  0x1d   : > { %396 = vmatpush.msrb.mxu1 %v1426_v34  ;;  %516 = vmatpush.msra.mxu3 %v1286_v8  ;;  %v1554_v61 = vld [vmem:[%s1813_s1] sm:$0xff]  ;;  %v1559_v62 = vld [vmem:[%s1813_s1 + $0x138] sm:$0xff]  ;;  %v233_v29 = vrot.slane %v1542_v56, 1  ;;  %v1578_v32 = vld [vmem:[%s1813_s1 + $0x130] sm:$0xff] }
  0x1e   : > { %309 = vmatpush.msra.mxu2 %v1439_v36  ;;  %258 = vmatpush.msra.mxu0 %v1452_v38  ;;  %v180_v63 = vld [vmem:[%s1358_s6] sm:$0xff]  ;;  %v1567_v21 = vld [vmem:[%s1813_s1 + $0x98] sm:$0xff]  ;;  %1818 = vst [vmem:[#allocation2_spill] sm:$0xff] %v1578_v32  ;;  %v1585_v44 = vld [vmem:[%s1813_s1 + $0x90] sm:$0xff] }
  0x1f   : > { %397 = vmatpush.msrb.mxu1 %v1445_v37  ;;  %517 = vmatpush.msra.mxu3 %v1306_v11  ;;  %v346_v31 = vld [vmem:[%s1358_s6] sm:$0xfc] }
  0x20   : > { %1053 = vmatmul.msk.f32.vlgmr.msra.gmra.mxu1 %vm244_vm0, %v237_v39  ;;  %310 = vmatpush.msra.mxu2 %v1459_v40  ;;  %v379_v39 = vsel %vm373_vm2, %v377_v59, %v378_v60  ;;  %v374_v52 = vrot.slane %v346_v31, 2  ;;  %v349_v59 = vld [vmem:[%s1358_s6 + $0x28] sm:$0x3] }
  0x21   : > { %398 = vmatpush.msrb.mxu1 %v1467_v41  ;;  %259 = vmatpush.msra.mxu0 %v1472_v42 }
  0x22   : > { %311 = vmatpush.msra.mxu2 %v1479_v43  ;;  %1056 = vmatmul.msk.f32.gmra.mxu3 %vm244_vm0, %v1405_v28  ;;  %v232_v28 = vrot.slane %v202_v57, 1  ;;  %v375_v57 = vrot.slane %v1542_v56, 2 }
  0x23   : > { %399 = vmatpush.msrb.mxu1 %v1487_v45  ;;  %260 = vmatpush.msra.mxu0 %v1499_v47 }
  0x24   : > { %312 = vmatpush.msra.mxu2 %v1494_v46  ;;  %518 = vmatpush.msra.mxu3 %v1331_v15  ;;  %v234_v49 = vsel %vm231_vm1, %v232_v28, %v233_v29  ;;  %v204_v28 = vld [vmem:[%s1358_s6 + $0x20] sm:$0x1]  ;;  %v376_v31 = vsel %vm373_vm2, %v374_v52, %v375_v57 }
  0x25   : > { %400 = vmatpush.msrb.mxu1 %v1506_v48  ;;  %261 = vmatpush.msra.mxu0 %v1519_v51 }
  0x26   : > { %313 = vmatpush.msra.mxu2 %v1514_v50  ;;  %519 = vmatpush.msra.mxu3 %v1365_v20 }
  0x27   : > { %401 = vmatpush.msrb.mxu1 %v1532_v54  ;;  %262 = vmatpush.msra.mxu0 %v1539_v55 }
  0x28   : > { %314 = vmatpush.msra.mxu2 %v1527_v53  ;;  %1054 = vmatmul.msk.f32.gmra.mxu1 %vm244_vm0, %v241_v58  ;;  %v1596_v58 = vld [vmem:[%s1813_s1 + $0x128] sm:$0xff] }
  0x29   : > { %520 = vmatpush.msra.mxu3 %v1390_v25  ;;  %402 = vmatpush.msrb.mxu1 %v1559_v62 }
  0x2a   : > { %315 = vmatpush.msra.mxu2 %v1554_v61  ;;  %263 = vmatpush.msra.mxu0 %v1567_v21 }
  0x2b   : > { %316 = vmatmul.f32.vlgmr.msra.gmra.mxu2 %v180_v63  ;;  %521 = vmatpush.msra.mxu3 %v1413_v30  ;;  %v1605_v63 = vld [vmem:[%s1813_s1 + $0x120] sm:$0xff] }
  0x2c   : > { %565 = vmatpush.msrb.mxu2 %v1241_v0  ;;  %403 = vmatpush.msrb.mxu1 %v1578_v32  ;;  %v348_v32 = vld [vmem:[%s1358_s6 + $0x20] sm:$0x3] }
  0x2d   : > { %1075 = vmatmul.msk.f32.vlgmr.msrb.gmra.mxu3 %vm244_vm0, %v379_v39  ;;  %264 = vmatpush.msra.mxu0 %v1585_v44  ;;  %v382_v39 = vrot.slane %v349_v59, 2  ;;  %v380_v59 = vrot.slane %v348_v32, 2 }
  0x2e   : > { %566 = vmatpush.msrb.mxu2 %v1246_v1  ;;  %522 = vmatpush.msra.mxu3 %v1433_v35 }
  0x2f   : > { %265 = vmatmul.f32.vlgmr.msra.gmra.mxu0 %v234_v49  ;;  %404 = vmatpush.msrb.mxu1 %v1596_v58  ;;  %v238_v49 = vrot.slane %v204_v28, 1  ;;  %v383_v52 = vsel %vm373_vm2, %v378_v60, %v382_v39  ;;  %v1635_v60 = vld [vmem:[%s1358_s6 + $0x48] sm:$0xff]  ;;  %v1653_v39 = vld [vmem:[%s1358_s6 + $0x40] sm:$0xff] }
  0x30   : > { %567 = vmatpush.msrb.mxu2 %v1269_v5  ;;  %523 = vmatpush.msra.mxu3 %v1452_v38 }
  0x31   : > { %551 = vmatpush.msrb.mxu0 %v1258_v3  ;;  %405 = vmatpush.msrb.mxu1 %v1605_v63  ;;  %v239_v28 = vsel %vm231_vm1, %v233_v29, %v238_v49  ;;  %v1082_v29 = vld [vmem:[%s1358_s6 + $0x38] sm:$0xfe]  ;;  %v1081_v49 = vld [vmem:[%s1358_s6 + $0x30] sm:$0xfe] }
  0x32   : > { %568 = vmatpush.msrb.mxu2 %v1292_v9  ;;  %406 = vmatmul.f32.vlgmr.msrb.gmra.mxu1 %v376_v31  ;;  %v501_v32 = vrot.slane %v1082_v29, 1  ;;  %v1078_v31 = vld [vmem:[%s1358_s6 + $0x38] sm:$0xff]  ;;  %v638_v29 = vrot.slane %v1653_v39, 2 }
  0x33   : > { %524 = vmatpush.msra.mxu3 %v1472_v42  ;;  %552 = vmatpush.msrb.mxu0 %v1274_v6 }
  0x34   : > { %319 = vmatmul.f32.gmra.mxu2 %v1542_v56  ;;  %602 = vmatpush.msra.mxu1 %v1311_v12  ;;  %v381_v56 = vsel %vm373_vm2, %v375_v57, %v380_v59  ;;  %v502_v57 = vrot.slane %v1635_v60, 1  ;;  %v499_v59 = vrot.slane %v1653_v39, 1 }
  0x35   : > { %569 = vmatpush.msrb.mxu2 %v1317_v13  ;;  %653 = vmatpush.msra.mxu0 %v1279_v7 }
  0x36   : > { %525 = vmatpush.msra.mxu3 %v1499_v47  ;;  %603 = vmatpush.msra.mxu1 %v1336_v16 }
  0x37   : > { %1076 = vmatmul.msk.f32.gmra.mxu3 %vm244_vm0, %v383_v52  ;;  %570 = vmatpush.msrb.mxu2 %v1347_v18  ;;  %v503_v52 = vsel %vm231_vm1, %v501_v32, %v502_v57 }
  0x38   : > { %654 = vmatpush.msra.mxu0 %v1297_v10  ;;  %526 = vmatpush.msra.mxu3 %v1519_v51 }
  0x39   : > { %268 = vmatmul.f32.gmra.mxu0 %v239_v28  ;;  %571 = vmatpush.msrb.mxu2 %v1372_v22 }
  0x3a   : > { %655 = vmatpush.msra.mxu0 %v1322_v14  ;;  %527 = vmatpush.msra.mxu3 %v1539_v55 }
  0x3b   : > { %572 = vmatpush.msrb.mxu2 %v1385_v24  ;;  %409 = vmatmul.f32.gmra.mxu1 %v381_v56  ;;  %v1083_v56 = vld [vmem:[%s1358_s6 + $0x50] sm:$0x1] }
  0x3c   : > { %656 = vmatpush.msra.mxu0 %v1352_v19  ;;  %528 = vmatpush.msra.mxu3 %v1567_v21 }
  0x3d   : > { %573 = vmatpush.msrb.mxu2 %v1420_v33  ;;  %690 = vmatpush.msrb.mxu1 %v1341_v17 }
  0x3e   : > { %657 = vmatpush.msra.mxu0 %v1377_v23  ;;  %529 = vmatpush.msra.mxu3 %v1585_v44 }
  0x3f   : > { %574 = vmatpush.msrb.mxu2 %v1439_v36  ;;  %691 = vmatpush.msrb.mxu1 %v1395_v26 }
  0x40   : > { %775 = vmatpush.msrb.mxu3 %v1251_v2  ;;  %658 = vmatpush.msra.mxu0 %v1402_v27  ;;  %v1084_v2 = vld [vmem:[%s1358_s6 + $0x58] sm:$0x1] }
  0x41   : > { %575 = vmatpush.msrb.mxu2 %v1459_v40  ;;  %1103 = vmatmul.msk.f32.vlgmr.msrb.gmra.mxu0 %vm244_vm0, %v503_v52  ;;  %v506_v28 = vrot.slane %v1084_v2, 1 }
  0x42   : > { %776 = vmatpush.msrb.mxu3 %v1263_v4  ;;  %659 = vmatpush.msra.mxu0 %v1426_v34  ;;  %v498_v4 = vrot.slane %v1081_v49, 1 }
  0x43   : > { %576 = vmatpush.msrb.mxu2 %v1479_v43  ;;  %1105 = vmatmul.msk.f32.vlgmr.msra.gmra.mxu1 %vm244_vm0, %v1078_v31 }
  0x44   : > { %777 = vmatpush.msrb.mxu3 %v1286_v8  ;;  %660 = vmatpush.msra.mxu0 %v1445_v37  ;;  %v500_v8 = vsel %vm231_vm1, %v498_v4, %v499_v59 }
  0x45   : > { %577 = vmatpush.msrb.mxu2 %v1494_v46  ;;  %826 = vmatpush.msra.mxu1 %v1241_v0  ;;  %v1077_v0 = vld [vmem:[%s1358_s6 + $0x30] sm:$0xff] }
  0x46   : > { %661 = vmatpush.msra.mxu0 %v1467_v41  ;;  %778 = vmatpush.msrb.mxu3 %v1306_v11  ;;  %v507_v11 = vsel %vm231_vm1, %v502_v57, %v506_v28 }
  0x47   : > { %578 = vmatpush.msrb.mxu2 %v1514_v50  ;;  %827 = vmatpush.msra.mxu1 %v1246_v1  ;;  %v504_v1 = vrot.slane %v1083_v56, 1 }
  0x48   : > { %662 = vmatpush.msra.mxu0 %v1487_v45  ;;  %779 = vmatpush.msrb.mxu3 %v1331_v15  ;;  %v1107_v15 = vld [vmem:[%s1358_s6 + $0x30] sm:$0xfc] }
  0x49   : > { %579 = vmatpush.msrb.mxu2 %v1527_v53  ;;  %530 = vmatmul.f32.vlgmr.msra.gmra.mxu3 %v500_v8 }
  0x4a   : > { %663 = vmatpush.msra.mxu0 %v1506_v48  ;;  %780 = vmatpush.msrb.mxu3 %v1365_v20  ;;  %v1108_v20 = vld [vmem:[%s1358_s6 + $0x38] sm:$0xfc] }
  0x4b   : > { %580 = vmatpush.msrb.mxu2 %v1554_v61  ;;  %828 = vmatpush.msra.mxu1 %v1269_v5  ;;  %v1819_v5 = vld [vmem:[#allocation2_spill] sm:$0xff]  ;;  %v640_v32 = vrot.slane %v1108_v20, 2 }
  0x4c   : > { %664 = vmatpush.msra.mxu0 %v1532_v54  ;;  %781 = vmatpush.msrb.mxu3 %v1390_v25  ;;  %v637_v25 = vrot.slane %v1107_v15, 2 }
  0x4d   : > { %1104 = vmatmul.msk.f32.gmra.mxu0 %vm244_vm0, %v507_v11  ;;  %581 = vmatmul.f32.vlgmr.msrb.gmra.mxu2 %v1077_v0  ;;  %v1789_v11 = vld [vmem:[%s1814_s2] ss:$0 sm:$0xff] }
  0x4e   : > { %1106 = vmatmul.msk.f32.gmra.mxu1 %vm244_vm0, %v1635_v60  ;;  %812 = vmatpush.msra.mxu2 %v1258_v3  ;;  %v505_v3 = vsel %vm231_vm1, %v499_v59, %v504_v1 }
  0x4f   : > { %665 = vmatpush.msra.mxu0 %v1559_v62  ;;  %782 = vmatpush.msrb.mxu3 %v1413_v30  ;;  %v641_v30 = vrot.slane %v1635_v60, 2 }
  0x50   : > { %829 = vmatpush.msra.mxu1 %v1292_v9  ;;  %813 = vmatpush.msra.mxu2 %v1274_v6  ;;  %v639_v6 = vsel %vm373_vm2, %v637_v25, %v638_v29  ;;  %v1109_v9 = vld [vmem:[%s1358_s6 + $0x50] sm:$0x3] }
  0x51   : > { %666 = vmatpush.msra.mxu0 %v1819_v5  ;;  %783 = vmatpush.msrb.mxu3 %v1433_v35  ;;  %v643_v35 = vrot.slane %v1109_v9, 2 }
  0x52   : > { %830 = vmatpush.msra.mxu1 %v1317_v13  ;;  %914 = vmatpush.msrb.mxu2 %v1279_v7  ;;  %v642_v7 = vsel %vm373_vm2, %v640_v32, %v641_v30  ;;  %v1110_v13 = vld [vmem:[%s1358_s6 + $0x58] sm:$0x3] }
  0x53   : > { %667 = vmatpush.msra.mxu0 %v1596_v58  ;;  %784 = vmatpush.msrb.mxu3 %v1452_v38  ;;  %v1724_v38 = vld [vmem:[%s1358_s6 + $0x78] sm:$0xff] }
  0x54   : > { %831 = vmatpush.msra.mxu1 %v1347_v18  ;;  %915 = vmatpush.msrb.mxu2 %v1297_v10  ;;  %v1718_v10 = vld [vmem:[%s1358_s6 + $0x70] sm:$0xff]  ;;  %v1137_v18 = vld [vmem:[%s1358_s6 + $0x60] sm:$0xfe] }
  0x55   : > { %533 = vmatmul.f32.gmra.mxu3 %v505_v3  ;;  %668 = vmatpush.msra.mxu0 %v1605_v63 }
  0x56   : > { %785 = vmatpush.msrb.mxu3 %v1472_v42  ;;  %832 = vmatpush.msra.mxu1 %v1372_v22  ;;  %v645_v22 = vrot.slane %v1110_v13, 2  ;;  %v759_v42 = vrot.slane %v1137_v18, 1 }
  0x57   : > { %916 = vmatpush.msrb.mxu2 %v1322_v14  ;;  %669 = vmatmul.f32.vlgmr.msra.gmra.mxu0 %v639_v6  ;;  %v1138_v14 = vld [vmem:[%s1358_s6 + $0x68] sm:$0xfe] }
  0x58   : > { %584 = vmatmul.f32.gmra.mxu2 %v1653_v39  ;;  %1129 = vmatmul.msk.f32.vlgmr.msrb.gmra.mxu1 %vm244_vm0, %v642_v7 }
  0x59   : > { %786 = vmatpush.msrb.mxu3 %v1499_v47  ;;  %833 = vmatpush.msra.mxu1 %v1385_v24  ;;  %v760_v47 = vrot.slane %v1718_v10, 1  ;;  %v762_v24 = vrot.slane %v1138_v14, 1 }
  0x5a   : > { %917 = vmatpush.msrb.mxu2 %v1352_v19  ;;  %863 = vmatpush.msrb.mxu0 %v1311_v12  ;;  %v763_v19 = vrot.slane %v1724_v38, 1  ;;  %v644_v12 = vsel %vm373_vm2, %v638_v29, %v643_v35 }
  0x5b   : > { %787 = vmatpush.msrb.mxu3 %v1519_v51  ;;  %834 = vmatpush.msra.mxu1 %v1420_v33  ;;  %v761_v33 = vsel %vm231_vm1, %v759_v42, %v760_v47  ;;  %v1164_v51 = vld [vmem:[%s1358_s6 + $0x68] sm:$0xfc] }
  0x5c   : > { %918 = vmatpush.msrb.mxu2 %v1377_v23  ;;  %864 = vmatpush.msrb.mxu0 %v1336_v16  ;;  %v646_v23 = vsel %vm373_vm2, %v641_v30, %v645_v22  ;;  %v764_v16 = vsel %vm231_vm1, %v762_v24, %v763_v19 }
  0x5d   : > { %788 = vmatpush.msrb.mxu3 %v1539_v55  ;;  %835 = vmatpush.msra.mxu1 %v1439_v36  ;;  %v1140_v36 = vld [vmem:[%s1358_s6 + $0x88] sm:$0x1]  ;;  %v1165_v55 = vld [vmem:[%s1358_s6 + $0x80] sm:$0x3] }
  0x5e   : > { %919 = vmatpush.msrb.mxu2 %v1402_v27  ;;  %v1139_v27 = vld [vmem:[%s1358_s6 + $0x80] sm:$0x1] }
  0x5f   : > { %789 = vmatpush.msrb.mxu3 %v1567_v21  ;;  %836 = vmatpush.msra.mxu1 %v1459_v40  ;;  %v767_v40 = vrot.slane %v1140_v36, 1 }
  0x60   : > { %920 = vmatpush.msrb.mxu2 %v1426_v34  ;;  %672 = vmatmul.f32.gmra.mxu0 %v644_v12  ;;  %v765_v34 = vrot.slane %v1139_v27, 1 }
  0x61   : > { %1130 = vmatmul.msk.f32.gmra.mxu1 %vm244_vm0, %v646_v23  ;;  %790 = vmatpush.msrb.mxu3 %v1585_v44 }
  0x62   : > { %837 = vmatpush.msra.mxu1 %v1479_v43  ;;  %921 = vmatpush.msrb.mxu2 %v1445_v37  ;;  %v1134_v37 = vld [vmem:[%s1358_s6 + $0x68] sm:$0xff]  ;;  %v768_v43 = vsel %vm231_vm1, %v763_v19, %v767_v40 }
  0x63   : > { %791 = vmatmul.f32.vlgmr.msrb.gmra.mxu3 %v761_v33  ;;  %1159 = vmatmul.msk.f32.vlgmr.msra.gmra.mxu2 %vm244_vm0, %v764_v16 }
  0x64   : > { %951 = vmatpush.msra.mxu3 %v1341_v17  ;;  %838 = vmatpush.msra.mxu1 %v1494_v46  ;;  %v766_v17 = vsel %vm231_vm1, %v760_v47, %v765_v34  ;;  %v1133_v46 = vld [vmem:[%s1358_s6 + $0x60] sm:$0xff] }
  0x65   : > { %922 = vmatpush.msrb.mxu2 %v1467_v41  ;;  %v1163_v41 = vld [vmem:[%s1358_s6 + $0x60] sm:$0xfc] }
  0x66   : > { %952 = vmatpush.msra.mxu3 %v1395_v26  ;;  %839 = vmatpush.msra.mxu1 %v1514_v50  ;;  %v898_v26 = vrot.slane %v1163_v41, 2  ;;  %v902_v50 = vrot.slane %v1724_v38, 2 }
  0x67   : > { %923 = vmatpush.msrb.mxu2 %v1487_v45  ;;  %v899_v45 = vrot.slane %v1718_v10, 2 }
  0x68   : > { %840 = vmatpush.msra.mxu1 %v1527_v53  ;;  %1161 = vmatmul.msk.f32.vlgmr.msrb.gmra.mxu0 %vm244_vm0, %v1134_v37 }
  0x69   : > { %924 = vmatpush.msrb.mxu2 %v1506_v48  ;;  %v901_v48 = vrot.slane %v1164_v51, 2  ;;  %v900_v53 = vsel %vm373_vm2, %v898_v26, %v899_v45 }
  0x6a   : > { %841 = vmatpush.msra.mxu1 %v1554_v61  ;;  %v1166_v61 = vld [vmem:[%s1358_s6 + $0x88] sm:$0x3] }
  0x6b   : > { %925 = vmatpush.msrb.mxu2 %v1532_v54  ;;  %794 = vmatmul.f32.gmra.mxu3 %v766_v17  ;;  %v903_v54 = vsel %vm373_vm2, %v901_v48, %v902_v50  ;;  %v906_v21 = vrot.slane %v1166_v61, 2 }
  0x6c   : > { %1160 = vmatmul.msk.f32.gmra.mxu2 %vm244_vm0, %v768_v43  ;;  %842 = vmatmul.f32.vlgmr.msra.gmra.mxu1 %v1133_v46 }
  0x6d   : > { %926 = vmatpush.msrb.mxu2 %v1559_v62  ;;  %v904_v62 = vrot.slane %v1165_v55, 2 }
  0x6f   : > { %927 = vmatpush.msrb.mxu2 %v1819_v5  ;;  %v905_v44 = vsel %vm373_vm2, %v899_v45, %v904_v62 }
  0x70   : > { %1162 = vmatmul.msk.f32.gmra.mxu0 %vm244_vm0, %v1724_v38 }
  0x71   : > { %928 = vmatpush.msrb.mxu2 %v1596_v58  ;;  %v907_v58 = vsel %vm373_vm2, %v902_v50, %v906_v21 }
  0x73   : > { %929 = vmatpush.msrb.mxu2 %v1605_v63  ;;  %1185 = vmatmul.msk.f32.vlgmr.msra.gmra.mxu3 %vm244_vm0, %v903_v54 }
  0x74   : > { %930 = vmatmul.f32.vlgmr.msrb.gmra.mxu2 %v900_v53  ;;  %845 = vmatmul.f32.gmra.mxu1 %v1718_v10 }
  0x7b   : > { %1186 = vmatmul.msk.f32.gmra.mxu3 %vm244_vm0, %v907_v58 }
  0x7c   : > { %933 = vmatmul.f32.gmra.mxu2 %v905_v44 }
  0x98   : > { %v340_v57 = vpop.f32.mrf.mxu3 }
  0x9d   : > { %v289_v60 = vpop.f32.mrf.mxu1 }
  0xa5   : > { %v292_v31 = vpop.f32.mrf.mxu1  ;;  %v343_v39 = vpop.f32.mrf.mxu3 }
  0xac   : > { %v266_v63 = vpop.f32.mrf.mxu0 }
  0xad   : > { %v290_v49 = vadd.f32 %v289_v60, %v266_v63 }
  0xae   : > { %v317_v52 = vpop.f32.mrf.mxu2 }
  0xaf   : > { %v318_v2 = vadd.f32 %v317_v52, %v290_v49  ;;  %v407_v4 = vpop.f32.mrf.mxu1 }
  0xb0   : > { %v430_v59 = vpop.f32.mrf.mxu3 }
  0xb1   : > { %v341_v28 = vadd.f32 %v340_v57, %v318_v2  ;;  %v431_v8 = vadd.f32 %v430_v59, %v407_v4 }
  0xb3   : > { %v436_v0 = vadd.f32 %v431_v8, %v341_v28 }
  0xb5   : > { %v441_v56 = vadd.f32 %v1789_v11, %v436_v0 }
  0xb6   : > { %v269_v1 = vpop.f32.mrf.mxu0 }
  0xb7   : > { %v443_v15 = vmax.f32 %v441_v56, 0.0  ;;  %v293_v20 = vadd.f32 %v292_v31, %v269_v1  ;;  %v320_v5 = vpop.f32.mrf.mxu2 }
  0xb8   : > { %v410_v25 = vpop.f32.mrf.mxu1 }
  0xb9   : > { %445 = vst [vmem:[%s1796_s7] sm:$0xff] %v443_v15  ;;  %v321_v29 = vadd.f32 %v320_v5, %v293_v20 }
  0xba   : > { %v433_v3 = vpop.f32.mrf.mxu3 }
  0xbb   : > { %v344_v32 = vadd.f32 %v343_v39, %v321_v29  ;;  %v434_v30 = vadd.f32 %v433_v3, %v410_v25 }
  0xbd   : > { %v437_v6 = vadd.f32 %v434_v30, %v344_v32 }
  0xbe   : > { %v554_v13 = vpop.f32.mrf.mxu0 }
  0xbf   : > { %v442_v7 = vadd.f32 %v1789_v11, %v437_v6 }
  0xc0   : > { %v605_v10 = vpop.f32.mrf.mxu1 }
  0xc1   : > { %v444_v9 = vmax.f32 %v442_v7, 0.0 }
  0xc3   : > { %446 = vst [vmem:[%s1796_s7 + $0x8] sm:$0xff] %v444_v9 }
  0xca   : > { %v557_v18 = vpop.f32.mrf.mxu0 }
  0xcb   : > { %v608_v35 = vpop.f32.mrf.mxu1 }
  0xcc   : > { %v531_v22 = vpop.f32.mrf.mxu3 }
  0xcd   : > { %v555_v38 = vadd.f32 %v554_v13, %v531_v22 }
  0xd0   : > { %v582_v14 = vpop.f32.mrf.mxu2 }
  0xd1   : > { %v583_v42 = vadd.f32 %v582_v14, %v555_v38 }
  0xd3   : > { %v606_v47 = vadd.f32 %v605_v10, %v583_v42 }
  0xd4   : > { %v670_v24 = vpop.f32.mrf.mxu0 }
  0xd5   : > { %v693_v19 = vpop.f32.mrf.mxu1 }
  0xd6   : > { %v694_v12 = vadd.f32 %v693_v19, %v670_v24 }
  0xd8   : > { %v534_v23 = vpop.f32.mrf.mxu3  ;;  %v699_v33 = vadd.f32 %v694_v12, %v606_v47 }
  0xd9   : > { %v558_v16 = vadd.f32 %v557_v18, %v534_v23 }
  0xda   : > { %v701_v27 = vadd.f32 %v1789_v11, %v699_v33 }
  0xdb   : > { %v585_v36 = vpop.f32.mrf.mxu2 }
  0xdc   : > { %v586_v34 = vadd.f32 %v585_v36, %v558_v16  ;;  %v703_v40 = vmax.f32 %v701_v27, 0.0 }
  0xdd   : > { %v673_v17 = vpop.f32.mrf.mxu0 }
  0xde   : > { %v609_v37 = vadd.f32 %v608_v35, %v586_v34  ;;  %v696_v43 = vpop.f32.mrf.mxu1  ;;  %1131 = vst [vmem:[%s1796_s7 + $0x10] sm:$0xff] %v703_v40 }
  0xdf   : > { %v697_v46 = vadd.f32 %v696_v43, %v673_v17 }
  0xe1   : > { %v700_v41 = vadd.f32 %v697_v46, %v609_v37 }
  0xe3   : > { %v702_v51 = vadd.f32 %v1789_v11, %v700_v41 }
  0xe5   : > { %v704_v26 = vmax.f32 %v702_v51, 0.0  ;;  %v866_v61 = vpop.f32.mrf.mxu0 }
  0xe6   : > { %v792_v45 = vpop.f32.mrf.mxu3  ;;  %v815_v48 = vpop.f32.mrf.mxu2 }
  0xe7   : > { %1132 = vst [vmem:[%s1796_s7 + $0x18] sm:$0xff] %v704_v26  ;;  %v816_v55 = vadd.f32 %v815_v48, %v792_v45 }
  0xe9   : > { %v843_v50 = vpop.f32.mrf.mxu1 }
  0xea   : > { %v844_v62 = vadd.f32 %v843_v50, %v816_v55 }
  0xec   : > { %v867_v58 = vadd.f32 %v866_v61, %v844_v62 }
  0xed   : > { %v869_v52 = vpop.f32.mrf.mxu0 }
  0xee   : > { %v795_v53 = vpop.f32.mrf.mxu3 }
  0xef   : > { %v818_v54 = vpop.f32.mrf.mxu2 }
  0xf0   : > { %v819_v60 = vadd.f32 %v818_v54, %v795_v53 }
  0xf1   : > { %v846_v31 = vpop.f32.mrf.mxu1 }
  0xf2   : > { %v847_v63 = vadd.f32 %v846_v31, %v819_v60 }
  0xf4   : > { %v870_v28 = vadd.f32 %v869_v52, %v847_v63 }
  0xf6   : > { %v954_v44 = vpop.f32.mrf.mxu3 }
  0xf7   : > { %v931_v21 = vpop.f32.mrf.mxu2 }
  0xf8   : > { %v955_v57 = vadd.f32 %v954_v44, %v931_v21 }
  0xfa   : > { %v960_v39 = vadd.f32 %v955_v57, %v867_v58 }
  0xfc   : > { %v962_v49 = vadd.f32 %v1789_v11, %v960_v39 }
  0xfe   : > { %v964_v2 = vmax.f32 %v962_v49, 0.0  ;;  %v957_v59 = vpop.f32.mrf.mxu3 }
  0xff   : > { %v934_v4 = vpop.f32.mrf.mxu2 }
 0x100   : > { %1187 = vst [vmem:[%s1796_s7 + $0x20] sm:$0xff] %v964_v2  ;;  %v958_v8 = vadd.f32 %v957_v59, %v934_v4 }
 0x102   : > { %v961_v0 = vadd.f32 %v958_v8, %v870_v28 }
 0x104   : > { %v963_v56 = vadd.f32 %v1789_v11, %v961_v0 }
 0x106   : > { %v965_v1 = vmax.f32 %v963_v56, 0.0 }
 0x108   : > { %1188 = vst [vmem:[%s1796_s7 + $0x28] sm:$0xff] %v965_v1 }
 0x109 PF: > { %s13_s12 = sadd.s32 1, %s1208_s12  }
 0x10a   : > { %p10_p4 = scmp.ge.s32.totalorder %s13_s12, 4  }
 0x10c   :  { %12 = sbr.rel (!%p10_p4) target bundleno = 1 (0x1), region = 68 }

// kernel: forward.9
= control target key start
LH: loop header
LB: loop body
LE: loop exit
PB: predicated region body
PF: predicated region fallthrough
CT: control target
= control target key end

     0   :  { %s688_s12 = smov 0   ;;  %s981_s0 = inlined_call_operand.vmem [shape: f32[6,10,80], index: 0, kind: input, shape index: {}]   ;;  %s982_s1 = inlined_call_operand.vmem [shape: f32[3,80,64], index: 1, kind: input, shape index: {}]   ;;  %s983_s2 = inlined_call_operand.vmem [shape: f32[1,64], index: 2, kind: input, shape index: {}]   ;;  %s984_s3 = inlined_call_operand.vmem [shape: f32[6,8,64], index: 3, kind: output, shape index: {}]  }
   0x1 LB: > { %s563_s13 = sadd.s32 4294967295, %s666_s12   ;;  %p567_p0 = scmp.ge.s32.totalorder %s666_s12, 1  ;;  %s666_s12 = sphi %s688_s12, %s13_s12  }
   0x2   : > { %p139_p1 = scmp.lt.s32.totalorder %s666_s12, 3 }
   0x4   : > { %p140_p2 = pnand %p567_p0, %p139_p1 }
   0x5   : > { %s766_s11 = smul.u32 (!%p140_p2), 3, %s563_s13 }
   0x6   : > { %143 = sbr.rel (%p140_p2) target bundleno = 204 (0xcc), region = 32 }
   0x7   : > { %p165_p3 = scmp.lt.s32.totalorder (!%p140_p2), %s766_s11, 5 }
   0xb   : > { %v699_v0 = vld [vmem:[%s982_s1 + $0x98] sm:$0xff]  ;;  %v704_v1 = vld [vmem:[%s982_s1 + $0x90] sm:$0xff]  ;;  %v711_v2 = vld [vmem:[%s982_s1 + $0x88] sm:$0xff]  ;;  %s986_s11 = smov (!%p165_p3, %s766_s11), 5  ;;  %vm201_vm0 = vcmask 654336   ;;  %vm289_vm1 = vcmask 523264  }
   0xc   : > { %211 = vmatpush.msra.mxu0 %v699_v0  ;;  %323 = vmatpush.msra.mxu3 %v699_v0  ;;  %v716_v3 = vld [vmem:[%s982_s1 + $0x48] sm:$0xff]  ;;  %v728_v5 = vld [vmem:[%s982_s1 + $0x40] sm:$0xff]  ;;  %v745_v8 = vld [vmem:[%s982_s1 + $0x38] sm:$0xff]  ;;  %s650_s22 = sshll.u32 %s986_s11, 4  ;;  %s570_s30 = sshll.u32 %s986_s11, 3 }
   0xd   : > { %v721_v4 = vld [vmem:[%s982_s1 + $0xe8] sm:$0xff]  ;;  %234 = vmatpush.msra.mxu1 %v716_v3  ;;  %v733_v6 = vld [vmem:[%s982_s1 + $0xe0] sm:$0xff]  ;;  %v752_v9 = vld [vmem:[%s982_s1 + $0xd8] sm:$0xff]  ;;  %s898_s27 = scalar_lea.vmem %s981_s0, %s650_s22  ;;  %s175_s6 = scalar_lea.vmem %s984_s3, %s570_s30 }
   0xe   : > { %212 = vmatpush.msra.mxu0 %v704_v1  ;;  %v738_v7 = vld [vmem:[%s982_s1 + $0x80] sm:$0xff]  ;;  %269 = vmatpush.msra.mxu2 %v721_v4  ;;  %v757_v10 = vld [vmem:[%s982_s1 + $0x78] sm:$0xff]  ;;  %v764_v11 = vld [vmem:[%s982_s1 + $0x30] sm:$0xff] }
   0xf   : > { %324 = vmatpush.msra.mxu3 %v704_v1  ;;  %235 = vmatpush.msra.mxu1 %v728_v5  ;;  %v773_v12 = vld [vmem:[%s982_s1 + $0xd0] sm:$0xff]  ;;  %v785_v14 = vld [vmem:[%s982_s1 + $0x28] sm:$0xff]  ;;  %v804_v17 = vld [vmem:[%s982_s1 + $0x20] sm:$0xff] }
  0x10   : > { %213 = vmatpush.msra.mxu0 %v711_v2  ;;  %270 = vmatpush.msra.mxu2 %v733_v6  ;;  %v778_v13 = vld [vmem:[%s982_s1 + $0x70] sm:$0xff]  ;;  %v792_v15 = vld [vmem:[%s982_s1 + $0xc8] sm:$0xff]  ;;  %v812_v18 = vld [vmem:[%s982_s1 + $0xc0] sm:$0xff] }
  0x11   : > { %325 = vmatpush.msra.mxu3 %v711_v2  ;;  %236 = vmatpush.msra.mxu1 %v745_v8  ;;  %v797_v16 = vld [vmem:[%s982_s1 + $0x68] sm:$0xff]  ;;  %v817_v19 = vld [vmem:[%s982_s1 + $0x60] sm:$0xff]  ;;  %v824_v20 = vld [vmem:[%s982_s1 + $0x18] sm:$0xff] }
  0x12   : > { %214 = vmatpush.msra.mxu0 %v738_v7  ;;  %271 = vmatpush.msra.mxu2 %v752_v9  ;;  %v831_v21 = vld [vmem:[%s982_s1 + $0xb8] sm:$0xff]  ;;  %v843_v23 = vld [vmem:[%s982_s1 + $0x10] sm:$0xff]  ;;  %v867_v26 = vld [vmem:[%s982_s1 + $0x8] sm:$0xff] }
  0x13   : > { %326 = vmatpush.msra.mxu3 %v738_v7  ;;  %237 = vmatpush.msra.mxu1 %v764_v11  ;;  %v836_v22 = vld [vmem:[%s982_s1 + $0x58] sm:$0xff]  ;;  %v855_v24 = vld [vmem:[%s982_s1 + $0xb0] sm:$0xff]  ;;  %v874_v27 = vld [vmem:[%s982_s1 + $0xa8] sm:$0xff] }
  0x14   : > { %215 = vmatpush.msra.mxu0 %v757_v10  ;;  %272 = vmatpush.msra.mxu2 %v773_v12  ;;  %v860_v25 = vld [vmem:[%s982_s1 + $0x50] sm:$0xff]  ;;  %v881_v28 = vld [vmem:[%s982_s1] sm:$0xff] }
  0x15   : > { %327 = vmatpush.msra.mxu3 %v757_v10  ;;  %238 = vmatpush.msra.mxu1 %v785_v14  ;;  %v889_v29 = vld [vmem:[%s982_s1 + $0xa0] sm:$0xff]  ;;  %v595_v33 = vld [vmem:[%s898_s27 + $0x11] sm:$0xff] }
  0x16   : > { %216 = vmatpush.msra.mxu0 %v778_v13  ;;  %273 = vmatpush.msra.mxu2 %v792_v15  ;;  %v248_v30 = vld [vmem:[%s898_s27 + $0x2] sm:$0xff]  ;;  %v594_v34 = vld [vmem:[%s898_s27 + $0x10] sm:$0xff]  ;;  %v659_v43 = vld [vmem:[%s983_s2] ss:$0 sm:$0xff] }
  0x17   : > { %328 = vmatpush.msra.mxu3 %v778_v13  ;;  %239 = vmatpush.msra.mxu1 %v804_v17  ;;  %v189_v31 = vld [vmem:[%s898_s27 + $0x1] sm:$0xff]  ;;  %v608_v35 = vld [vmem:[%s898_s27 + $0x12] sm:$0xff] }
  0x18   : > { %217 = vmatpush.msra.mxu0 %v797_v16  ;;  %274 = vmatpush.msra.mxu2 %v812_v18  ;;  %v178_v32 = vld [vmem:[%s898_s27] sm:$0xff] }
  0x19   : > { %329 = vmatpush.msra.mxu3 %v797_v16  ;;  %240 = vmatpush.msra.mxu1 %v824_v20  ;;  %v622_v36 = vld [vmem:[%s898_s27 + $0x21] sm:$0xff] }
  0x1a   : > { %218 = vmatpush.msra.mxu0 %v817_v19  ;;  %275 = vmatpush.msra.mxu2 %v831_v21  ;;  %v621_v37 = vld [vmem:[%s898_s27 + $0x20] sm:$0xff] }
  0x1b   : > { %330 = vmatpush.msra.mxu3 %v817_v19  ;;  %241 = vmatpush.msra.mxu1 %v843_v23  ;;  %v635_v38 = vld [vmem:[%s898_s27 + $0x22] sm:$0xff] }
  0x1c   : > { %219 = vmatpush.msra.mxu0 %v836_v22  ;;  %276 = vmatpush.msra.mxu2 %v855_v24 }
  0x1d   : > { %331 = vmatpush.msra.mxu3 %v836_v22  ;;  %242 = vmatpush.msra.mxu1 %v867_v26 }
  0x1e   : > { %220 = vmatpush.msra.mxu0 %v860_v25  ;;  %277 = vmatpush.msra.mxu2 %v874_v27 }
  0x1f   : > { %243 = vmatpush.msra.mxu1 %v881_v28  ;;  %332 = vmatpush.msra.mxu3 %v860_v25 }
  0x20   : > { %346 = vmatpush.msrb.mxu0 %v716_v3  ;;  %278 = vmatpush.msra.mxu2 %v889_v29 }
  0x21   : > { %380 = vmatpush.msrb.mxu1 %v721_v4  ;;  %454 = vmatpush.msrb.mxu3 %v716_v3 }
  0x22   : > { %347 = vmatpush.msrb.mxu0 %v728_v5  ;;  %431 = vmatpush.msrb.mxu2 %v699_v0 }
  0x23   : > { %381 = vmatpush.msrb.mxu1 %v733_v6  ;;  %455 = vmatpush.msrb.mxu3 %v728_v5 }
  0x24   : > { %348 = vmatpush.msrb.mxu0 %v745_v8  ;;  %432 = vmatpush.msrb.mxu2 %v704_v1 }
  0x25   : > { %593 = vmatmul.msk.f32.vlgmr.msra.gmra.mxu2 %vm201_vm0, %v248_v30  ;;  %382 = vmatpush.msrb.mxu1 %v752_v9 }
  0x26   : > { %349 = vmatpush.msrb.mxu0 %v764_v11  ;;  %433 = vmatpush.msrb.mxu2 %v711_v2 }
  0x27   : > { %456 = vmatpush.msrb.mxu3 %v745_v8  ;;  %383 = vmatpush.msrb.mxu1 %v773_v12 }
  0x28   : > { %350 = vmatpush.msrb.mxu0 %v785_v14  ;;  %434 = vmatpush.msrb.mxu2 %v738_v7 }
  0x29   : > { %457 = vmatpush.msrb.mxu3 %v764_v11  ;;  %581 = vmatmul.msk.f32.vlgmr.msra.gmra.mxu0 %vm201_vm0, %v189_v31 }
  0x2a   : > { %351 = vmatpush.msrb.mxu0 %v804_v17  ;;  %582 = vmatmul.msk.f32.vlgmr.msra.gmra.mxu1 %vm201_vm0, %v178_v32 }
  0x2b   : > { %384 = vmatpush.msrb.mxu1 %v792_v15  ;;  %435 = vmatpush.msrb.mxu2 %v757_v10 }
  0x2c   : > { %352 = vmatpush.msrb.mxu0 %v824_v20  ;;  %458 = vmatpush.msrb.mxu3 %v785_v14 }
  0x2d   : > { %385 = vmatpush.msrb.mxu1 %v812_v18  ;;  %436 = vmatpush.msrb.mxu2 %v778_v13 }
  0x2e   : > { %353 = vmatpush.msrb.mxu0 %v843_v23  ;;  %459 = vmatpush.msrb.mxu3 %v804_v17 }
  0x2f   : > { %606 = vmatmul.msk.f32.vlgmr.msra.gmra.mxu3 %vm201_vm0, %v595_v33  ;;  %386 = vmatpush.msrb.mxu1 %v831_v21 }
  0x30   : > { %354 = vmatpush.msrb.mxu0 %v867_v26  ;;  %437 = vmatpush.msrb.mxu2 %v797_v16 }
  0x31   : > { %460 = vmatpush.msrb.mxu3 %v824_v20  ;;  %387 = vmatpush.msrb.mxu1 %v855_v24 }
  0x32   : > { %355 = vmatpush.msrb.mxu0 %v881_v28  ;;  %438 = vmatpush.msrb.mxu2 %v817_v19 }
  0x33   : > { %461 = vmatpush.msrb.mxu3 %v843_v23  ;;  %388 = vmatpush.msrb.mxu1 %v874_v27 }
  0x34   : > { %488 = vmatpush.msra.mxu0 %v721_v4  ;;  %439 = vmatpush.msrb.mxu2 %v836_v22 }
  0x35   : > { %462 = vmatpush.msrb.mxu3 %v867_v26  ;;  %607 = vmatmul.msk.f32.vlgmr.msrb.gmra.mxu0 %vm201_vm0, %v594_v34 }
  0x36   : > { %489 = vmatpush.msra.mxu0 %v733_v6  ;;  %389 = vmatpush.msrb.mxu1 %v889_v29 }
  0x37   : > { %440 = vmatpush.msrb.mxu2 %v860_v25  ;;  %463 = vmatpush.msrb.mxu3 %v881_v28 }
  0x38   : > { %490 = vmatpush.msra.mxu0 %v752_v9  ;;  %619 = vmatmul.msk.f32.vlgmr.msrb.gmra.mxu1 %vm201_vm0, %v608_v35 }
  0x39   : > { %633 = vmatmul.msk.f32.vlgmr.msrb.gmra.mxu2 %vm201_vm0, %v622_v36  ;;  %634 = vmatmul.msk.f32.vlgmr.msrb.gmra.mxu3 %vm201_vm0, %v621_v37 }
  0x3a   : > { %491 = vmatpush.msra.mxu0 %v773_v12 }
  0x3c   : > { %492 = vmatpush.msra.mxu0 %v792_v15 }
  0x3e   : > { %493 = vmatpush.msra.mxu0 %v812_v18 }
  0x40   : > { %494 = vmatpush.msra.mxu0 %v831_v21 }
  0x42   : > { %495 = vmatpush.msra.mxu0 %v855_v24 }
  0x44   : > { %496 = vmatpush.msra.mxu0 %v874_v27 }
  0x46   : > { %497 = vmatpush.msra.mxu0 %v889_v29 }
  0x47   : > { %646 = vmatmul.msk.f32.vlgmr.msra.gmra.mxu0 %vm201_vm0, %v635_v38 }
  0xa6   : > { %v222_v39 = vpop.f32.mrf.mxu0 }
  0xa7   : > { %v245_v40 = vpop.f32.mrf.mxu1 }
  0xa8   : > { %v246_v41 = vadd.f32 %v245_v40, %v222_v39  ;;  %v280_v42 = vpop.f32.mrf.mxu2 }
  0xaa   : > { %v283_v44 = vadd.f32 %v280_v42, %v246_v41 }
  0xac   : > { %v287_v45 = vadd.f32 %v659_v43, %v283_v44 }
  0xae   : > { %v288_v46 = vmax.f32 %v287_v45, 0.0 }
  0xb0   : > { %290 = vst.msk [vmem:[%s175_s6] sm:$0xff] %vm289_vm1, %v288_v46 }
  0xb2   : > { %v334_v47 = vpop.f32.mrf.mxu3  ;;  %v357_v48 = vpop.f32.mrf.mxu0 }
  0xb3   : > { %v358_v49 = vadd.f32 %v357_v48, %v334_v47 }
  0xb5   : > { %v391_v50 = vpop.f32.mrf.mxu1 }
  0xb6   : > { %v394_v51 = vadd.f32 %v391_v50, %v358_v49 }
  0xb8   : > { %v395_v52 = vadd.f32 %v659_v43, %v394_v51 }
  0xba   : > { %v396_v53 = vmax.f32 %v395_v52, 0.0 }
  0xbc   : > { %620 = vst.msk [vmem:[%s175_s6 + $0x8] sm:$0xff] %vm289_vm1, %v396_v53  ;;  %v442_v54 = vpop.f32.mrf.mxu2  ;;  %v465_v55 = vpop.f32.mrf.mxu3 }
  0xbd   : > { %v466_v56 = vadd.f32 %v465_v55, %v442_v54 }
  0xc4   : > { %v499_v57 = vpop.f32.mrf.mxu0 }
  0xc5   : > { %v502_v58 = vadd.f32 %v499_v57, %v466_v56 }
  0xc7   : > { %v503_v59 = vadd.f32 %v659_v43, %v502_v58 }
  0xc9   : > { %v504_v60 = vmax.f32 %v503_v59, 0.0 }
  0xcb   : > { %647 = vst.msk [vmem:[%s175_s6 + $0x10] sm:$0xff] %vm289_vm1, %v504_v60 }
  0xcc PF: > { %s13_s12 = sadd.s32 1, %s666_s12  }
  0xcd   : > { %p10_p4 = scmp.ge.s32.totalorder %s13_s12, 4  }
  0xcf   :  { %12 = sbr.rel (!%p10_p4) target bundleno = 1 (0x1), region = 68 }

// kernel: forward.11
= control target key start
LH: loop header
LB: loop body
LE: loop exit
PB: predicated region body
PF: predicated region fallthrough
CT: control target
= control target key end

     0   :  { %s623_s12 = smov 0   ;;  %s749_s0 = inlined_call_operand.vmem [shape: f32[6,6,48], index: 0, kind: input, shape index: {}]   ;;  %s750_s1 = inlined_call_operand.vmem [shape: f32[3,48,64], index: 1, kind: input, shape index: {}]   ;;  %s751_s2 = inlined_call_operand.vmem [shape: f32[1,64], index: 2, kind: input, shape index: {}]   ;;  %s752_s3 = inlined_call_operand.vmem [shape: f32[6,4,64], index: 3, kind: output, shape index: {}]  }
   0x1 LB: > { %s524_s13 = sadd.s32 4294967295, %s601_s12   ;;  %p528_p0 = scmp.ge.s32.totalorder %s601_s12, 1  ;;  %s601_s12 = sphi %s623_s12, %s13_s12  }
   0x2   : > { %p138_p1 = scmp.lt.s32.totalorder %s601_s12, 3 }
   0x4   : > { %p139_p2 = pnand %p528_p0, %p138_p1 }
   0x5   : > { %s162_s20 = smul.u32 (!%p139_p2), 3, %s524_s13 }
   0x6   : > { %142 = sbr.rel (%p139_p2) target bundleno = 181 (0xb5), region = 32 }
   0x7   : > { %p163_p3 = scmp.lt.s32.totalorder (!%p139_p2), %s162_s20, 5 }
   0xb   : > { %v536_v0 = vld [vmem:[%s750_s1 + $0x58] sm:$0xff]  ;;  %v535_v1 = vld [vmem:[%s750_s1 + $0x50] sm:$0xff]  ;;  %v640_v2 = vld [vmem:[%s750_s1 + $0x88] sm:$0xff]  ;;  %s754_s20 = smov (!%p163_p3, %s162_s20), 5  ;;  %vm190_vm0 = vcmask 392192   ;;  %vm274_vm1 = vcmask 519168  }
   0xc   : > { %204 = vmatpush.msra.mxu0 %v536_v0  ;;  %258 = vmatpush.msra.mxu2 %v640_v2  ;;  %v181_v3 = vld [vmem:[%s750_s1 + $0x28] sm:$0xff]  ;;  %v649_v4 = vld [vmem:[%s750_s1 + $0x80] sm:$0xff]  ;;  %v660_v7 = vld [vmem:[%s750_s1 + $0x78] sm:$0xff]  ;;  %s529_s17 = sshll.u32 %s754_s20, 3  ;;  %s530_s5 = sshll.u32 %s754_s20, 2 }
   0xd   : > { %227 = vmatpush.msra.mxu1 %v181_v3  ;;  %304 = vmatpush.msra.mxu3 %v536_v0  ;;  %v534_v5 = vld [vmem:[%s750_s1 + $0x48] sm:$0xff]  ;;  %v180_v6 = vld [vmem:[%s750_s1 + $0x20] sm:$0xff]  ;;  %v179_v8 = vld [vmem:[%s750_s1 + $0x18] sm:$0xff]  ;;  %s696_s23 = scalar_lea.vmem %s749_s0, %s529_s17  ;;  %s172_s8 = scalar_lea.vmem %s752_s3, %s530_s5 }
   0xe   : > { %205 = vmatpush.msra.mxu0 %v535_v1  ;;  %259 = vmatpush.msra.mxu2 %v649_v4  ;;  %v533_v9 = vld [vmem:[%s750_s1 + $0x40] sm:$0xff]  ;;  %v672_v10 = vld [vmem:[%s750_s1 + $0x70] sm:$0xff]  ;;  %v532_v12 = vld [vmem:[%s750_s1 + $0x38] sm:$0xff] }
   0xf   : > { %228 = vmatpush.msra.mxu1 %v180_v6  ;;  %305 = vmatpush.msra.mxu3 %v535_v1  ;;  %v178_v11 = vld [vmem:[%s750_s1 + $0x10] sm:$0xff]  ;;  %v686_v13 = vld [vmem:[%s750_s1 + $0x68] sm:$0xff]  ;;  %v539_v16 = vld [vmem:[%s750_s1 + $0x60] sm:$0xff] }
  0x10   : > { %206 = vmatpush.msra.mxu0 %v534_v5  ;;  %260 = vmatpush.msra.mxu2 %v660_v7  ;;  %v177_v14 = vld [vmem:[%s750_s1 + $0x8] sm:$0xff]  ;;  %v531_v15 = vld [vmem:[%s750_s1 + $0x30] sm:$0xff]  ;;  %v176_v17 = vld [vmem:[%s750_s1] sm:$0xff] }
  0x11   : > { %229 = vmatpush.msra.mxu1 %v179_v8  ;;  %306 = vmatpush.msra.mxu3 %v534_v5  ;;  %v237_v18 = vld [vmem:[%s696_s23 + $0x2] sm:$0xf]  ;;  %v547_v21 = vld [vmem:[%s696_s23 + $0x9] sm:$0xf]  ;;  %v566_v24 = vld [vmem:[%s696_s23 + $0x11] sm:$0xf] }
  0x12   : > { %207 = vmatpush.msra.mxu0 %v533_v9  ;;  %261 = vmatpush.msra.mxu2 %v672_v10  ;;  %v182_v19 = vld [vmem:[%s696_s23 + $0x1] sm:$0xf]  ;;  %v546_v22 = vld [vmem:[%s696_s23 + $0x8] sm:$0xf]  ;;  %v565_v25 = vld [vmem:[%s696_s23 + $0x10] sm:$0xf] }
  0x13   : > { %230 = vmatpush.msra.mxu1 %v178_v11  ;;  %307 = vmatpush.msra.mxu3 %v533_v9  ;;  %v175_v20 = vld [vmem:[%s696_s23] sm:$0xf]  ;;  %v556_v23 = vld [vmem:[%s696_s23 + $0xa] sm:$0xf]  ;;  %v575_v26 = vld [vmem:[%s696_s23 + $0x12] sm:$0xf] }
  0x14   : > { %208 = vmatpush.msra.mxu0 %v532_v12  ;;  %262 = vmatpush.msra.mxu2 %v686_v13  ;;  %v594_v31 = vld [vmem:[%s751_s2] ss:$0 sm:$0xff] }
  0x15   : > { %231 = vmatpush.msra.mxu1 %v177_v14  ;;  %308 = vmatpush.msra.mxu3 %v532_v12 }
  0x16   : > { %209 = vmatpush.msra.mxu0 %v531_v15  ;;  %263 = vmatpush.msra.mxu2 %v539_v16 }
  0x17   : > { %232 = vmatpush.msra.mxu1 %v176_v17  ;;  %545 = vmatmul.msk.f32.vlgmr.msra.gmra.mxu2 %vm190_vm0, %v237_v18 }
  0x18   : > { %327 = vmatpush.msrb.mxu0 %v181_v3  ;;  %309 = vmatpush.msra.mxu3 %v531_v15 }
  0x19   : > { %357 = vmatpush.msrb.mxu1 %v640_v2  ;;  %400 = vmatpush.msrb.mxu2 %v536_v0 }
  0x1a   : > { %328 = vmatpush.msrb.mxu0 %v180_v6  ;;  %423 = vmatpush.msrb.mxu3 %v181_v3 }
  0x1b   : > { %537 = vmatmul.msk.f32.vlgmr.msra.gmra.mxu0 %vm190_vm0, %v182_v19  ;;  %358 = vmatpush.msrb.mxu1 %v649_v4 }
  0x1c   : > { %329 = vmatpush.msrb.mxu0 %v179_v8  ;;  %401 = vmatpush.msrb.mxu2 %v535_v1 }
  0x1d   : > { %424 = vmatpush.msrb.mxu3 %v180_v6  ;;  %538 = vmatmul.msk.f32.vlgmr.msra.gmra.mxu1 %vm190_vm0, %v175_v20 }
  0x1e   : > { %554 = vmatmul.msk.f32.vlgmr.msra.gmra.mxu3 %vm190_vm0, %v547_v21  ;;  %330 = vmatpush.msrb.mxu0 %v178_v11 }
  0x1f   : > { %359 = vmatpush.msrb.mxu1 %v660_v7  ;;  %402 = vmatpush.msrb.mxu2 %v534_v5 }
  0x20   : > { %425 = vmatpush.msrb.mxu3 %v179_v8  ;;  %331 = vmatpush.msrb.mxu0 %v177_v14 }
  0x21   : > { %360 = vmatpush.msrb.mxu1 %v672_v10  ;;  %403 = vmatpush.msrb.mxu2 %v533_v9 }
  0x22   : > { %426 = vmatpush.msrb.mxu3 %v178_v11  ;;  %332 = vmatpush.msrb.mxu0 %v176_v17 }
  0x23   : > { %361 = vmatpush.msrb.mxu1 %v686_v13  ;;  %404 = vmatpush.msrb.mxu2 %v532_v12 }
  0x24   : > { %427 = vmatpush.msrb.mxu3 %v177_v14  ;;  %453 = vmatpush.msra.mxu0 %v640_v2 }
  0x25   : > { %555 = vmatmul.msk.f32.vlgmr.msrb.gmra.mxu0 %vm190_vm0, %v546_v22  ;;  %362 = vmatpush.msrb.mxu1 %v539_v16 }
  0x26   : > { %405 = vmatpush.msrb.mxu2 %v531_v15  ;;  %428 = vmatpush.msrb.mxu3 %v176_v17 }
  0x27   : > { %454 = vmatpush.msra.mxu0 %v649_v4  ;;  %563 = vmatmul.msk.f32.vlgmr.msrb.gmra.mxu1 %vm190_vm0, %v556_v23 }
  0x28   : > { %573 = vmatmul.msk.f32.vlgmr.msrb.gmra.mxu2 %vm190_vm0, %v566_v24  ;;  %574 = vmatmul.msk.f32.vlgmr.msrb.gmra.mxu3 %vm190_vm0, %v565_v25 }
  0x29   : > { %455 = vmatpush.msra.mxu0 %v660_v7 }
  0x2b   : > { %456 = vmatpush.msra.mxu0 %v672_v10 }
  0x2d   : > { %457 = vmatpush.msra.mxu0 %v686_v13 }
  0x2f   : > { %458 = vmatpush.msra.mxu0 %v539_v16 }
  0x30   : > { %582 = vmatmul.msk.f32.vlgmr.msra.gmra.mxu0 %vm190_vm0, %v575_v26 }
  0x98   : > { %v211_v27 = vpop.f32.mrf.mxu0 }
  0x9a   : > { %v234_v28 = vpop.f32.mrf.mxu1  ;;  %v265_v30 = vpop.f32.mrf.mxu2 }
  0x9b   : > { %v235_v29 = vadd.f32 %v234_v28, %v211_v27 }
  0x9d   : > { %v268_v32 = vadd.f32 %v265_v30, %v235_v29 }
  0x9f   : > { %v272_v33 = vadd.f32 %v594_v31, %v268_v32 }
  0xa1   : > { %v273_v34 = vmax.f32 %v272_v33, 0.0  ;;  %v311_v35 = vpop.f32.mrf.mxu3 }
  0xa2   : > { %v334_v36 = vpop.f32.mrf.mxu0 }
  0xa3   : > { %275 = vst.msk [vmem:[%s172_s8] sm:$0xf] %vm274_vm1, %v273_v34  ;;  %v335_v37 = vadd.f32 %v334_v36, %v311_v35 }
  0xa4   : > { %v364_v38 = vpop.f32.mrf.mxu1 }
  0xa5   : > { %v367_v39 = vadd.f32 %v364_v38, %v335_v37 }
  0xa7   : > { %v368_v40 = vadd.f32 %v594_v31, %v367_v39 }
  0xa9   : > { %v369_v41 = vmax.f32 %v368_v40, 0.0 }
  0xab   : > { %564 = vst.msk [vmem:[%s172_s8 + $0x4] sm:$0xf] %vm274_vm1, %v369_v41  ;;  %v407_v42 = vpop.f32.mrf.mxu2  ;;  %v430_v43 = vpop.f32.mrf.mxu3 }
  0xac   : > { %v431_v44 = vadd.f32 %v430_v43, %v407_v42 }
  0xad   : > { %v460_v45 = vpop.f32.mrf.mxu0 }
  0xae   : > { %v463_v46 = vadd.f32 %v460_v45, %v431_v44 }
  0xb0   : > { %v464_v47 = vadd.f32 %v594_v31, %v463_v46 }
  0xb2   : > { %v465_v48 = vmax.f32 %v464_v47, 0.0 }
  0xb4   : > { %583 = vst.msk [vmem:[%s172_s8 + $0x8] sm:$0xf] %vm274_vm1, %v465_v48 }
  0xb5 PF: > { %s13_s12 = sadd.s32 1, %s601_s12  }
  0xb6   : > { %p10_p4 = scmp.ge.s32.totalorder %s13_s12, 4  }
  0xb8   :  { %12 = sbr.rel (!%p10_p4) target bundleno = 1 (0x1), region = 68 }

// kernel: forward.12
= control target key start
LH: loop header
LB: loop body
LE: loop exit
PB: predicated region body
PF: predicated region fallthrough
CT: control target
= control target key end

     0   :  { %s713_s12 = smov 0   ;;  %s1056_s0 = inlined_call_operand.vmem [shape: f32[6,6,96], index: 0, kind: input, shape index: {}]   ;;  %s1057_s1 = inlined_call_operand.vmem [shape: f32[3,96,64], index: 1, kind: input, shape index: {}]   ;;  %s1058_s2 = inlined_call_operand.vmem [shape: f32[1,64], index: 2, kind: input, shape index: {}]   ;;  %s1059_s3 = inlined_call_operand.vmem [shape: f32[6,4,64], index: 3, kind: output, shape index: {}]  }
   0x1 LB: > { %s578_s13 = sadd.s32 4294967295, %s691_s12   ;;  %p582_p0 = scmp.ge.s32.totalorder %s691_s12, 1  ;;  %s691_s12 = sphi %s713_s12, %s13_s12  }
   0x2   : > { %p138_p1 = scmp.lt.s32.totalorder %s691_s12, 3 }
   0x4   : > { %p139_p2 = pnand %p582_p0, %p138_p1 }
   0x5   : > { %s831_s25 = smul.u32 (!%p139_p2), 3, %s578_s13 }
   0x6   : > { %142 = sbr.rel (%p139_p2) target bundleno = 216 (0xd8), region = 32 }
   0x7   : > { %p163_p3 = scmp.lt.s32.totalorder (!%p139_p2), %s831_s25, 5 }
   0xb   : > { %v724_v0 = vld [vmem:[%s1057_s1 + $0xb8] sm:$0xff]  ;;  %v729_v1 = vld [vmem:[%s1057_s1 + $0xb0] sm:$0xff]  ;;  %v736_v2 = vld [vmem:[%s1057_s1 + $0xa8] sm:$0xff]  ;;  %s1061_s25 = smov (!%p163_p3, %s831_s25), 5  ;;  %vm202_vm0 = vcmask 785408   ;;  %vm292_vm1 = vcmask 519168  }
   0xc   : > { %210 = vmatpush.msra.mxu0 %v724_v0  ;;  %328 = vmatpush.msra.mxu3 %v724_v0  ;;  %v741_v3 = vld [vmem:[%s1057_s1 + $0x58] sm:$0xff]  ;;  %v753_v5 = vld [vmem:[%s1057_s1 + $0x50] sm:$0xff]  ;;  %v758_v6 = vld [vmem:[%s1057_s1 + $0xa0] sm:$0xff]  ;;  %s583_s7 = sshll.u32 %s1061_s25, 3  ;;  %s584_s17 = sshll.u32 %s1061_s25, 2 }
   0xd   : > { %233 = vmatpush.msra.mxu1 %v741_v3  ;;  %v748_v4 = vld [vmem:[%s1057_s1 + $0x118] sm:$0xff]  ;;  %v764_v7 = vld [vmem:[%s1057_s1 + $0x110] sm:$0xff]  ;;  %v770_v8 = vld [vmem:[%s1057_s1 + $0x48] sm:$0xff]  ;;  %s963_s14 = scalar_lea.vmem %s1056_s0, %s583_s7  ;;  %s172_s20 = scalar_lea.vmem %s1059_s3, %s584_s17 }
   0xe   : > { %211 = vmatpush.msra.mxu0 %v729_v1  ;;  %270 = vmatpush.msra.mxu2 %v748_v4  ;;  %v777_v9 = vld [vmem:[%s1057_s1 + $0x108] sm:$0xff]  ;;  %v782_v10 = vld [vmem:[%s1057_s1 + $0x98] sm:$0xff]  ;;  %v789_v11 = vld [vmem:[%s1057_s1 + $0x40] sm:$0xff] }
   0xf   : > { %329 = vmatpush.msra.mxu3 %v729_v1  ;;  %234 = vmatpush.msra.mxu1 %v753_v5  ;;  %v796_v12 = vld [vmem:[%s1057_s1 + $0x100] sm:$0xff]  ;;  %v801_v13 = vld [vmem:[%s1057_s1 + $0x90] sm:$0xff]  ;;  %v808_v14 = vld [vmem:[%s1057_s1 + $0x38] sm:$0xff] }
  0x10   : > { %212 = vmatpush.msra.mxu0 %v736_v2  ;;  %271 = vmatpush.msra.mxu2 %v764_v7  ;;  %v815_v15 = vld [vmem:[%s1057_s1 + $0xf8] sm:$0xff]  ;;  %v820_v16 = vld [vmem:[%s1057_s1 + $0x88] sm:$0xff]  ;;  %v827_v17 = vld [vmem:[%s1057_s1 + $0x30] sm:$0xff] }
  0x11   : > { %330 = vmatpush.msra.mxu3 %v736_v2  ;;  %235 = vmatpush.msra.mxu1 %v770_v8  ;;  %v838_v18 = vld [vmem:[%s1057_s1 + $0xf0] sm:$0xff]  ;;  %v843_v19 = vld [vmem:[%s1057_s1 + $0x80] sm:$0xff]  ;;  %v850_v20 = vld [vmem:[%s1057_s1 + $0x28] sm:$0xff] }
  0x12   : > { %213 = vmatpush.msra.mxu0 %v758_v6  ;;  %272 = vmatpush.msra.mxu2 %v777_v9  ;;  %v857_v21 = vld [vmem:[%s1057_s1 + $0xe8] sm:$0xff]  ;;  %v862_v22 = vld [vmem:[%s1057_s1 + $0x78] sm:$0xff]  ;;  %v869_v23 = vld [vmem:[%s1057_s1 + $0x20] sm:$0xff] }
  0x13   : > { %331 = vmatpush.msra.mxu3 %v758_v6  ;;  %236 = vmatpush.msra.mxu1 %v789_v11  ;;  %v877_v24 = vld [vmem:[%s1057_s1 + $0xe0] sm:$0xff]  ;;  %v882_v25 = vld [vmem:[%s1057_s1 + $0x70] sm:$0xff]  ;;  %v889_v26 = vld [vmem:[%s1057_s1 + $0x18] sm:$0xff] }
  0x14   : > { %214 = vmatpush.msra.mxu0 %v782_v10  ;;  %273 = vmatpush.msra.mxu2 %v796_v12  ;;  %v896_v27 = vld [vmem:[%s1057_s1 + $0xd8] sm:$0xff]  ;;  %v901_v28 = vld [vmem:[%s1057_s1 + $0x68] sm:$0xff]  ;;  %v908_v29 = vld [vmem:[%s1057_s1 + $0x10] sm:$0xff] }
  0x15   : > { %332 = vmatpush.msra.mxu3 %v782_v10  ;;  %237 = vmatpush.msra.mxu1 %v808_v14  ;;  %v920_v30 = vld [vmem:[%s1057_s1 + $0xd0] sm:$0xff]  ;;  %v925_v31 = vld [vmem:[%s1057_s1 + $0x60] sm:$0xff]  ;;  %v932_v32 = vld [vmem:[%s1057_s1 + $0x8] sm:$0xff] }
  0x16   : > { %215 = vmatpush.msra.mxu0 %v801_v13  ;;  %274 = vmatpush.msra.mxu2 %v815_v15  ;;  %v939_v33 = vld [vmem:[%s1057_s1 + $0xc8] sm:$0xff]  ;;  %v946_v34 = vld [vmem:[%s1057_s1] sm:$0xff]  ;;  %v644_v42 = vld [vmem:[%s963_s14 + $0x11] sm:$0xf] }
  0x17   : > { %333 = vmatpush.msra.mxu3 %v801_v13  ;;  %238 = vmatpush.msra.mxu1 %v827_v17  ;;  %v954_v35 = vld [vmem:[%s1057_s1 + $0xc0] sm:$0xff]  ;;  %v613_v39 = vld [vmem:[%s963_s14 + $0x9] sm:$0xf]  ;;  %v643_v43 = vld [vmem:[%s963_s14 + $0x10] sm:$0xf] }
  0x18   : > { %216 = vmatpush.msra.mxu0 %v820_v16  ;;  %275 = vmatpush.msra.mxu2 %v838_v18  ;;  %v249_v36 = vld [vmem:[%s963_s14 + $0x2] sm:$0xf]  ;;  %v612_v40 = vld [vmem:[%s963_s14 + $0x8] sm:$0xf]  ;;  %v659_v44 = vld [vmem:[%s963_s14 + $0x12] sm:$0xf] }
  0x19   : > { %334 = vmatpush.msra.mxu3 %v820_v16  ;;  %239 = vmatpush.msra.mxu1 %v850_v20  ;;  %v188_v37 = vld [vmem:[%s963_s14 + $0x1] sm:$0xf]  ;;  %v628_v41 = vld [vmem:[%s963_s14 + $0xa] sm:$0xf]  ;;  %v684_v49 = vld [vmem:[%s1058_s2] ss:$0 sm:$0xff] }
  0x1a   : > { %217 = vmatpush.msra.mxu0 %v843_v19  ;;  %276 = vmatpush.msra.mxu2 %v857_v21  ;;  %v175_v38 = vld [vmem:[%s963_s14] sm:$0xf] }
  0x1b   : > { %335 = vmatpush.msra.mxu3 %v843_v19  ;;  %240 = vmatpush.msra.mxu1 %v869_v23 }
  0x1c   : > { %218 = vmatpush.msra.mxu0 %v862_v22  ;;  %277 = vmatpush.msra.mxu2 %v877_v24 }
  0x1d   : > { %336 = vmatpush.msra.mxu3 %v862_v22  ;;  %241 = vmatpush.msra.mxu1 %v889_v26 }
  0x1e   : > { %219 = vmatpush.msra.mxu0 %v882_v25  ;;  %278 = vmatpush.msra.mxu2 %v896_v27 }
  0x1f   : > { %337 = vmatpush.msra.mxu3 %v882_v25  ;;  %242 = vmatpush.msra.mxu1 %v908_v29 }
  0x20   : > { %220 = vmatpush.msra.mxu0 %v901_v28  ;;  %279 = vmatpush.msra.mxu2 %v920_v30 }
  0x21   : > { %338 = vmatpush.msra.mxu3 %v901_v28  ;;  %243 = vmatpush.msra.mxu1 %v932_v32 }
  0x22   : > { %221 = vmatpush.msra.mxu0 %v925_v31  ;;  %280 = vmatpush.msra.mxu2 %v939_v33 }
  0x23   : > { %244 = vmatpush.msra.mxu1 %v946_v34  ;;  %339 = vmatpush.msra.mxu3 %v925_v31 }
  0x24   : > { %351 = vmatpush.msrb.mxu0 %v741_v3  ;;  %281 = vmatpush.msra.mxu2 %v954_v35 }
  0x25   : > { %387 = vmatpush.msrb.mxu1 %v748_v4  ;;  %465 = vmatpush.msrb.mxu3 %v741_v3 }
  0x26   : > { %352 = vmatpush.msrb.mxu0 %v753_v5  ;;  %442 = vmatpush.msrb.mxu2 %v724_v0 }
  0x27   : > { %388 = vmatpush.msrb.mxu1 %v764_v7  ;;  %466 = vmatpush.msrb.mxu3 %v753_v5 }
  0x28   : > { %353 = vmatpush.msrb.mxu0 %v770_v8  ;;  %443 = vmatpush.msrb.mxu2 %v729_v1 }
  0x29   : > { %611 = vmatmul.msk.f32.vlgmr.msra.gmra.mxu2 %vm202_vm0, %v249_v36  ;;  %389 = vmatpush.msrb.mxu1 %v777_v9 }
  0x2a   : > { %354 = vmatpush.msrb.mxu0 %v789_v11  ;;  %444 = vmatpush.msrb.mxu2 %v736_v2 }
  0x2b   : > { %467 = vmatpush.msrb.mxu3 %v770_v8  ;;  %390 = vmatpush.msrb.mxu1 %v796_v12 }
  0x2c   : > { %355 = vmatpush.msrb.mxu0 %v808_v14  ;;  %445 = vmatpush.msrb.mxu2 %v758_v6 }
  0x2d   : > { %468 = vmatpush.msrb.mxu3 %v789_v11  ;;  %597 = vmatmul.msk.f32.vlgmr.msra.gmra.mxu0 %vm202_vm0, %v188_v37 }
  0x2e   : > { %356 = vmatpush.msrb.mxu0 %v827_v17  ;;  %598 = vmatmul.msk.f32.vlgmr.msra.gmra.mxu1 %vm202_vm0, %v175_v38 }
  0x2f   : > { %391 = vmatpush.msrb.mxu1 %v815_v15  ;;  %446 = vmatpush.msrb.mxu2 %v782_v10 }
  0x30   : > { %357 = vmatpush.msrb.mxu0 %v850_v20  ;;  %469 = vmatpush.msrb.mxu3 %v808_v14 }
  0x31   : > { %392 = vmatpush.msrb.mxu1 %v838_v18  ;;  %447 = vmatpush.msrb.mxu2 %v801_v13 }
  0x32   : > { %358 = vmatpush.msrb.mxu0 %v869_v23  ;;  %470 = vmatpush.msrb.mxu3 %v827_v17 }
  0x33   : > { %393 = vmatpush.msrb.mxu1 %v857_v21  ;;  %448 = vmatpush.msrb.mxu2 %v820_v16 }
  0x34   : > { %359 = vmatpush.msrb.mxu0 %v889_v26  ;;  %471 = vmatpush.msrb.mxu3 %v850_v20 }
  0x35   : > { %394 = vmatpush.msrb.mxu1 %v877_v24  ;;  %449 = vmatpush.msrb.mxu2 %v843_v19 }
  0x36   : > { %360 = vmatpush.msrb.mxu0 %v908_v29  ;;  %472 = vmatpush.msrb.mxu3 %v869_v23 }
  0x37   : > { %626 = vmatmul.msk.f32.vlgmr.msra.gmra.mxu3 %vm202_vm0, %v613_v39  ;;  %395 = vmatpush.msrb.mxu1 %v896_v27 }
  0x38   : > { %361 = vmatpush.msrb.mxu0 %v932_v32  ;;  %450 = vmatpush.msrb.mxu2 %v862_v22 }
  0x39   : > { %473 = vmatpush.msrb.mxu3 %v889_v26  ;;  %396 = vmatpush.msrb.mxu1 %v920_v30 }
  0x3a   : > { %362 = vmatpush.msrb.mxu0 %v946_v34  ;;  %451 = vmatpush.msrb.mxu2 %v882_v25 }
  0x3b   : > { %474 = vmatpush.msrb.mxu3 %v908_v29  ;;  %397 = vmatpush.msrb.mxu1 %v939_v33 }
  0x3c   : > { %501 = vmatpush.msra.mxu0 %v748_v4  ;;  %452 = vmatpush.msrb.mxu2 %v901_v28 }
  0x3d   : > { %475 = vmatpush.msrb.mxu3 %v932_v32  ;;  %627 = vmatmul.msk.f32.vlgmr.msrb.gmra.mxu0 %vm202_vm0, %v612_v40 }
  0x3e   : > { %502 = vmatpush.msra.mxu0 %v764_v7  ;;  %398 = vmatpush.msrb.mxu1 %v954_v35 }
  0x3f   : > { %453 = vmatpush.msrb.mxu2 %v925_v31  ;;  %476 = vmatpush.msrb.mxu3 %v946_v34 }
  0x40   : > { %503 = vmatpush.msra.mxu0 %v777_v9  ;;  %641 = vmatmul.msk.f32.vlgmr.msrb.gmra.mxu1 %vm202_vm0, %v628_v41 }
  0x41   : > { %657 = vmatmul.msk.f32.vlgmr.msrb.gmra.mxu2 %vm202_vm0, %v644_v42  ;;  %658 = vmatmul.msk.f32.vlgmr.msrb.gmra.mxu3 %vm202_vm0, %v643_v43 }
  0x42   : > { %504 = vmatpush.msra.mxu0 %v796_v12 }
  0x44   : > { %505 = vmatpush.msra.mxu0 %v815_v15 }
  0x46   : > { %506 = vmatpush.msra.mxu0 %v838_v18 }
  0x48   : > { %507 = vmatpush.msra.mxu0 %v857_v21 }
  0x4a   : > { %508 = vmatpush.msra.mxu0 %v877_v24 }
  0x4c   : > { %509 = vmatpush.msra.mxu0 %v896_v27 }
  0x4e   : > { %510 = vmatpush.msra.mxu0 %v920_v30 }
  0x50   : > { %511 = vmatpush.msra.mxu0 %v939_v33 }
  0x52   : > { %512 = vmatpush.msra.mxu0 %v954_v35 }
  0x53   : > { %672 = vmatmul.msk.f32.vlgmr.msra.gmra.mxu0 %vm202_vm0, %v659_v44 }
  0xaa   : > { %v223_v45 = vpop.f32.mrf.mxu0 }
  0xab   : > { %v246_v46 = vpop.f32.mrf.mxu1 }
  0xac   : > { %v247_v47 = vadd.f32 %v246_v46, %v223_v45  ;;  %v283_v48 = vpop.f32.mrf.mxu2 }
  0xae   : > { %v286_v50 = vadd.f32 %v283_v48, %v247_v47 }
  0xb0   : > { %v290_v51 = vadd.f32 %v684_v49, %v286_v50 }
  0xb2   : > { %v291_v52 = vmax.f32 %v290_v51, 0.0 }
  0xb4   : > { %293 = vst.msk [vmem:[%s172_s20] sm:$0xf] %vm292_vm1, %v291_v52 }
  0xba   : > { %v341_v53 = vpop.f32.mrf.mxu3  ;;  %v364_v54 = vpop.f32.mrf.mxu0 }
  0xbb   : > { %v365_v55 = vadd.f32 %v364_v54, %v341_v53 }
  0xbd   : > { %v400_v56 = vpop.f32.mrf.mxu1 }
  0xbe   : > { %v403_v57 = vadd.f32 %v400_v56, %v365_v55 }
  0xc0   : > { %v404_v58 = vadd.f32 %v684_v49, %v403_v57 }
  0xc2   : > { %v405_v59 = vmax.f32 %v404_v58, 0.0 }
  0xc4   : > { %642 = vst.msk [vmem:[%s172_s20 + $0x4] sm:$0xf] %vm292_vm1, %v405_v59  ;;  %v455_v60 = vpop.f32.mrf.mxu2  ;;  %v478_v61 = vpop.f32.mrf.mxu3 }
  0xc5   : > { %v479_v62 = vadd.f32 %v478_v61, %v455_v60 }
  0xd0   : > { %v514_v63 = vpop.f32.mrf.mxu0 }
  0xd1   : > { %v517_v0 = vadd.f32 %v514_v63, %v479_v62 }
  0xd3   : > { %v518_v1 = vadd.f32 %v684_v49, %v517_v0 }
  0xd5   : > { %v519_v2 = vmax.f32 %v518_v1, 0.0 }
  0xd7   : > { %673 = vst.msk [vmem:[%s172_s20 + $0x8] sm:$0xf] %vm292_vm1, %v519_v2 }
  0xd8 PF: > { %s13_s12 = sadd.s32 1, %s691_s12  }
  0xd9   : > { %p10_p4 = scmp.ge.s32.totalorder %s13_s12, 4  }
  0xdb   :  { %12 = sbr.rel (!%p10_p4) target bundleno = 1 (0x1), region = 68 }

// kernel: forward.13
= control target key start
LH: loop header
LB: loop body
LE: loop exit
PB: predicated region body
PF: predicated region fallthrough
CT: control target
= control target key end

     0   :  { %vm39_vm0 = vcmask 523264   ;;  %vm72_vm1 = vcmask 261120   ;;  %vm103_vm2 = vcmask 130048   ;;  %vm127_vm3 = vcmask 78848   ;;  %s236_s1 = inlined_call_operand.vmem [shape: f32[64,32], index: 1, kind: input, shape index: {}]   ;;  %s237_s3 = inlined_call_operand.vmem [shape: f32[32,16], index: 3, kind: input, shape index: {}]   ;;  %s238_s2 = inlined_call_operand.vmem [shape: f32[1,32], index: 2, kind: input, shape index: {}]   ;;  %s239_s0 = inlined_call_operand.vmem [shape: f32[6,64], index: 0, kind: input, shape index: {}]   ;;  %s240_s4 = inlined_call_operand.vmem [shape: f32[1,16], index: 4, kind: input, shape index: {}]   ;;  %s241_s6 = inlined_call_operand.vmem [shape: f32[1,10], index: 6, kind: input, shape index: {}]   ;;  %s242_s5 = inlined_call_operand.vmem [shape: f32[16,10], index: 5, kind: input, shape index: {}]   ;;  %s243_s7 = inlined_call_operand.vmem [shape: f32[6,10], index: 7, kind: output, shape index: {}]  }
   0x1   :  { %v34_v0 = vld [vmem:[%s236_s1 + $0x38] sm:$0xff]  ;;  %v33_v1 = vld [vmem:[%s236_s1 + $0x30] sm:$0xff]  ;;  %v32_v2 = vld [vmem:[%s236_s1 + $0x28] sm:$0xff] }
   0x2   :  { %51 = vmatpush.msra.mxu0 %v34_v0  ;;  %v67_v3 = vld [vmem:[%s237_s3 + $0x18] sm:$0xff]  ;;  %v31_v4 = vld [vmem:[%s236_s1 + $0x20] sm:$0xff]  ;;  %v29_v6 = vld [vmem:[%s236_s1 + $0x10] sm:$0xff] }
   0x3   :  { %88 = vmatpush.msra.mxu1 %v67_v3  ;;  %v30_v5 = vld [vmem:[%s236_s1 + $0x18] sm:$0xff]  ;;  %v28_v7 = vld [vmem:[%s236_s1 + $0x8] sm:$0xff]  ;;  %v27_v8 = vld [vmem:[%s236_s1] sm:$0xff] }
   0x4   :  { %52 = vmatpush.msra.mxu0 %v33_v1  ;;  %v26_v9 = vld [vmem:[%s239_s0] sm:$0x3f]  ;;  %v66_v10 = vld [vmem:[%s237_s3 + $0x10] sm:$0xff]  ;;  %v65_v11 = vld [vmem:[%s237_s3 + $0x8] sm:$0xff] }
   0x5   :  { %89 = vmatpush.msra.mxu1 %v66_v10  ;;  %v64_v12 = vld [vmem:[%s237_s3] sm:$0xff]  ;;  %v98_v17 = vld [vmem:[%s242_s5 + $0x8] sm:$0xff] }
   0x6   :  { %53 = vmatpush.msra.mxu0 %v32_v2  ;;  %v136_v13 = vld [vmem:[%s238_s2] ss:$0 sm:$0xff]  ;;  %121 = vmatpush.msra.mxu2 %v98_v17 }
   0x7   :  { %90 = vmatpush.msra.mxu1 %v65_v11  ;;  %v97_v18 = vld [vmem:[%s242_s5] sm:$0xff] }
   0x8   :  { %54 = vmatpush.msra.mxu0 %v31_v4  ;;  %122 = vmatpush.msra.mxu2 %v97_v18  ;;  %v137_v19 = vld [vmem:[%s240_s4] ss:$0 sm:$0xff] }
   0x9   :  { %91 = vmatpush.msra.mxu1 %v64_v12  ;;  %v138_v23 = vld [vmem:[%s241_s6] ss:$0 sm:$0xff] }
   0xa   :  { %55 = vmatpush.msra.mxu0 %v30_v5 }
   0xc   :  { %56 = vmatpush.msra.mxu0 %v29_v6 }
   0xe   :  { %57 = vmatpush.msra.mxu0 %v28_v7 }
  0x10   :  { %58 = vmatpush.msra.mxu0 %v27_v8 }
  0x11   :  { %133 = vmatmul.msk.f32.vlgmr.msra.gmra.mxu0 %vm39_vm0, %v26_v9 }
  0x8e   :  { %v60_v14 = vpop.f32.mrf.mxu0 }
  0x8f   :  { %v61_v15 = vadd.f32 %v136_v13, %v60_v14 }
  0x91   :  { %v63_v16 = vmax.f32 %v61_v15, 0.0 }
  0x93   :  { %134 = vmatmul.msk.f32.vlgmr.msra.gmra.mxu1 %vm72_vm1, %v63_v16 }
 0x110   :  { %v93_v20 = vpop.f32.mrf.mxu1 }
 0x111   :  { %v94_v21 = vadd.f32 %v137_v19, %v93_v20 }
 0x113   :  { %v96_v22 = vmax.f32 %v94_v21, 0.0 }
 0x115   :  { %135 = vmatmul.msk.f32.vlgmr.msra.gmra.mxu2 %vm103_vm2, %v96_v22 }
 0x198   :  { %v124_v24 = vpop.f32.mrf.mxu2 }
 0x199   :  { %v125_v25 = vadd.f32 %v138_v23, %v124_v24 }
 0x19b   :  { %128 = vst.msk [vmem:[%s243_s7] sm:$0x3f] %vm127_vm3, %v125_v25 }

</bundles_post_ra>
